<compile_context>
chip_gen: v6e
topology: v6e:2x2x1
jax: 0.10.0
libtpu: 0.0.40
codegen_flags: <defaults>
</compile_context>

<pallas_src>
import functools

import jax
import jax.numpy as jnp
from jax.experimental import pallas as pl
from jax.experimental.pallas import tpu as pltpu

K = 3          # Conv1d kernel size used by TargetRepresentation
OUT_CH = 96    # conv out_channels / final Linear out_features
C_PAD = 128    # channel padding -> lane-dense tiles, full MXU columns


# ----------------------------------------------------------------------------
# Fused kernel: one grid step = tile_b batch rows, whole forward.
# refs = (emb, w_first, b_first, [w, b] per deeper conv layer, lin_w, lin_b, out)
#   emb     : (tile_b*L, C)        bf16  batch-major segments of length L
#   w_first : (K, C, block_num*C)  bf16  first conv layer of every block, N-fused
#   b_first : (1, block_num*C)     f32
#   w       : (K, C, C)            bf16  one deeper conv layer (per-tap matrices)
#   b       : (1, C)               f32
#   lin_w   : (block_num*C, C)     bf16
#   lin_b   : (1, C)               f32
#   out     : (tile_b, C)          f32
# ----------------------------------------------------------------------------
def _fused_kernel(*refs, block_num, tile_b, L, C):
    emb_ref, w0_ref, b0_ref = refs[0], refs[1], refs[2]
    lin_w_ref, lin_b_ref, o_ref = refs[-3], refs[-2], refs[-1]
    deep_refs = refs[3:-3]

    M = tile_b * L
    x0 = emb_ref[...]                               # (M, C) bf16
    x0_f32 = x0.astype(jnp.float32)

    def shifted(h32, k):
        # Row j of the result holds h32[j + k].  The wrapped rows (per-segment
        # positions >= L - k) are garbage, but valid conv outputs never read
        # them and they are masked out before the max-pool.  f32 keeps the
        # sublane roll on the plain 32-bit XLU path (no packed-dtype repacking).
        return h32 if k == 0 else pltpu.roll(h32, M - k, axis=0)

    # --- first conv layer of every block, fused along the MXU N dimension ----
    acc0 = jnp.zeros((M, block_num * C), jnp.float32)
    for k in range(K):
        hk = x0 if k == 0 else shifted(x0_f32, k).astype(jnp.bfloat16)
        acc0 = acc0 + jnp.dot(hk, w0_ref[k], preferred_element_type=jnp.float32)
    h_first = jnp.maximum(acc0 + b0_ref[...], 0.0)  # (M, block_num*C) f32

    # Per-segment row position, used to mask the shrunk rows at pool time.
    pos = jax.lax.broadcasted_iota(jnp.int32, (tile_b, L, C), 1)

    pooled = []
    idx = 0
    for blk in range(block_num):
        h = h_first[:, blk * C:(blk + 1) * C]       # lane-aligned 128-wide slice
        for _ in range(blk):                        # remaining conv+ReLU layers
            w_ref, b_ref = deep_refs[idx], deep_refs[idx + 1]
            idx += 2
            acc = jnp.zeros((M, C), jnp.float32)
            for k in range(K):
                hk = shifted(h, k).astype(jnp.bfloat16)
                acc = acc + jnp.dot(hk, w_ref[k], preferred_element_type=jnp.float32)
            h = jnp.maximum(acc + b_ref[...], 0.0)
        # AdaptiveMaxPool1d(1): per-segment max over the valid rows only.
        lcur = L - (K - 1) * (blk + 1)
        h3 = h.reshape(tile_b, L, C)
        pooled.append(jnp.max(jnp.where(pos < lcur, h3, -jnp.inf), axis=1))
    # Feature "concat" is just lane offsets; final Linear is the epilogue.
    feats = jnp.concatenate(pooled, axis=-1).astype(jnp.bfloat16)   # (tile_b, bn*C)
    out = jnp.dot(feats, lin_w_ref[...], preferred_element_type=jnp.float32)
    o_ref[...] = out + lin_b_ref[...]


# ----------------------------------------------------------------------------
# Parameter init (PyTorch layouts, f32) and one-time layout preparation.
# ----------------------------------------------------------------------------
def init_params(key, block_num, vocab_size, embedding_num, out_ch=OUT_CH):
    k_emb, k_blocks, k_lin = jax.random.split(key, 3)
    emb = 0.1 * jax.random.normal(k_emb, (vocab_size, embedding_num), jnp.float32)
    emb = emb.at[0].set(0.0)                           # padding_idx=0
    blocks = []
    k = k_blocks
    for bi in range(block_num):
        layers = []
        cin = embedding_num
        for _ in range(bi + 1):                        # StackCNN(bi+1 conv layers)
            k, kw, kb = jax.random.split(k, 3)
            w = 0.1 * jax.random.normal(kw, (out_ch, cin, K), jnp.float32)
            b = 0.1 * jax.random.normal(kb, (out_ch,), jnp.float32)
            layers.append((w, b))
            cin = out_ch
        blocks.append(layers)
    kw, kb = jax.random.split(k_lin)
    lin_w = 0.1 * jax.random.normal(kw, (out_ch, block_num * out_ch), jnp.float32)
    lin_b = 0.1 * jax.random.normal(kb, (out_ch,), jnp.float32)
    return {"embedding": emb, "blocks": blocks, "lin_w": lin_w, "lin_b": lin_b}


def prepare_params(params, C=C_PAD):
    """One-time: pad channels to 128, per-tap weight layout, N-fused first layer, bf16."""
    emb = params["embedding"]                                   # (V, E)
    V, E = emb.shape
    emb_pad = jnp.pad(emb, ((0, 0), (0, C - E)))                # (V, 128) f32

    block_num = len(params["blocks"])
    w_first = jnp.zeros((K, C, block_num * C), jnp.float32)
    b_first = jnp.zeros((1, block_num * C), jnp.float32)
    deep = []                                                   # [(K,C,C) bf16, (1,C) f32]
    for blk, layers in enumerate(params["blocks"]):
        w, b = layers[0]                                        # (96, E, 3), (96,)
        cin = w.shape[1]
        for k in range(K):
            w_first = w_first.at[k, :cin, blk * C: blk * C + OUT_CH].set(w[:, :, k].T)
        b_first = b_first.at[0, blk * C: blk * C + OUT_CH].set(b)
        for (w, b) in layers[1:]:                               # (96, 96, 3), (96,)
            ws = jnp.zeros((K, C, C), jnp.float32)
            for k in range(K):
                ws = ws.at[k, :OUT_CH, :OUT_CH].set(w[:, :, k].T)
            deep.append((ws.astype(jnp.bfloat16),
                         jnp.pad(b, (0, C - OUT_CH)).reshape(1, C)))

    lin_w = params["lin_w"]                                     # (96, block_num*96)
    lw = jnp.zeros((block_num * C, C), jnp.float32)
    for blk in range(block_num):
        lw = lw.at[blk * C: blk * C + OUT_CH, :OUT_CH].set(
            lin_w[:, blk * OUT_CH:(blk + 1) * OUT_CH].T)
    lb = jnp.pad(params["lin_b"], (0, C - OUT_CH)).reshape(1, C)
    return {"emb": emb_pad,
            "w_first": w_first.astype(jnp.bfloat16), "b_first": b_first,
            "deep": deep,
            "lin_w": lw.astype(jnp.bfloat16), "lin_b": lb,
            "block_num": block_num}


# ----------------------------------------------------------------------------
# Forward pass: one fused pallas_call, gridded over batch tiles.
# ----------------------------------------------------------------------------
def target_representation_forward(tokens, prep, tile_b=8):
    # At production shapes pick tile_b so tile_b*L lands around 256-512 (MXU row
    # utilization) while keeping tile_b a multiple of 8 (sublane-dense blocks).
    B, L = tokens.shape
    C = C_PAD
    block_num = prep["block_num"]
    assert L - block_num * (K - 1) >= 1, "sequence too short for deepest block"
    assert tile_b % 8 == 0

    # Pad batch to a multiple of tile_b with token 0 (padding_idx) rows; the
    # padded rows are computed but sliced off the output (no in-kernel masking).
    b_pad = ((B + tile_b - 1) // tile_b) * tile_b
    if b_pad != B:
        tokens = jnp.pad(tokens, ((0, b_pad - B), (0, 0)))

    # Embedding gather stays in XLA (glue); bf16 halves the HBM->VMEM bytes of
    # the largest kernel input.
    # TODO(synk): at production B*L, move the gather in-kernel via
    # PrefetchScalarGridSpec + row gather to avoid the extra HBM round trip.
    emb = prep["emb"][tokens].astype(jnp.bfloat16).reshape(b_pad * L, C)

    inputs = [emb, prep["w_first"], prep["b_first"]]
    in_specs = [
        pl.BlockSpec((tile_b * L, C), lambda i: (i, 0)),
        pl.BlockSpec(prep["w_first"].shape, lambda i: (0, 0, 0)),
        pl.BlockSpec(prep["b_first"].shape, lambda i: (0, 0)),
    ]
    for (w, b) in prep["deep"]:
        inputs += [w, b]
        in_specs += [pl.BlockSpec(w.shape, lambda i: (0, 0, 0)),
                     pl.BlockSpec(b.shape, lambda i: (0, 0))]
    inputs += [prep["lin_w"], prep["lin_b"]]
    in_specs += [pl.BlockSpec(prep["lin_w"].shape, lambda i: (0, 0)),
                 pl.BlockSpec(prep["lin_b"].shape, lambda i: (0, 0))]

    kernel = functools.partial(_fused_kernel, block_num=block_num,
                               tile_b=tile_b, L=L, C=C)
    out = pl.pallas_call(
        kernel,
        out_shape=jax.ShapeDtypeStruct((b_pad, C), jnp.float32),
        grid=(b_pad // tile_b,),
        in_specs=in_specs,
        out_specs=pl.BlockSpec((tile_b, C), lambda i: (i, 0)),
        compiler_params=pltpu.CompilerParams(
            dimension_semantics=("parallel",)),   # v7x: 2 TensorCores share batch tiles
    )(*inputs)
    return out[:B, :OUT_CH]                                     # drop batch/channel pad


# Pure-jnp f32 reference (PyTorch semantics) for the correctness check.
def reference_forward(tokens, params):
    emb = params["embedding"][tokens]                           # (B, L, E)
    feats = []
    for block_layers in params["blocks"]:
        h = emb
        for (w, b) in block_layers:
            Cout, Cin, Kk = w.shape
            Lout = h.shape[1] - Kk + 1
            acc = jnp.zeros((h.shape[0], Lout, Cout), jnp.float32)
            for k in range(Kk):
                acc = acc + jnp.einsum("blc,oc->blo", h[:, k:k + Lout, :], w[:, :, k])
            h = jax.nn.relu(acc + b[None, None, :])
        feats.append(jnp.max(h, axis=1))
    x = jnp.concatenate(feats, axis=-1)
    return x @ params["lin_w"].T + params["lin_b"]


if __name__ == "__main__":
    # Small shapes consistent with the module.
    B, L = 2, 16
    block_num, vocab_size, embedding_num = 3, 20, 32

    key = jax.random.PRNGKey(0)
    k_tok, k_par = jax.random.split(key)
    tokens = jax.random.randint(k_tok, (B, L), 0, vocab_size, dtype=jnp.int32)
    params = init_params(k_par, block_num, vocab_size, embedding_num)
    prep = prepare_params(params)            # one-time layout/pad/bf16 prep

    out = jax.block_until_ready(target_representation_forward(tokens, prep))
    ref = jax.block_until_ready(reference_forward(tokens, params))

    assert out.shape == (B, OUT_CH), out.shape
    # bf16 MXU operands with f32 accumulation -> slightly looser tolerance vs f32 ref.
    assert jnp.allclose(out, ref, rtol=2e-2, atol=2e-2), "mismatch vs reference"

    print("KERNEL_OK")
</pallas_src>

<mosaic_0001>
module attributes {stable_mosaic.version = 11 : i64} {
  func.func @_fused_kernel(%arg0: i32, %arg1: memref<128x128xbf16, #tpu.memory_space<vmem>>, %arg2: memref<3x128x384xbf16, #tpu.memory_space<vmem>>, %arg3: memref<1x384xf32, #tpu.memory_space<vmem>>, %arg4: memref<3x128x128xbf16, #tpu.memory_space<vmem>>, %arg5: memref<1x128xf32, #tpu.memory_space<vmem>>, %arg6: memref<3x128x128xbf16, #tpu.memory_space<vmem>>, %arg7: memref<1x128xf32, #tpu.memory_space<vmem>>, %arg8: memref<3x128x128xbf16, #tpu.memory_space<vmem>>, %arg9: memref<1x128xf32, #tpu.memory_space<vmem>>, %arg10: memref<384x128xbf16, #tpu.memory_space<vmem>>, %arg11: memref<1x128xf32, #tpu.memory_space<vmem>>, %arg12: memref<8x128xf32, #tpu.memory_space<vmem>>) attributes {dimension_semantics = [#tpu.dimension_semantics<parallel>], iteration_bounds = array<i64: 1>, scalar_prefetch = 0 : i64, scratch_operands = 0 : i64, tpu.core_type = #tpu.core_type<tc>, window_params = [{transform_indices = @transform_0, window_bounds = array<i64: 128, 128>}, {pipeline_mode = #tpu.pipeline_mode<synchronous>, transform_indices = @transform_1, window_bounds = array<i64: 3, 128, 384>}, {pipeline_mode = #tpu.pipeline_mode<synchronous>, transform_indices = @transform_2, window_bounds = array<i64: 1, 384>}, {pipeline_mode = #tpu.pipeline_mode<synchronous>, transform_indices = @transform_3, window_bounds = array<i64: 3, 128, 128>}, {pipeline_mode = #tpu.pipeline_mode<synchronous>, transform_indices = @transform_4, window_bounds = array<i64: 1, 128>}, {pipeline_mode = #tpu.pipeline_mode<synchronous>, transform_indices = @transform_5, window_bounds = array<i64: 3, 128, 128>}, {pipeline_mode = #tpu.pipeline_mode<synchronous>, transform_indices = @transform_6, window_bounds = array<i64: 1, 128>}, {pipeline_mode = #tpu.pipeline_mode<synchronous>, transform_indices = @transform_7, window_bounds = array<i64: 3, 128, 128>}, {pipeline_mode = #tpu.pipeline_mode<synchronous>, transform_indices = @transform_8, window_bounds = array<i64: 1, 128>}, {pipeline_mode = #tpu.pipeline_mode<synchronous>, transform_indices = @transform_9, window_bounds = array<i64: 384, 128>}, {pipeline_mode = #tpu.pipeline_mode<synchronous>, transform_indices = @transform_10, window_bounds = array<i64: 1, 128>}, {transform_indices = @transform_11, window_bounds = array<i64: 8, 128>}]} {
    %c0 = arith.constant 0 : index
    %c0_0 = arith.constant 0 : index
    %0 = vector.load %arg1[%c0, %c0_0] : memref<128x128xbf16, #tpu.memory_space<vmem>>, vector<128x128xbf16>
    %1 = arith.extf %0 : vector<128x128xbf16> to vector<128x128xf32>
    %cst = arith.constant 0.000000e+00 : f32
    %2 = vector.broadcast %cst : f32 to vector<128x384xf32>
    %c0_1 = arith.constant 0 : index
    %c0_2 = arith.constant 0 : index
    %c0_3 = arith.constant 0 : index
    %3 = vector.load %arg2[%c0_1, %c0_2, %c0_3] : memref<3x128x384xbf16, #tpu.memory_space<vmem>>, vector<1x128x384xbf16>
    %4 = vector.shape_cast %3 : vector<1x128x384xbf16> to vector<128x384xbf16>
    %cst_4 = arith.constant dense<0.000000e+00> : vector<128x384xf32>
    %5 = tpu.matmul %0, %4, %cst_4 {dimension_numbers = #tpu.dot_dimension_numbers<[1], [0], [0], [1], [0, 0, 1, 1], [], []>} : vector<128x128xbf16>, vector<128x384xbf16>, vector<128x384xf32> -> vector<128x384xf32>
    %6 = arith.addf %2, %5 : vector<128x384xf32>
    %c127_i32 = arith.constant 127 : i32
    %7 = tpu.dynamic_rotate %1 by %c127_i32 dim 0 : vector<128x128xf32>, i32 -> vector<128x128xf32>
    %8 = arith.truncf %7 : vector<128x128xf32> to vector<128x128xbf16>
    %c1 = arith.constant 1 : index
    %c0_5 = arith.constant 0 : index
    %c0_6 = arith.constant 0 : index
    %9 = vector.load %arg2[%c1, %c0_5, %c0_6] : memref<3x128x384xbf16, #tpu.memory_space<vmem>>, vector<1x128x384xbf16>
    %10 = vector.shape_cast %9 : vector<1x128x384xbf16> to vector<128x384xbf16>
    %cst_7 = arith.constant dense<0.000000e+00> : vector<128x384xf32>
    %11 = tpu.matmul %8, %10, %cst_7 {dimension_numbers = #tpu.dot_dimension_numbers<[1], [0], [0], [1], [0, 0, 1, 1], [], []>} : vector<128x128xbf16>, vector<128x384xbf16>, vector<128x384xf32> -> vector<128x384xf32>
    %12 = arith.addf %6, %11 : vector<128x384xf32>
    %c126_i32 = arith.constant 126 : i32
    %13 = tpu.dynamic_rotate %1 by %c126_i32 dim 0 : vector<128x128xf32>, i32 -> vector<128x128xf32>
    %14 = arith.truncf %13 : vector<128x128xf32> to vector<128x128xbf16>
    %c2 = arith.constant 2 : index
    %c0_8 = arith.constant 0 : index
    %c0_9 = arith.constant 0 : index
    %15 = vector.load %arg2[%c2, %c0_8, %c0_9] : memref<3x128x384xbf16, #tpu.memory_space<vmem>>, vector<1x128x384xbf16>
    %16 = vector.shape_cast %15 : vector<1x128x384xbf16> to vector<128x384xbf16>
    %cst_10 = arith.constant dense<0.000000e+00> : vector<128x384xf32>
    %17 = tpu.matmul %14, %16, %cst_10 {dimension_numbers = #tpu.dot_dimension_numbers<[1], [0], [0], [1], [0, 0, 1, 1], [], []>} : vector<128x128xbf16>, vector<128x384xbf16>, vector<128x384xf32> -> vector<128x384xf32>
    %18 = arith.addf %12, %17 : vector<128x384xf32>
    %c0_11 = arith.constant 0 : index
    %c0_12 = arith.constant 0 : index
    %19 = vector.load %arg3[%c0_11, %c0_12] : memref<1x384xf32, #tpu.memory_space<vmem>>, vector<1x384xf32>
    %20 = vector.broadcast %19 : vector<1x384xf32> to vector<128x384xf32>
    %21 = arith.addf %18, %20 : vector<128x384xf32>
    %cst_13 = arith.constant 0.000000e+00 : f32
    %22 = vector.broadcast %cst_13 : f32 to vector<128x384xf32>
    %23 = arith.maximumf %21, %22 : vector<128x384xf32>
    %24 = tpu.iota {dimensions = array<i32: 1>} : vector<8x16x128xi32>
    %25 = vector.extract_strided_slice %23 {offsets = [0, 0], sizes = [128, 128], strides = [1, 1]} : vector<128x384xf32> to vector<128x128xf32>
    %26 = vector.shape_cast %25 : vector<128x128xf32> to vector<8x16x128xf32>
    %c14_i32 = arith.constant 14 : i32
    %27 = vector.broadcast %c14_i32 : i32 to vector<8x16x128xi32>
    %28 = arith.cmpi slt, %24, %27 : vector<8x16x128xi32>
    %cst_14 = arith.constant 0xFF800000 : f32
    %29 = vector.broadcast %cst_14 : f32 to vector<8x16x128xf32>
    %30 = arith.select %28, %26, %29 : vector<8x16x128xi1>, vector<8x16x128xf32>
    %cst_15 = arith.constant dense<0xFF800000> : vector<8x128xf32>
    %31 = vector.multi_reduction <maximumf>, %30, %cst_15 [1] : vector<8x16x128xf32> to vector<8x128xf32>
    %32 = vector.extract_strided_slice %23 {offsets = [0, 128], sizes = [128, 128], strides = [1, 1]} : vector<128x384xf32> to vector<128x128xf32>
    %cst_16 = arith.constant 0.000000e+00 : f32
    %33 = vector.broadcast %cst_16 : f32 to vector<128x128xf32>
    %34 = arith.truncf %32 : vector<128x128xf32> to vector<128x128xbf16>
    %c0_17 = arith.constant 0 : index
    %c0_18 = arith.constant 0 : index
    %c0_19 = arith.constant 0 : index
    %35 = vector.load %arg4[%c0_17, %c0_18, %c0_19] : memref<3x128x128xbf16, #tpu.memory_space<vmem>>, vector<1x128x128xbf16>
    %36 = vector.shape_cast %35 : vector<1x128x128xbf16> to vector<128x128xbf16>
    %cst_20 = arith.constant dense<0.000000e+00> : vector<128x128xf32>
    %37 = tpu.matmul %34, %36, %cst_20 {dimension_numbers = #tpu.dot_dimension_numbers<[1], [0], [0], [1], [0, 0, 1, 1], [], []>} : vector<128x128xbf16>, vector<128x128xbf16>, vector<128x128xf32> -> vector<128x128xf32>
    %38 = arith.addf %33, %37 : vector<128x128xf32>
    %c127_i32_21 = arith.constant 127 : i32
    %39 = tpu.dynamic_rotate %32 by %c127_i32_21 dim 0 : vector<128x128xf32>, i32 -> vector<128x128xf32>
    %40 = arith.truncf %39 : vector<128x128xf32> to vector<128x128xbf16>
    %c1_22 = arith.constant 1 : index
    %c0_23 = arith.constant 0 : index
    %c0_24 = arith.constant 0 : index
    %41 = vector.load %arg4[%c1_22, %c0_23, %c0_24] : memref<3x128x128xbf16, #tpu.memory_space<vmem>>, vector<1x128x128xbf16>
    %42 = vector.shape_cast %41 : vector<1x128x128xbf16> to vector<128x128xbf16>
    %cst_25 = arith.constant dense<0.000000e+00> : vector<128x128xf32>
    %43 = tpu.matmul %40, %42, %cst_25 {dimension_numbers = #tpu.dot_dimension_numbers<[1], [0], [0], [1], [0, 0, 1, 1], [], []>} : vector<128x128xbf16>, vector<128x128xbf16>, vector<128x128xf32> -> vector<128x128xf32>
    %44 = arith.addf %38, %43 : vector<128x128xf32>
    %c126_i32_26 = arith.constant 126 : i32
    %45 = tpu.dynamic_rotate %32 by %c126_i32_26 dim 0 : vector<128x128xf32>, i32 -> vector<128x128xf32>
    %46 = arith.truncf %45 : vector<128x128xf32> to vector<128x128xbf16>
    %c2_27 = arith.constant 2 : index
    %c0_28 = arith.constant 0 : index
    %c0_29 = arith.constant 0 : index
    %47 = vector.load %arg4[%c2_27, %c0_28, %c0_29] : memref<3x128x128xbf16, #tpu.memory_space<vmem>>, vector<1x128x128xbf16>
    %48 = vector.shape_cast %47 : vector<1x128x128xbf16> to vector<128x128xbf16>
    %cst_30 = arith.constant dense<0.000000e+00> : vector<128x128xf32>
    %49 = tpu.matmul %46, %48, %cst_30 {dimension_numbers = #tpu.dot_dimension_numbers<[1], [0], [0], [1], [0, 0, 1, 1], [], []>} : vector<128x128xbf16>, vector<128x128xbf16>, vector<128x128xf32> -> vector<128x128xf32>
    %50 = arith.addf %44, %49 : vector<128x128xf32>
    %c0_31 = arith.constant 0 : index
    %c0_32 = arith.constant 0 : index
    %51 = vector.load %arg5[%c0_31, %c0_32] : memref<1x128xf32, #tpu.memory_space<vmem>>, vector<1x128xf32>
    %52 = vector.broadcast %51 : vector<1x128xf32> to vector<128x128xf32>
    %53 = arith.addf %50, %52 : vector<128x128xf32>
    %cst_33 = arith.constant 0.000000e+00 : f32
    %54 = vector.broadcast %cst_33 : f32 to vector<128x128xf32>
    %55 = arith.maximumf %53, %54 : vector<128x128xf32>
    %56 = vector.shape_cast %55 : vector<128x128xf32> to vector<8x16x128xf32>
    %c12_i32 = arith.constant 12 : i32
    %57 = vector.broadcast %c12_i32 : i32 to vector<8x16x128xi32>
    %58 = arith.cmpi slt, %24, %57 : vector<8x16x128xi32>
    %cst_34 = arith.constant 0xFF800000 : f32
    %59 = vector.broadcast %cst_34 : f32 to vector<8x16x128xf32>
    %60 = arith.select %58, %56, %59 : vector<8x16x128xi1>, vector<8x16x128xf32>
    %cst_35 = arith.constant dense<0xFF800000> : vector<8x128xf32>
    %61 = vector.multi_reduction <maximumf>, %60, %cst_35 [1] : vector<8x16x128xf32> to vector<8x128xf32>
    %62 = vector.extract_strided_slice %23 {offsets = [0, 256], sizes = [128, 128], strides = [1, 1]} : vector<128x384xf32> to vector<128x128xf32>
    %cst_36 = arith.constant 0.000000e+00 : f32
    %63 = vector.broadcast %cst_36 : f32 to vector<128x128xf32>
    %64 = arith.truncf %62 : vector<128x128xf32> to vector<128x128xbf16>
    %c0_37 = arith.constant 0 : index
    %c0_38 = arith.constant 0 : index
    %c0_39 = arith.constant 0 : index
    %65 = vector.load %arg6[%c0_37, %c0_38, %c0_39] : memref<3x128x128xbf16, #tpu.memory_space<vmem>>, vector<1x128x128xbf16>
    %66 = vector.shape_cast %65 : vector<1x128x128xbf16> to vector<128x128xbf16>
    %cst_40 = arith.constant dense<0.000000e+00> : vector<128x128xf32>
    %67 = tpu.matmul %64, %66, %cst_40 {dimension_numbers = #tpu.dot_dimension_numbers<[1], [0], [0], [1], [0, 0, 1, 1], [], []>} : vector<128x128xbf16>, vector<128x128xbf16>, vector<128x128xf32> -> vector<128x128xf32>
    %68 = arith.addf %63, %67 : vector<128x128xf32>
    %c127_i32_41 = arith.constant 127 : i32
    %69 = tpu.dynamic_rotate %62 by %c127_i32_41 dim 0 : vector<128x128xf32>, i32 -> vector<128x128xf32>
    %70 = arith.truncf %69 : vector<128x128xf32> to vector<128x128xbf16>
    %c1_42 = arith.constant 1 : index
    %c0_43 = arith.constant 0 : index
    %c0_44 = arith.constant 0 : index
    %71 = vector.load %arg6[%c1_42, %c0_43, %c0_44] : memref<3x128x128xbf16, #tpu.memory_space<vmem>>, vector<1x128x128xbf16>
    %72 = vector.shape_cast %71 : vector<1x128x128xbf16> to vector<128x128xbf16>
    %cst_45 = arith.constant dense<0.000000e+00> : vector<128x128xf32>
    %73 = tpu.matmul %70, %72, %cst_45 {dimension_numbers = #tpu.dot_dimension_numbers<[1], [0], [0], [1], [0, 0, 1, 1], [], []>} : vector<128x128xbf16>, vector<128x128xbf16>, vector<128x128xf32> -> vector<128x128xf32>
    %74 = arith.addf %68, %73 : vector<128x128xf32>
    %c126_i32_46 = arith.constant 126 : i32
    %75 = tpu.dynamic_rotate %62 by %c126_i32_46 dim 0 : vector<128x128xf32>, i32 -> vector<128x128xf32>
    %76 = arith.truncf %75 : vector<128x128xf32> to vector<128x128xbf16>
    %c2_47 = arith.constant 2 : index
    %c0_48 = arith.constant 0 : index
    %c0_49 = arith.constant 0 : index
    %77 = vector.load %arg6[%c2_47, %c0_48, %c0_49] : memref<3x128x128xbf16, #tpu.memory_space<vmem>>, vector<1x128x128xbf16>
    %78 = vector.shape_cast %77 : vector<1x128x128xbf16> to vector<128x128xbf16>
    %cst_50 = arith.constant dense<0.000000e+00> : vector<128x128xf32>
    %79 = tpu.matmul %76, %78, %cst_50 {dimension_numbers = #tpu.dot_dimension_numbers<[1], [0], [0], [1], [0, 0, 1, 1], [], []>} : vector<128x128xbf16>, vector<128x128xbf16>, vector<128x128xf32> -> vector<128x128xf32>
    %80 = arith.addf %74, %79 : vector<128x128xf32>
    %c0_51 = arith.constant 0 : index
    %c0_52 = arith.constant 0 : index
    %81 = vector.load %arg7[%c0_51, %c0_52] : memref<1x128xf32, #tpu.memory_space<vmem>>, vector<1x128xf32>
    %82 = vector.broadcast %81 : vector<1x128xf32> to vector<128x128xf32>
    %83 = arith.addf %80, %82 : vector<128x128xf32>
    %cst_53 = arith.constant 0.000000e+00 : f32
    %84 = vector.broadcast %cst_53 : f32 to vector<128x128xf32>
    %85 = arith.maximumf %83, %84 : vector<128x128xf32>
    %cst_54 = arith.constant 0.000000e+00 : f32
    %86 = vector.broadcast %cst_54 : f32 to vector<128x128xf32>
    %87 = arith.truncf %85 : vector<128x128xf32> to vector<128x128xbf16>
    %c0_55 = arith.constant 0 : index
    %c0_56 = arith.constant 0 : index
    %c0_57 = arith.constant 0 : index
    %88 = vector.load %arg8[%c0_55, %c0_56, %c0_57] : memref<3x128x128xbf16, #tpu.memory_space<vmem>>, vector<1x128x128xbf16>
    %89 = vector.shape_cast %88 : vector<1x128x128xbf16> to vector<128x128xbf16>
    %cst_58 = arith.constant dense<0.000000e+00> : vector<128x128xf32>
    %90 = tpu.matmul %87, %89, %cst_58 {dimension_numbers = #tpu.dot_dimension_numbers<[1], [0], [0], [1], [0, 0, 1, 1], [], []>} : vector<128x128xbf16>, vector<128x128xbf16>, vector<128x128xf32> -> vector<128x128xf32>
    %91 = arith.addf %86, %90 : vector<128x128xf32>
    %c127_i32_59 = arith.constant 127 : i32
    %92 = tpu.dynamic_rotate %85 by %c127_i32_59 dim 0 : vector<128x128xf32>, i32 -> vector<128x128xf32>
    %93 = arith.truncf %92 : vector<128x128xf32> to vector<128x128xbf16>
    %c1_60 = arith.constant 1 : index
    %c0_61 = arith.constant 0 : index
    %c0_62 = arith.constant 0 : index
    %94 = vector.load %arg8[%c1_60, %c0_61, %c0_62] : memref<3x128x128xbf16, #tpu.memory_space<vmem>>, vector<1x128x128xbf16>
    %95 = vector.shape_cast %94 : vector<1x128x128xbf16> to vector<128x128xbf16>
    %cst_63 = arith.constant dense<0.000000e+00> : vector<128x128xf32>
    %96 = tpu.matmul %93, %95, %cst_63 {dimension_numbers = #tpu.dot_dimension_numbers<[1], [0], [0], [1], [0, 0, 1, 1], [], []>} : vector<128x128xbf16>, vector<128x128xbf16>, vector<128x128xf32> -> vector<128x128xf32>
    %97 = arith.addf %91, %96 : vector<128x128xf32>
    %c126_i32_64 = arith.constant 126 : i32
    %98 = tpu.dynamic_rotate %85 by %c126_i32_64 dim 0 : vector<128x128xf32>, i32 -> vector<128x128xf32>
    %99 = arith.truncf %98 : vector<128x128xf32> to vector<128x128xbf16>
    %c2_65 = arith.constant 2 : index
    %c0_66 = arith.constant 0 : index
    %c0_67 = arith.constant 0 : index
    %100 = vector.load %arg8[%c2_65, %c0_66, %c0_67] : memref<3x128x128xbf16, #tpu.memory_space<vmem>>, vector<1x128x128xbf16>
    %101 = vector.shape_cast %100 : vector<1x128x128xbf16> to vector<128x128xbf16>
    %cst_68 = arith.constant dense<0.000000e+00> : vector<128x128xf32>
    %102 = tpu.matmul %99, %101, %cst_68 {dimension_numbers = #tpu.dot_dimension_numbers<[1], [0], [0], [1], [0, 0, 1, 1], [], []>} : vector<128x128xbf16>, vector<128x128xbf16>, vector<128x128xf32> -> vector<128x128xf32>
    %103 = arith.addf %97, %102 : vector<128x128xf32>
    %c0_69 = arith.constant 0 : index
    %c0_70 = arith.constant 0 : index
    %104 = vector.load %arg9[%c0_69, %c0_70] : memref<1x128xf32, #tpu.memory_space<vmem>>, vector<1x128xf32>
    %105 = vector.broadcast %104 : vector<1x128xf32> to vector<128x128xf32>
    %106 = arith.addf %103, %105 : vector<128x128xf32>
    %cst_71 = arith.constant 0.000000e+00 : f32
    %107 = vector.broadcast %cst_71 : f32 to vector<128x128xf32>
    %108 = arith.maximumf %106, %107 : vector<128x128xf32>
    %109 = vector.shape_cast %108 : vector<128x128xf32> to vector<8x16x128xf32>
    %c10_i32 = arith.constant 10 : i32
    %110 = vector.broadcast %c10_i32 : i32 to vector<8x16x128xi32>
    %111 = arith.cmpi slt, %24, %110 : vector<8x16x128xi32>
    %cst_72 = arith.constant 0xFF800000 : f32
    %112 = vector.broadcast %cst_72 : f32 to vector<8x16x128xf32>
    %113 = arith.select %111, %109, %112 : vector<8x16x128xi1>, vector<8x16x128xf32>
    %cst_73 = arith.constant dense<0xFF800000> : vector<8x128xf32>
    %114 = vector.multi_reduction <maximumf>, %113, %cst_73 [1] : vector<8x16x128xf32> to vector<8x128xf32>
    %115 = tpu.concatenate %31, %61, %114 in 1 : vector<8x128xf32>, vector<8x128xf32>, vector<8x128xf32> -> vector<8x384xf32>
    %116 = arith.truncf %115 : vector<8x384xf32> to vector<8x384xbf16>
    %c0_74 = arith.constant 0 : index
    %c0_75 = arith.constant 0 : index
    %117 = vector.load %arg10[%c0_74, %c0_75] : memref<384x128xbf16, #tpu.memory_space<vmem>>, vector<384x128xbf16>
    %cst_76 = arith.constant dense<0.000000e+00> : vector<8x128xf32>
    %118 = tpu.matmul %116, %117, %cst_76 {dimension_numbers = #tpu.dot_dimension_numbers<[1], [0], [0], [1], [0, 0, 1, 1], [], []>} : vector<8x384xbf16>, vector<384x128xbf16>, vector<8x128xf32> -> vector<8x128xf32>
    %c0_77 = arith.constant 0 : index
    %c0_78 = arith.constant 0 : index
    %119 = vector.load %arg11[%c0_77, %c0_78] : memref<1x128xf32, #tpu.memory_space<vmem>>, vector<1x128xf32>
    %120 = vector.broadcast %119 : vector<1x128xf32> to vector<8x128xf32>
    %121 = arith.addf %118, %120 : vector<8x128xf32>
    %c0_79 = arith.constant 0 : index
    %c0_80 = arith.constant 0 : index
    %122 = vector.load %arg12[%c0_79, %c0_80] : memref<8x128xf32, #tpu.memory_space<vmem>>, vector<8x128xf32>
    tpu.vector_store %arg12[%c0_79, %c0_80], %121 {strides = array<i32>} : memref<8x128xf32, #tpu.memory_space<vmem>>, vector<8x128xf32>,
    return
  }
  func.func @transform_0(%arg0: i32) -> (i32, i32) {
    %c0_i32 = arith.constant 0 : i32
    %c0_i32_0 = arith.constant 0 : i32
    return %arg0, %c0_i32 : i32, i32
  }
  func.func @transform_1(%arg0: i32) -> (i32, i32, i32) {
    %c0_i32 = arith.constant 0 : i32
    %c0_i32_0 = arith.constant 0 : i32
    %c0_i32_1 = arith.constant 0 : i32
    %c0_i32_2 = arith.constant 0 : i32
    return %c0_i32, %c0_i32_0, %c0_i32_1 : i32, i32, i32
  }
  func.func @transform_2(%arg0: i32) -> (i32, i32) {
    %c0_i32 = arith.constant 0 : i32
    %c0_i32_0 = arith.constant 0 : i32
    %c0_i32_1 = arith.constant 0 : i32
    return %c0_i32, %c0_i32_0 : i32, i32
  }
  func.func @transform_3(%arg0: i32) -> (i32, i32, i32) {
    %c0_i32 = arith.constant 0 : i32
    %c0_i32_0 = arith.constant 0 : i32
    %c0_i32_1 = arith.constant 0 : i32
    %c0_i32_2 = arith.constant 0 : i32
    return %c0_i32, %c0_i32_0, %c0_i32_1 : i32, i32, i32
  }
  func.func @transform_4(%arg0: i32) -> (i32, i32) {
    %c0_i32 = arith.constant 0 : i32
    %c0_i32_0 = arith.constant 0 : i32
    %c0_i32_1 = arith.constant 0 : i32
    return %c0_i32, %c0_i32_0 : i32, i32
  }
  func.func @transform_5(%arg0: i32) -> (i32, i32, i32) {
    %c0_i32 = arith.constant 0 : i32
    %c0_i32_0 = arith.constant 0 : i32
    %c0_i32_1 = arith.constant 0 : i32
    %c0_i32_2 = arith.constant 0 : i32
    return %c0_i32, %c0_i32_0, %c0_i32_1 : i32, i32, i32
  }
  func.func @transform_6(%arg0: i32) -> (i32, i32) {
    %c0_i32 = arith.constant 0 : i32
    %c0_i32_0 = arith.constant 0 : i32
    %c0_i32_1 = arith.constant 0 : i32
    return %c0_i32, %c0_i32_0 : i32, i32
  }
  func.func @transform_7(%arg0: i32) -> (i32, i32, i32) {
    %c0_i32 = arith.constant 0 : i32
    %c0_i32_0 = arith.constant 0 : i32
    %c0_i32_1 = arith.constant 0 : i32
    %c0_i32_2 = arith.constant 0 : i32
    return %c0_i32, %c0_i32_0, %c0_i32_1 : i32, i32, i32
  }
  func.func @transform_8(%arg0: i32) -> (i32, i32) {
    %c0_i32 = arith.constant 0 : i32
    %c0_i32_0 = arith.constant 0 : i32
    %c0_i32_1 = arith.constant 0 : i32
    return %c0_i32, %c0_i32_0 : i32, i32
  }
  func.func @transform_9(%arg0: i32) -> (i32, i32) {
    %c0_i32 = arith.constant 0 : i32
    %c0_i32_0 = arith.constant 0 : i32
    %c0_i32_1 = arith.constant 0 : i32
    return %c0_i32, %c0_i32_0 : i32, i32
  }
  func.func @transform_10(%arg0: i32) -> (i32, i32) {
    %c0_i32 = arith.constant 0 : i32
    %c0_i32_0 = arith.constant 0 : i32
    %c0_i32_1 = arith.constant 0 : i32
    return %c0_i32, %c0_i32_0 : i32, i32
  }
  func.func @transform_11(%arg0: i32) -> (i32, i32) {
    %c0_i32 = arith.constant 0 : i32
    %c0_i32_0 = arith.constant 0 : i32
    return %arg0, %c0_i32 : i32, i32
  }
}

</mosaic_0001>

<bundles_post_ra>
// kernel: tpu_custom_call.1
= control target key start
LH: loop header
LB: loop body
LE: loop exit
PB: predicated region body
PF: predicated region fallthrough
CT: control target
= control target key end

     0   :  { %16 = vsyncpa [#allocation3], 0  ;;  %s7058_s0 = inlined_call_operand.hbm [shape: bf16[128,128], index: 0, kind: input, shape index: {}]   ;;  %s7059_s1 = inlined_call_operand.hbm [shape: bf16[3,128,384], index: 1, kind: input, shape index: {}]   ;;  %s7060_s2 = inlined_call_operand.vmem [shape: f32[1,384], index: 2, kind: input, shape index: {}]   ;;  %s7061_s3 = inlined_call_operand.hbm [shape: bf16[3,128,128], index: 3, kind: input, shape index: {}]   ;;  %s7062_s4 = inlined_call_operand.vmem [shape: f32[1,128], index: 4, kind: input, shape index: {}]   ;;  %s7063_s5 = inlined_call_operand.hbm [shape: bf16[3,128,128], index: 5, kind: input, shape index: {}]   ;;  %s7064_s6 = inlined_call_operand.vmem [shape: f32[1,128], index: 6, kind: input, shape index: {}]   ;;  %s7065_s7 = inlined_call_operand.hbm [shape: bf16[3,128,128], index: 7, kind: input, shape index: {}]   ;;  %s7066_s8 = inlined_call_operand.vmem [shape: f32[1,128], index: 8, kind: input, shape index: {}]   ;;  %s7067_s9 = inlined_call_operand.hbm [shape: bf16[384,128], index: 9, kind: input, shape index: {}]   ;;  %s7068_s10 = inlined_call_operand.vmem [shape: f32[1,128], index: 10, kind: input, shape index: {}]   ;;  %s7069_s11 = inlined_call_operand.hbm [shape: f32[8,128], index: 11, kind: output, shape index: {}]  }
   0x1   :  { %17 = vsyncpa [#allocation6], 0 }
   0x2   :  { %18 = vsyncpa [#allocation9], 0 }
   0x3   :  { %19 = vsyncpa [#allocation12], 0 }
   0x4   :  { %20 = vsyncpa [#allocation4], 0  ;;  %s5201_s17 = smov [#allocation5]  }
   0x5   :  { %s38_s18 = sshll.u32 %s5201_s17, 4  ;;  %s39_s18 = int_to_ptr.vmem [resolvable:$true] %s38_s18 }
   0x6   :  { %s5059_s19 = scalar_lea.vmem %s39_s18, 9216  ;;  %p5064_p1 = scmp.lt.s32.totalorder %s39_s18, %s39_s18 }
   0x7   :  { %p5060_p0 = scmp.ne.s32.totalorder %s39_s18, %s5059_s19  ;;  %p5065_p2 = scmp.lt.s32.totalorder %s5059_s19, %s5059_s19 }
   0x9   :  { %p5066_p3 = por %p5065_p2, %p5064_p1 }
   0xb   :  { %p5067_p4 = pnand %p5066_p3, %p5060_p0 }
   0xd   :  { %5070 = shalt.err (!%p5067_p4)
}
   0xe   :  { %s5202_s20 = smov 192   ;;  %s5203_s21 = smov 12  }
   0xf   :  { %44 = dma.hbm_to_vmem [thread:$0]  %s7059_s1, 9216, %s39_s18, [#allocation6], %s5202_s20, %s5202_s20, %s5203_s21  }
  0x10   :  { %s5204_s24 = smov [#allocation8]   ;;  %s5205_s26 = smov [#allocation2]  }
  0x11   :  { %s66_s25 = sshll.u32 %s5204_s24, 4  ;;  %s26_s27 = sshll.u32 %s5205_s26, 4  ;;  %s67_s25 = int_to_ptr.vmem [resolvable:$true] %s66_s25  ;;  %s27_s27 = int_to_ptr.vmem [resolvable:$true] %s26_s27 }
  0x12   :  { %s5079_s28 = scalar_lea.vmem %s67_s25, 3072  ;;  %p5084_p6 = scmp.lt.s32.totalorder %s67_s25, %s67_s25 }
  0x13   :  { %p5080_p5 = scmp.ne.s32.totalorder %s67_s25, %s5079_s28  ;;  %p5085_p7 = scmp.lt.s32.totalorder %s5079_s28, %s5079_s28 }
  0x15   :  { %p5086_p8 = por %p5085_p7, %p5084_p6 }
  0x17   :  { %p5087_p9 = pnand %p5086_p8, %p5080_p5 }
  0x19   :  { %5090 = shalt.err (!%p5087_p9)
}
  0x1a   :  { %s5206_s29 = smov 64   ;;  %s5207_s30 = smov 4  }
  0x1b   :  { %72 = dma.hbm_to_vmem [thread:$0]  %s7063_s5, 3072, %s67_s25, [#allocation9], %s5206_s29, %s5206_s29, %s5207_s30  }
  0x1c   :  { %s5099_s1 = scalar_lea.vmem %s27_s27, 1024  ;;  %p5104_p11 = scmp.lt.s32.totalorder %s27_s27, %s27_s27 }
  0x1d   :  { %p5100_p10 = scmp.ne.s32.totalorder %s27_s27, %s5099_s1  ;;  %p5105_p12 = scmp.lt.s32.totalorder %s5099_s1, %s5099_s1 }
  0x1f   :  { %p5106_p13 = por %p5105_p12, %p5104_p11 }
  0x21   :  { %p5107_p0 = pnand %p5106_p13, %p5100_p10 }
  0x23   :  { %5110 = shalt.err (!%p5107_p0)
}
  0x24   :  { %32 = dma.hbm_to_vmem [thread:$0]  %s7058_s0, 1024, %s27_s27, [#allocation3], %s5206_s29, %s5206_s29, %s5207_s30  }
  0x25   :  { %s5208_s16 = smov [#allocation7]   ;;  %s5209_s18 = smov [#allocation10]  }
  0x26   :  { %s52_s17 = sshll.u32 %s5208_s16, 4  ;;  %s80_s5 = sshll.u32 %s5209_s18, 4  ;;  %s53_s17 = int_to_ptr.vmem [resolvable:$true] %s52_s17  ;;  %s81_s5 = int_to_ptr.vmem [resolvable:$true] %s80_s5 }
  0x27   :  { %s5119_s19 = scalar_lea.vmem %s53_s17, 3072  ;;  %p5124_p2 = scmp.lt.s32.totalorder %s53_s17, %s53_s17 }
  0x28   :  { %p5120_p1 = scmp.ne.s32.totalorder %s53_s17, %s5119_s19  ;;  %p5125_p3 = scmp.lt.s32.totalorder %s5119_s19, %s5119_s19 }
  0x2a   :  { %p5126_p4 = por %p5125_p3, %p5124_p2 }
  0x2c   :  { %p5127_p5 = pnand %p5126_p4, %p5120_p1 }
  0x2e   :  { %5130 = shalt.err (!%p5127_p5)
}
  0x2f   :  { %58 = dma.hbm_to_vmem [thread:$0]  %s7061_s3, 3072, %s53_s17, [#allocation6], %s5206_s29, %s5206_s29, %s5207_s30  }
  0x30   :  { %s5139_s0 = scalar_lea.vmem %s81_s5, 3072  ;;  %p5144_p7 = scmp.lt.s32.totalorder %s81_s5, %s81_s5 }
  0x31   :  { %p5140_p6 = scmp.ne.s32.totalorder %s81_s5, %s5139_s0  ;;  %p5145_p8 = scmp.lt.s32.totalorder %s5139_s0, %s5139_s0 }
  0x33   :  { %p5146_p9 = por %p5145_p8, %p5144_p7 }
  0x35   :  { %p5147_p10 = pnand %p5146_p9, %p5140_p6 }
  0x37   :  { %5150 = shalt.err (!%p5147_p10)
}
  0x38   :  { %86 = dma.hbm_to_vmem [thread:$0]  %s7065_s7, 3072, %s81_s5, [#allocation9], %s5206_s29, %s5206_s29, %s5207_s30  }
  0x39   :  { %s5210_s24 = smov [#allocation11]  }
  0x3a   :  { %s94_s25 = sshll.u32 %s5210_s24, 4  ;;  %s95_s25 = int_to_ptr.vmem [resolvable:$true] %s94_s25 }
  0x3b   :  { %s5159_s26 = scalar_lea.vmem %s95_s25, 3072  ;;  %p5164_p12 = scmp.lt.s32.totalorder %s95_s25, %s95_s25 }
  0x3c   :  { %p5160_p11 = scmp.ne.s32.totalorder %s95_s25, %s5159_s26  ;;  %p5165_p13 = scmp.lt.s32.totalorder %s5159_s26, %s5159_s26 }
  0x3e   :  { %p5166_p0 = por %p5165_p13, %p5164_p12 }
  0x40   :  { %p5167_p1 = pnand %p5166_p0, %p5160_p11 }
  0x42   :  { %5170 = shalt.err (!%p5167_p1)
}
  0x43   :  { %100 = dma.hbm_to_vmem [thread:$0]  %s7067_s9, 3072, %s95_s25, [#allocation12], %s5206_s29, %s5206_s29, %s5207_s30  }
  0x44   :  { %5191 = dma.done.wait [#allocation3], 1024  }
  0x45   :  { %5192 = vsyncadd [#allocation3], 4294966272 }
  0x46   :  { %5193 = dma.done.wait [#allocation6], 12288  }
  0x47   :  { %5194 = vsyncadd [#allocation6], 4294955008 }
  0x48   :  { %5195 = dma.done.wait [#allocation9], 6144  }
  0x49   :  { %5196 = vsyncadd [#allocation9], 4294961152 }
  0x4a   :  { %5197 = dma.done.wait [#allocation12], 3072  }
  0x4b   :  { %5198 = vsyncadd [#allocation12], 4294964224  ;;  %v5211_v0 = vmov 0   ;;  %v4843_v1 = vld [vmem:[#allocation5 + $0x16c] ss:$12 sps:$4 sm:$0xff]   ;;  %v202_v13 = vlaneseq  ;;  %v5311_v21 = vld [vmem:[#allocation2] sm:$0xff]  }
  0x4c   :  { %422 = vmatprep.mubr.bf16.mxu0 %v5211_v0  ;;  %v4845_v2 = vld [vmem:[#allocation5 + $0x170] ss:$12 sps:$4 sm:$0xff]   ;;  %390 = vmatprep.subr.bf16.mxu0 %v4843_v1  ;;  %v4846_v3 = vld [vmem:[#allocation5 + $0x168] ss:$12 sps:$4 sm:$0xff]   ;;  %v4849_v5 = vld [vmem:[#allocation5 + $0x158] ss:$12 sps:$4 sm:$0xff]   ;;  %v138_v23 = vunpack.c.l.bf16 %v5311_v21  ;;  %v139_v24 = vunpack.c.h.bf16 %v5311_v21 }
  0x4d   :  { %4425 = vmatprep.subr.bf16.mxu1 %v4845_v2  ;;  %v4847_v4 = vld [vmem:[#allocation5 + $0x154] ss:$12 sps:$4 sm:$0xff]   ;;  %391 = vmatpush1.bf16.msra.mxu0 %v4846_v3  ;;  %v4850_v6 = vld [vmem:[#allocation5 + $0x150] ss:$12 sps:$4 sm:$0xff]   ;;  %v4854_v9 = vld [vmem:[#allocation5 + $0x138] ss:$12 sps:$4 sm:$0xff]  }
  0x4e   :  { %4426 = vmatpush3.bf16.msra.mxu1 %v4845_v2  ;;  %392 = vmatprep.subr.bf16.mxu0 %v4847_v4  ;;  %v4851_v7 = vld [vmem:[#allocation5 + $0x13c] ss:$12 sps:$4 sm:$0xff]   ;;  %v4853_v8 = vld [vmem:[#allocation5 + $0x140] ss:$12 sps:$4 sm:$0xff]   ;;  %v4855_v10 = vld [vmem:[#allocation5 + $0x124] ss:$12 sps:$4 sm:$0xff]  }
  0x4f   :  { %4427 = vmatprep.subr.bf16.mxu1 %v4849_v5  ;;  %v4857_v11 = vld [vmem:[#allocation5 + $0x128] ss:$12 sps:$4 sm:$0xff]   ;;  %v4858_v12 = vld [vmem:[#allocation5 + $0x120] ss:$12 sps:$4 sm:$0xff]   ;;  %v4861_v15 = vld [vmem:[#allocation5 + $0x110] ss:$12 sps:$4 sm:$0xff]  }
  0x50   :  { %v4859_v14 = vld [vmem:[#allocation5 + $0x10c] ss:$12 sps:$4 sm:$0xff]   ;;  %v4862_v16 = vld [vmem:[#allocation5 + $0x108] ss:$12 sps:$4 sm:$0xff]   ;;  %v5309_v18 = vshrl.u32 %v202_v13, 7  ;;  %v5323_v31 = vrot.slane %v138_v23, 1 }
  0x51   :  { %393 = vmatpush1.bf16.msra.mxu0 %v4850_v6  ;;  %v4863_v17 = vld [vmem:[#allocation5 + $0xf4] ss:$12 sps:$4 sm:$0xff]   ;;  %v4865_v19 = vld [vmem:[#allocation5 + $0xf8] ss:$12 sps:$4 sm:$0xff]   ;;  %v4866_v20 = vld [vmem:[#allocation5 + $0xf0] ss:$12 sps:$4 sm:$0xff]  }
  0x52   :  { %4428 = vmatpush3.bf16.msra.mxu1 %v4849_v5  ;;  %394 = vmatprep.subr.bf16.mxu0 %v4851_v7  ;;  %v5313_v22 = vld [vmem:[#allocation2 + $0x8] sm:$0xff]   ;;  %v5317_v25 = vld [vmem:[#allocation2 + $0x10] sm:$0xff]   ;;  %vm204_vm0 = vcmp.lt.s32.totalorder %v5309_v18, 7  ;;  %v187_v32 = vrot.slane %v139_v24, 1  ;;  %v4870_v33 = vld [vmem:[#allocation5 + $0xd8] ss:$12 sps:$4 sm:$0xff]  }
  0x53   :  { %4429 = vmatprep.subr.bf16.mxu1 %v4853_v8  ;;  %v4867_v26 = vld [vmem:[#allocation5 + $0xdc] ss:$12 sps:$4 sm:$0xff]   ;;  %v4869_v27 = vld [vmem:[#allocation5 + $0xe0] ss:$12 sps:$4 sm:$0xff]   ;;  %v140_v28 = vunpack.c.l.bf16 %v5313_v22  ;;  %v141_v29 = vunpack.c.h.bf16 %v5313_v22  ;;  %v142_v30 = vunpack.c.l.bf16 %v5317_v25  ;;  %v4871_v35 = vld [vmem:[#allocation5 + $0xc4] ss:$12 sps:$4 sm:$0xff]   ;;  %v143_v39 = vunpack.c.h.bf16 %v5317_v25 }
  0x54   :  { %v219_v36 = vsel %vm204_vm0, %v5323_v31, %v187_v32  ;;  %v4873_v40 = vld [vmem:[#allocation5 + $0xc8] ss:$12 sps:$4 sm:$0xff]   ;;  %v5333_v44 = vld [vmem:[#allocation2 + $0x18] sm:$0xff]   ;;  %vm1002_vm1 = vcmp.lt.s32.totalorder %v5309_v18, 6  ;;  %v5337_v47 = vld [vmem:[#allocation2 + $0x20] sm:$0xff]   ;;  %v5339_v48 = vrot.slane %v138_v23, 2 }
  0x55   :  { %395 = vmatpush1.bf16.msra.mxu0 %v4854_v9  ;;  %v188_v34 = vrot.slane %v140_v28, 1  ;;  %v989_v37 = vrot.slane %v141_v29, 2  ;;  %v5328_v38 = vrot.slane %v142_v30, 2  ;;  %v189_v42 = vrot.slane %v141_v29, 1  ;;  %v4874_v53 = vld [vmem:[#allocation5 + $0xc0] ss:$12 sps:$4 sm:$0xff]  }
  0x56   :  { %4430 = vmatpush3.bf16.msra.mxu1 %v4853_v8  ;;  %396 = vmatprep.subr.bf16.mxu0 %v4855_v10  ;;  %v190_v43 = vrot.slane %v142_v30, 1  ;;  %v144_v46 = vunpack.c.l.bf16 %v5333_v44  ;;  %v191_v49 = vrot.slane %v143_v39, 1  ;;  %v987_v51 = vrot.slane %v139_v24, 2  ;;  %v4878_v56 = vld [vmem:[#allocation5 + $0xac] ss:$12 sps:$4 sm:$0xff]   ;;  %v5369_v9 = vld [vmem:[#allocation2 + $0x30] sm:$0xff]  }
  0x57   :  { %4431 = vmatprep.subr.bf16.mxu1 %v4857_v11  ;;  %v218_v41 = vsel %vm204_vm0, %v187_v32, %v188_v34  ;;  %v1014_v52 = vsel %vm1002_vm1, %v989_v37, %v5328_v38  ;;  %v217_v55 = vsel %vm204_vm0, %v188_v34, %v189_v42  ;;  %v145_v57 = vunpack.c.h.bf16 %v5333_v44  ;;  %v4879_v59 = vld [vmem:[#allocation5 + $0xb0] ss:$12 sps:$4 sm:$0xff]   ;;  %v5354_v60 = vld [vmem:[#allocation2 + $0x28] sm:$0xff]   ;;  %v4882_v8 = vld [vmem:[#allocation5 + $0x94] ss:$12 sps:$4 sm:$0xff]   ;;  %s5214_s13 = smov [#allocation13]  }
  0x58   :  { %v221_v45 = vpack.c.bf16 %v218_v41, %v219_v36  ;;  %v192_v50 = vrot.slane %v144_v46, 1  ;;  %v216_v54 = vsel %vm204_vm0, %v189_v42, %v190_v43  ;;  %v146_v58 = vunpack.c.l.bf16 %v5337_v47  ;;  %v4876_v5 = vld [vmem:[#allocation5 + $0xa8] ss:$12 sps:$4 sm:$0xff]   ;;  %v4883_v32 = vld [vmem:[#allocation5 + $0x78] ss:$12 sps:$4 sm:$0xff]   ;;  %s4010_s1 = sshll.u32 %s5214_s13, 4  ;;  %s4011_s1 = int_to_ptr.vmem [resolvable:$true] %s4010_s1 }
  0x59   :  { %397 = vmatpush1.bf16.msra.mxu0 %v4858_v12  ;;  %v988_v61 = vrot.slane %v140_v28, 2  ;;  %v1017_v62 = vsel %vm1002_vm1, %v5339_v48, %v987_v51  ;;  %v147_v63 = vunpack.c.h.bf16 %v5337_v47  ;;  %v148_v1 = vunpack.c.l.bf16 %v5354_v60  ;;  %v4880_v12 = vld [vmem:[#allocation5 + $0x90] ss:$12 sps:$4 sm:$0xff]   ;;  %s5171_s14 = scalar_lea.vmem %s4011_s1, 128  ;;  %p5176_p3 = scmp.lt.s32.totalorder %s4011_s1, %s4011_s1 }
  0x5a   :  { %4432 = vmatpush3.bf16.msra.mxu1 %v4857_v11  ;;  %398 = vmatprep.subr.bf16.mxu0 %v4859_v14  ;;  %v222_v2 = vpack.c.bf16 %v216_v54, %v217_v55  ;;  %v214_v3 = vsel %vm204_vm0, %v191_v49, %v192_v50  ;;  %v215_v4 = vsel %vm204_vm0, %v190_v43, %v191_v49  ;;  %v193_v6 = vrot.slane %v145_v57, 1  ;;  %v4886_v14 = vld [vmem:[#allocation5 + $0x98] ss:$12 sps:$4 sm:$0xff]   ;;  %v4885_v23 = vld [vmem:[#allocation5 + $0x7c] ss:$12 sps:$4 sm:$0xff]   ;;  %p5172_p2 = scmp.ne.s32.totalorder %s4011_s1, %s5171_s14  ;;  %p5177_p4 = scmp.lt.s32.totalorder %s5171_s14, %s5171_s14 }
  0x5b   :  { %4433 = vmatprep.subr.bf16.mxu1 %v4861_v15  ;;  %4441 = vmatprep.mubr.bf16.mxu1 %v221_v45  ;;  %v194_v7 = vrot.slane %v146_v58, 1  ;;  %v1016_v10 = vsel %vm1002_vm1, %v987_v51, %v988_v61  ;;  %v1015_v11 = vsel %vm1002_vm1, %v988_v61, %v989_v37  ;;  %v5375_v13 = vpack.c.bf16 %v214_v3, %v215_v4  ;;  %v4889_v37 = vld [vmem:[#allocation5 + $0x64] ss:$12 sps:$4 sm:$0xff]   ;;  %v4887_v55 = vld [vmem:[#allocation5 + $0x60] ss:$12 sps:$4 sm:$0xff]  }
  0x5c   :  { %v149_v24 = vunpack.c.h.bf16 %v5354_v60  ;;  %v151_v28 = vunpack.c.h.bf16 %v5369_v9  ;;  %v5391_v29 = vpack.c.bf16 %v1016_v10, %v1017_v62  ;;  %v5393_v30 = vpack.c.bf16 %v1014_v52, %v1015_v11  ;;  %v4900_v52 = vld [vmem:[#allocation5 + $0x68] ss:$12 sps:$4 sm:$0xff]   ;;  %p5178_p5 = por %p5177_p4, %p5176_p3 }
  0x5d   :  { %399 = vmatpush1.bf16.msra.mxu0 %v4862_v16  ;;  %v196_v16 = vrot.slane %v148_v1, 1  ;;  %v992_v49 = vrot.slane %v144_v46, 2  ;;  %v994_v61 = vrot.slane %v146_v58, 2  ;;  %v995_v58 = vrot.slane %v147_v63, 2 }
  0x5e   :  { %4434 = vmatpush3.bf16.msra.mxu1 %v4861_v15  ;;  %400 = vmatprep.subr.bf16.mxu0 %v4863_v17  ;;  %v195_v15 = vrot.slane %v147_v63, 1  ;;  %v5381_v17 = vld [vmem:[#allocation2 + $0x38] sm:$0xff]   ;;  %v199_v43 = vrot.slane %v151_v28, 1  ;;  %v996_v4 = vrot.slane %v148_v1, 2  ;;  %v4896_v63 = vld [vmem:[#allocation5 + $0x34] ss:$12 sps:$4 sm:$0xff]   ;;  %p5179_p6 = pnand %p5178_p5, %p5172_p2 }
  0x5f   :  { %4435 = vmatprep.subr.bf16.mxu1 %v4865_v19  ;;  %v153_v51 = vunpack.c.h.bf16 %v5381_v17  ;;  %v1009_v11 = vsel %vm1002_vm1, %v994_v61, %v995_v58  ;;  %vm3674_vm3 = vcmask 1041409   ;;  %vm3676_vm4 = vcmask 1042434  }
  0x60   :  { %v211_v34 = vsel %vm204_vm0, %v194_v7, %v195_v15  ;;  %v1008_v10 = vsel %vm1002_vm1, %v995_v58, %v996_v4  ;;  %v4927_v58 = vld [vmem:[#allocation5 + $0x1e4] ss:$12 sps:$4 sm:$0xff]   ;;  %vm3678_vm5 = vcmask 1043459   ;;  %vm3680_vm6 = vcmask 1044484  }
  0x61   :  { %401 = vmatpush1.bf16.msra.mxu0 %v4866_v20  ;;  %v213_v20 = vsel %vm204_vm0, %v192_v50, %v193_v6  ;;  %v5452_v1 = vpack.c.bf16 %v1008_v10, %v1009_v11  ;;  %v4955_v10 = vld [vmem:[#allocation7 + $0x60] sm:$0xff]   ;;  %v4956_v11 = vld [vmem:[#allocation7 + $0x10] sm:$0xff]   ;;  %vm3682_vm7 = vcmask 1045509   ;;  %vm3684_vm8 = vcmask 1046534  }
  0x62   :  { %4436 = vmatpush3.bf16.msra.mxu1 %v4865_v19  ;;  %402 = vmatprep.subr.bf16.mxu0 %v4867_v26  ;;  %v212_v19 = vsel %vm204_vm0, %v193_v6, %v194_v7  ;;  %v150_v26 = vunpack.c.l.bf16 %v5369_v9  ;;  %v201_v6 = vrot.slane %v153_v51, 1  ;;  %vm3686_vm9 = vcmask 1047559  }
  0x63   :  { %4437 = vmatprep.subr.bf16.mxu1 %v4869_v27  ;;  %v5401_v36 = vpack.c.bf16 %v212_v19, %v213_v20  ;;  %vm5213_vm11 = vmmov 0  }
  0x64   :  { %v198_v41 = vrot.slane %v150_v26, 1 }
  0x65   :  { %403 = vmatpush1.bf16.msra.mxu0 %v4870_v33  ;;  %v210_v33 = vsel %vm204_vm0, %v195_v15, %v196_v16 }
  0x66   :  { %4438 = vmatpush3.bf16.msra.mxu1 %v4869_v27  ;;  %404 = vmatprep.subr.bf16.mxu0 %v4871_v35  ;;  %v4893_v27 = vld [vmem:[#allocation5 + $0x80] ss:$12 sps:$4 sm:$0xff]   ;;  %v152_v35 = vunpack.c.l.bf16 %v5381_v17  ;;  %v5403_v42 = vpack.c.bf16 %v210_v33, %v211_v34  ;;  %v220_v33 = vsel %vm204_vm0, %v201_v6, %v5323_v31  ;;  %v4906_v34 = vld [vmem:[#allocation5 + $0x38] ss:$12 sps:$4 sm:$0xff]  }
  0x67   :  { %4439 = vmatprep.subr.bf16.mxu1 %v4873_v40 }
  0x68   :  { %v200_v50 = vrot.slane %v152_v35, 1 }
  0x69   :  { %405 = vmatpush1.bf16.msra.mxu0 %v4874_v53 }
  0x6a   :  { %4440 = vmatpush3.bf16.msra.mxu1 %v4873_v40  ;;  %4457 = vmatprep.subr.bf16.mxu0 %v4879_v59  ;;  %v197_v40 = vrot.slane %v149_v24, 1 }
  0x6b   :  { %776 = vmatprep.subr.bf16.mxu1 %v4878_v56 }
  0x6c   :  { %423 = vmatmul.mubr.bf16.vlgmr.msra.gmra.mxu0 %v221_v45  ;;  %v991_v45 = vrot.slane %v143_v39, 2  ;;  %v993_v39 = vrot.slane %v145_v57, 2  ;;  %v208_v46 = vsel %vm204_vm0, %v197_v40, %v198_v41  ;;  %v209_v56 = vsel %vm204_vm0, %v196_v16, %v197_v40  ;;  %v4904_v16 = vld [vmem:[#allocation5 + $0x50] ss:$12 sps:$4 sm:$0xff]  }
  0x6d   :  { %4442 = vmatmul.mubr.bf16.vlgmr.msra.gmra.mxu1 %v222_v2  ;;  %4458 = vmatpush3.bf16.msra.mxu0 %v4879_v59  ;;  %v207_v57 = vsel %vm204_vm0, %v198_v41, %v199_v43 }
  0x6e   :  { %777 = vmatpush1.bf16.msra.mxu1 %v4876_v5  ;;  %432 = vmatprep.mubr.bf16.mxu0 %v5211_v0  ;;  %v1012_v53 = vsel %vm1002_vm1, %v991_v45, %v992_v49  ;;  %v1013_v54 = vsel %vm1002_vm1, %v5328_v38, %v991_v45  ;;  %v4892_v38 = vld [vmem:[#allocation5 + $0x4c] ss:$12 sps:$4 sm:$0xff]   ;;  %v1011_v62 = vsel %vm1002_vm1, %v992_v49, %v993_v39 }
  0x6f   :  { %778 = vmatprep.subr.bf16.mxu1 %v4882_v8  ;;  %4445 = vmatprep.mubr.bf16.mxu1 %v5375_v13  ;;  %v5425_v59 = vpack.c.bf16 %v1012_v53, %v1013_v54  ;;  %v1010_v3 = vsel %vm1002_vm1, %v993_v39, %v994_v61  ;;  %v5442_v5 = vpack.c.bf16 %v208_v46, %v209_v56  ;;  %v4890_v8 = vld [vmem:[#allocation5 + $0x48] ss:$12 sps:$4 sm:$0xff]   ;;  %v4897_v45 = vld [vmem:[#allocation5 + $0x18] ss:$12 sps:$4 sm:$0xff]   ;;  %v4915_v53 = vld [vmem:[#allocation5 + $0x230] ss:$12 sps:$4 sm:$0xff]  }
  0x70   :  { %4459 = vmatprep.subr.bf16.mxu0 %v4886_v14  ;;  %v5444_v7 = vpack.c.bf16 %v1010_v3, %v1011_v62  ;;  %v4919_v54 = vld [vmem:[#allocation5 + $0x218] ss:$12 sps:$4 sm:$0xff]   ;;  %v4942_v56 = vld [vmem:[#allocation5 + $0x1a0] ss:$12 sps:$4 sm:$0xff]   ;;  %v4946_v61 = vld [vmem:[#allocation5 + $0x188] ss:$12 sps:$4 sm:$0xff]  }
  0x71   :  { %4460 = vmatpush3.bf16.msra.mxu0 %v4886_v14  ;;  %v998_v14 = vrot.slane %v150_v26, 2  ;;  %v4914_v39 = vld [vmem:[#allocation5 + $0x22c] ss:$12 sps:$4 sm:$0xff]   ;;  %v4916_v62 = vld [vmem:[#allocation5 + $0x210] ss:$12 sps:$4 sm:$0xff]  }
  0x72   :  { %779 = vmatpush1.bf16.msra.mxu1 %v4880_v12  ;;  %4461 = vmatprep.subr.bf16.mxu0 %v4893_v27  ;;  %v997_v12 = vrot.slane %v149_v24, 2  ;;  %v4894_v24 = vld [vmem:[#allocation5 + $0x30] ss:$12 sps:$4 sm:$0xff]   ;;  %v4937_v46 = vld [vmem:[#allocation5 + $0x1b8] ss:$12 sps:$4 sm:$0xff]  }
  0x73   :  { %780 = vmatprep.subr.bf16.mxu1 %v4885_v23  ;;  %v999_v23 = vrot.slane %v151_v28, 2  ;;  %v4899_v28 = vld [vmem:[#allocation5 + $0x1c] ss:$12 sps:$4 sm:$0xff]   ;;  %v4921_v3 = vld [vmem:[#allocation5 + $0x1f8] ss:$12 sps:$4 sm:$0xff]  }
  0x74   :  { %433 = vmatmul.mubr.bf16.gmra.mxu0 %v222_v2  ;;  %v206_v2 = vsel %vm204_vm0, %v199_v43, %v200_v50  ;;  %v1006_v19 = vsel %vm1002_vm1, %v997_v12, %v998_v14  ;;  %v1007_v20 = vsel %vm1002_vm1, %v996_v4, %v997_v12  ;;  %v4932_v4 = vld [vmem:[#allocation5 + $0x1cc] ss:$12 sps:$4 sm:$0xff]  }
  0x75   :  { %4446 = vmatmul.mubr.bf16.gmra.mxu1 %v5401_v36  ;;  %442 = vmatprep.mubr.bf16.mxu0 %v5211_v0  ;;  %v5450_v15 = vpack.c.bf16 %v206_v2, %v207_v57  ;;  %v5462_v26 = vpack.c.bf16 %v1006_v19, %v1007_v20  ;;  %v4918_v57 = vld [vmem:[#allocation5 + $0x214] ss:$12 sps:$4 sm:$0xff]   ;;  %v4923_v2 = vld [vmem:[#allocation5 + $0x1fc] ss:$12 sps:$4 sm:$0xff]  }
  0x76   :  { %781 = vmatpush1.bf16.msra.mxu1 %v4883_v32  ;;  %4449 = vmatprep.mubr.bf16.mxu1 %v5403_v42  ;;  %v205_v32 = vsel %vm204_vm0, %v200_v50, %v201_v6  ;;  %v4903_v50 = vld [vmem:[#allocation5 + $0x4] ss:$12 sps:$4 sm:$0xff]   ;;  %v4941_v6 = vld [vmem:[#allocation5 + $0x19c] ss:$12 sps:$4 sm:$0xff]  }
  0x77   :  { %782 = vmatprep.subr.bf16.mxu1 %v4889_v37  ;;  %4462 = vmatpush3.bf16.msra.mxu0 %v4893_v27  ;;  %v1000_v27 = vrot.slane %v152_v35, 2  ;;  %v1001_v37 = vrot.slane %v153_v51, 2  ;;  %v228_v41 = vpack.c.bf16 %v220_v33, %v205_v32  ;;  %v4901_v51 = vld [vmem:[#allocation5] ss:$12 sps:$4 sm:$0xff]   ;;  %v4957_v12 = vld [vmem:[#allocation7 + $0x58] sm:$0xff]  }
  0x78   :  { %4463 = vmatprep.subr.bf16.mxu0 %v4900_v52 }
  0x79   :  { %v1004_v35 = vsel %vm1002_vm1, %v999_v23, %v1000_v27  ;;  %v1003_v31 = vsel %vm1002_vm1, %v1000_v27, %v1001_v37  ;;  %v1018_v43 = vsel %vm1002_vm1, %v1001_v37, %v5339_v48  ;;  %v4910_v48 = vld [vmem:[#allocation5 + $0x8] ss:$12 sps:$4 sm:$0xff]  }
  0x7a   :  { %783 = vmatpush1.bf16.msra.mxu1 %v4887_v55  ;;  %v5482_v49 = vpack.c.bf16 %v1018_v43, %v1003_v31  ;;  %v4928_v55 = vld [vmem:[#allocation5 + $0x1e8] ss:$12 sps:$4 sm:$0xff]   ;;  %v4962_v31 = vld [vmem:[#allocation7 + $0x40] sm:$0xff]  }
  0x7b   :  { %784 = vmatprep.subr.bf16.mxu1 %v4892_v38  ;;  %4464 = vmatpush3.bf16.msra.mxu0 %v4900_v52  ;;  %v4908_v52 = vld [vmem:[#allocation5 + $0x20] ss:$12 sps:$4 sm:$0xff]   ;;  %v4912_v38 = vld [vmem:[#allocation5 + $0x228] ss:$12 sps:$4 sm:$0xff]  }
  0x7c   :  { %443 = vmatmul.mubr.bf16.gmra.mxu0 %v5375_v13  ;;  %v1005_v13 = vsel %vm1002_vm1, %v998_v14, %v999_v23  ;;  %4465 = vmatprep.subr.bf16.mxu0 %v4904_v16  ;;  %v4958_v14 = vld [vmem:[#allocation7 + $0x8] sm:$0xff]  }
  0x7d   :  { %4450 = vmatmul.mubr.bf16.gmra.mxu1 %v5442_v5  ;;  %452 = vmatprep.mubr.bf16.mxu0 %v5211_v0  ;;  %v5475_v40 = vpack.c.bf16 %v1004_v35, %v1005_v13 }
  0x7e   :  { %785 = vmatpush1.bf16.msra.mxu1 %v4890_v8  ;;  %4453 = vmatprep.mubr.bf16.mxu1 %v5450_v15  ;;  %v4945_v8 = vld [vmem:[#allocation5 + $0x184] ss:$12 sps:$4 sm:$0xff]  }
  0x7f   :  { %786 = vmatprep.subr.bf16.mxu1 %v4896_v63  ;;  %4466 = vmatpush3.bf16.msra.mxu0 %v4904_v16  ;;  %v4959_v63 = vld [vmem:[#allocation7 + $0x50] sm:$0xff]  }
  0x80   :  { %4467 = vmatprep.subr.bf16.mxu0 %v4906_v34 }
  0x82   :  { %787 = vmatpush1.bf16.msra.mxu1 %v4894_v24 }
  0x83   :  { %788 = vmatprep.subr.bf16.mxu1 %v4899_v28  ;;  %4468 = vmatpush3.bf16.msra.mxu0 %v4906_v34 }
  0x84   :  { %453 = vmatmul.mubr.bf16.gmra.mxu0 %v5401_v36  ;;  %4469 = vmatprep.subr.bf16.mxu0 %v4908_v52  ;;  %v4924_v36 = vld [vmem:[#allocation5 + $0x200] ss:$12 sps:$4 sm:$0xff]  }
  0x85   :  { %4454 = vmatmul.mubr.bf16.gmra.mxu1 %v228_v41  ;;  %462 = vmatprep.mubr.bf16.mxu0 %v5211_v0 }
  0x86   :  { %789 = vmatpush1.bf16.msra.mxu1 %v4897_v45  ;;  %808 = vmatprep.mubr.bf16.mxu1 %v5211_v0 }
  0x87   :  { %790 = vmatprep.subr.bf16.mxu1 %v4903_v50  ;;  %4470 = vmatpush3.bf16.msra.mxu0 %v4908_v52 }
  0x88   :  { %4471 = vmatprep.subr.bf16.mxu0 %v4910_v48 }
  0x8a   :  { %791 = vmatpush1.bf16.msra.mxu1 %v4901_v51 }
  0x8b   :  { %4489 = vmatprep.subr.bf16.mxu1 %v4915_v53  ;;  %4472 = vmatpush3.bf16.msra.mxu0 %v4910_v48 }
  0x8c   :  { %463 = vmatmul.mubr.bf16.gmra.mxu0 %v5403_v42  ;;  %1188 = vmatprep.subr.bf16.mxu0 %v4914_v39  ;;  %v4933_v42 = vld [vmem:[#allocation5 + $0x1d0] ss:$12 sps:$4 sm:$0xff]  }
  0x8d   :  { %809 = vmatmul.mubr.bf16.vlgmr.msra.gmra.mxu1 %v5311_v21  ;;  %472 = vmatprep.mubr.bf16.mxu0 %v5211_v0 }
  0x8e   :  { %818 = vmatprep.mubr.bf16.mxu1 %v5211_v0  ;;  %4490 = vmatpush3.bf16.msra.mxu1 %v4915_v53 }
  0x8f   :  { %4491 = vmatprep.subr.bf16.mxu1 %v4919_v54 }
  0x92   :  { %4492 = vmatpush3.bf16.msra.mxu1 %v4919_v54 }
  0x93   :  { %4493 = vmatprep.subr.bf16.mxu1 %v4924_v36 }
  0x94   :  { %473 = vmatmul.mubr.bf16.gmra.mxu0 %v5442_v5  ;;  %v4936_v5 = vld [vmem:[#allocation5 + $0x1b4] ss:$12 sps:$4 sm:$0xff]  }
  0x95   :  { %819 = vmatmul.mubr.bf16.gmra.mxu1 %v5313_v22  ;;  %482 = vmatprep.mubr.bf16.mxu0 %v5211_v0 }
  0x96   :  { %828 = vmatprep.mubr.bf16.mxu1 %v5211_v0  ;;  %4494 = vmatpush3.bf16.msra.mxu1 %v4924_v36 }
  0x97   :  { %4495 = vmatprep.subr.bf16.mxu1 %v4928_v55 }
  0x9a   :  { %4496 = vmatpush3.bf16.msra.mxu1 %v4928_v55 }
  0x9b   :  { %4497 = vmatprep.subr.bf16.mxu1 %v4933_v42 }
  0x9c   :  { %483 = vmatmul.mubr.bf16.gmra.mxu0 %v5450_v15  ;;  %v4960_v15 = vld [vmem:[#allocation7] sm:$0xff]  }
  0x9d   :  { %829 = vmatmul.mubr.bf16.gmra.mxu1 %v5317_v25  ;;  %492 = vmatprep.mubr.bf16.mxu0 %v5211_v0 }
  0x9e   :  { %838 = vmatprep.mubr.bf16.mxu1 %v5211_v0  ;;  %4498 = vmatpush3.bf16.msra.mxu1 %v4933_v42 }
  0x9f   :  { %4499 = vmatprep.subr.bf16.mxu1 %v4937_v46 }
  0xa2   :  { %4500 = vmatpush3.bf16.msra.mxu1 %v4937_v46 }
  0xa3   :  { %4501 = vmatprep.subr.bf16.mxu1 %v4942_v56 }
  0xa4   :  { %493 = vmatmul.mubr.bf16.gmra.mxu0 %v228_v41 }
  0xa5   :  { %839 = vmatmul.mubr.bf16.gmra.mxu1 %v5333_v44  ;;  %4473 = vmatprep.mubr.bf16.mxu0 %v5311_v21  ;;  %v4925_v21 = vld [vmem:[#allocation5 + $0x1e0] ss:$12 sps:$4 sm:$0xff]  }
  0xa6   :  { %848 = vmatprep.mubr.bf16.mxu1 %v5211_v0  ;;  %4502 = vmatpush3.bf16.msra.mxu1 %v4942_v56 }
  0xa7   :  { %4503 = vmatprep.subr.bf16.mxu1 %v4946_v61 }
  0xaa   :  { %4504 = vmatpush3.bf16.msra.mxu1 %v4946_v61 }
  0xac   :  { %4474 = vmatmul.mubr.bf16.vlgmr.msra.gmra.mxu0 %v5313_v22  ;;  %v4930_v22 = vld [vmem:[#allocation5 + $0x1c8] ss:$12 sps:$4 sm:$0xff]  }
  0xad   :  { %849 = vmatmul.mubr.bf16.gmra.mxu1 %v5337_v47  ;;  %1189 = vmatpush1.bf16.msra.mxu0 %v4912_v38 }
  0xae   :  { %858 = vmatprep.mubr.bf16.mxu1 %v5211_v0  ;;  %1190 = vmatprep.subr.bf16.mxu0 %v4918_v57 }
  0xaf   :  { %4477 = vmatprep.mubr.bf16.mxu0 %v5317_v25  ;;  %v4934_v25 = vld [vmem:[#allocation5 + $0x1b0] ss:$12 sps:$4 sm:$0xff]  }
  0xb1   :  { %1191 = vmatpush1.bf16.msra.mxu0 %v4916_v62 }
  0xb2   :  { %1192 = vmatprep.subr.bf16.mxu0 %v4923_v2 }
  0xb4   :  { %4478 = vmatmul.mubr.bf16.gmra.mxu0 %v5333_v44  ;;  %v4939_v44 = vld [vmem:[#allocation5 + $0x198] ss:$12 sps:$4 sm:$0xff]  }
  0xb5   :  { %859 = vmatmul.mubr.bf16.gmra.mxu1 %v5354_v60  ;;  %1193 = vmatpush1.bf16.msra.mxu0 %v4921_v3 }
  0xb6   :  { %868 = vmatprep.mubr.bf16.mxu1 %v5211_v0  ;;  %1194 = vmatprep.subr.bf16.mxu0 %v4927_v58  ;;  %v5594_v58 = vld [vmem:[#allocation8 + $0x78] sm:$0xff]  }
  0xb7   :  { %4481 = vmatprep.mubr.bf16.mxu0 %v5337_v47  ;;  %v4943_v47 = vld [vmem:[#allocation5 + $0x180] ss:$12 sps:$4 sm:$0xff]   ;;  %7088 = vst [vmem:[#allocation20_spill] sm:$0xff] %v5594_v58 }
  0xb9   :  { %1195 = vmatpush1.bf16.msra.mxu0 %v4925_v21 }
  0xba   :  { %1196 = vmatprep.subr.bf16.mxu0 %v4932_v4 }
  0xbc   :  { %4482 = vmatmul.mubr.bf16.gmra.mxu0 %v5354_v60  ;;  %v4947_v60 = vld [vmem:[#allocation7 + $0x38] sm:$0xff]  }
  0xbd   :  { %869 = vmatmul.mubr.bf16.gmra.mxu1 %v5369_v9  ;;  %1197 = vmatpush1.bf16.msra.mxu0 %v4930_v22 }
  0xbe   :  { %878 = vmatprep.mubr.bf16.mxu1 %v5211_v0  ;;  %1198 = vmatprep.subr.bf16.mxu0 %v4936_v5 }
  0xbf   :  { %4485 = vmatprep.mubr.bf16.mxu0 %v5369_v9  ;;  %v4948_v9 = vld [vmem:[#allocation7 + $0x30] sm:$0xff]  }
  0xc1   :  { %1199 = vmatpush1.bf16.msra.mxu0 %v4934_v25 }
  0xc2   :  { %1200 = vmatprep.subr.bf16.mxu0 %v4941_v6  ;;  %v5603_v6 = vld [vmem:[#allocation7 + $0xb8] sm:$0xff]  }
  0xc3   :  { %7089 = vst [vmem:[#allocation21_spill] sm:$0xff] %v5603_v6 }
  0xc4   :  { %4486 = vmatmul.mubr.bf16.gmra.mxu0 %v5381_v17 }
  0xc5   :  { %879 = vmatmul.mubr.bf16.gmra.mxu1 %v5381_v17  ;;  %1201 = vmatpush1.bf16.msra.mxu0 %v4939_v44  ;;  %v4949_v17 = vld [vmem:[#allocation7 + $0x78] sm:$0xff]  }
  0xc6   :  { %1220 = vmatprep.mubr.bf16.mxu0 %v5211_v0  ;;  %1202 = vmatprep.subr.bf16.mxu0 %v4945_v8 }
  0xc7   :  { %4505 = vmatprep.mubr.bf16.mxu1 %v5391_v29  ;;  %4521 = vmatprep.subr.bf16.mxu1 %v4949_v17 }
  0xc9   :  { %1203 = vmatpush1.bf16.msra.mxu0 %v4943_v47 }
  0xca   :  { %4553 = vmatprep.subr.bf16.mxu0 %v4947_v60 }
  0xcc   :  { %1221 = vmatmul.mubr.bf16.vlgmr.msra.gmra.mxu0 %v5391_v29  ;;  %v4950_v29 = vld [vmem:[#allocation7 + $0x28] sm:$0xff]  }
  0xcd   :  { %4506 = vmatmul.mubr.bf16.vlgmr.msra.gmra.mxu1 %v5393_v30  ;;  %1230 = vmatprep.mubr.bf16.mxu0 %v5211_v0 }
  0xce   :  { %4509 = vmatprep.mubr.bf16.mxu1 %v5425_v59  ;;  %4554 = vmatpush3.bf16.msra.mxu0 %v4947_v60 }
  0xcf   :  { %4555 = vmatprep.subr.bf16.mxu0 %v4948_v9  ;;  %4522 = vmatpush3.bf16.msra.mxu1 %v4949_v17 }
  0xd2   :  { %4556 = vmatpush3.bf16.msra.mxu0 %v4948_v9 }
  0xd3   :  { %4557 = vmatprep.subr.bf16.mxu0 %v4950_v29 }
  0xd4   :  { %1231 = vmatmul.mubr.bf16.gmra.mxu0 %v5393_v30  ;;  %v4951_v30 = vld [vmem:[#allocation7 + $0x70] sm:$0xff]  }
  0xd5   :  { %4510 = vmatmul.mubr.bf16.gmra.mxu1 %v5444_v7  ;;  %1240 = vmatprep.mubr.bf16.mxu0 %v5211_v0 }
  0xd6   :  { %4513 = vmatprep.mubr.bf16.mxu1 %v5452_v1  ;;  %4558 = vmatpush3.bf16.msra.mxu0 %v4950_v29 }
  0xd7   :  { %4523 = vmatprep.subr.bf16.mxu1 %v4951_v30 }
  0xd8   :  { %4524 = vmatpush3.bf16.msra.mxu1 %v4951_v30 }
  0xdc   :  { %1241 = vmatmul.mubr.bf16.gmra.mxu0 %v5425_v59  ;;  %v4952_v59 = vld [vmem:[#allocation7 + $0x20] sm:$0xff]  }
  0xdd   :  { %4514 = vmatmul.mubr.bf16.gmra.mxu1 %v5462_v26  ;;  %1250 = vmatprep.mubr.bf16.mxu0 %v5211_v0 }
  0xde   :  { %4517 = vmatprep.mubr.bf16.mxu1 %v5475_v40  ;;  %4559 = vmatprep.subr.bf16.mxu0 %v4952_v59 }
  0xdf   :  { %4560 = vmatpush3.bf16.msra.mxu0 %v4952_v59 }
  0xe4   :  { %1251 = vmatmul.mubr.bf16.gmra.mxu0 %v5444_v7  ;;  %v4954_v7 = vld [vmem:[#allocation7 + $0x18] sm:$0xff]  }
  0xe5   :  { %4518 = vmatmul.mubr.bf16.gmra.mxu1 %v5482_v49  ;;  %1260 = vmatprep.mubr.bf16.mxu0 %v5211_v0 }
  0xe6   :  { %4561 = vmatprep.subr.bf16.mxu0 %v4954_v7 }
  0xe7   :  { %4562 = vmatpush3.bf16.msra.mxu0 %v4954_v7 }
  0xe8   :  { %4563 = vmatprep.subr.bf16.mxu0 %v4956_v11 }
  0xeb   :  { %4564 = vmatpush3.bf16.msra.mxu0 %v4956_v11 }
  0xec   :  { %1261 = vmatmul.mubr.bf16.gmra.mxu0 %v5452_v1  ;;  %4565 = vmatprep.subr.bf16.mxu0 %v4958_v14  ;;  %v4961_v1 = vld [vmem:[#allocation7 + $0x48] sm:$0xff]  }
  0xed   :  { %1270 = vmatprep.mubr.bf16.mxu0 %v5211_v0 }
  0xef   :  { %4566 = vmatpush3.bf16.msra.mxu0 %v4958_v14 }
  0xf0   :  { %4567 = vmatprep.subr.bf16.mxu0 %v4960_v15 }
  0xf3   :  { %4568 = vmatpush3.bf16.msra.mxu0 %v4960_v15 }
  0xf4   :  { %1271 = vmatmul.mubr.bf16.gmra.mxu0 %v5462_v26  ;;  %4617 = vmatprep.subr.bf16.mxu0 %v5594_v58 }
  0xf5   :  { %1280 = vmatprep.mubr.bf16.mxu0 %v5211_v0 }
  0xfc   :  { %1281 = vmatmul.mubr.bf16.gmra.mxu0 %v5475_v40 }
  0xfd   :  { %1290 = vmatprep.mubr.bf16.mxu0 %v5211_v0  ;;  %v4953_v0 = vld [vmem:[#allocation7 + $0x68] sm:$0xff]  }
  0xfe   :  { %4525 = vmatprep.subr.bf16.mxu1 %v4953_v0 }
  0xff   :  { %4526 = vmatpush3.bf16.msra.mxu1 %v4953_v0 }
 0x100   :  { %4527 = vmatprep.subr.bf16.mxu1 %v4955_v10 }
 0x103   :  { %4528 = vmatpush3.bf16.msra.mxu1 %v4955_v10 }
 0x104   :  { %1291 = vmatmul.mubr.bf16.gmra.mxu0 %v5482_v49  ;;  %4529 = vmatprep.subr.bf16.mxu1 %v4957_v12 }
 0x107   :  { %4530 = vmatpush3.bf16.msra.mxu1 %v4957_v12 }
 0x108   :  { %4531 = vmatprep.subr.bf16.mxu1 %v4959_v63 }
 0x10b   :  { %4532 = vmatpush3.bf16.msra.mxu1 %v4959_v63 }
 0x10c   :  { %4533 = vmatprep.subr.bf16.mxu1 %v4961_v1 }
 0x10f   :  { %4534 = vmatpush3.bf16.msra.mxu1 %v4961_v1 }
 0x110   :  { %4535 = vmatprep.subr.bf16.mxu1 %v4962_v31 }
 0x113   :  { %4536 = vmatpush3.bf16.msra.mxu1 %v4962_v31 }
 0x114   :  { %4585 = vmatprep.subr.bf16.mxu1 %v5603_v6 }
 0x12c   :  { %v424_v16 = vpop.f32.mrf.mxu0 }
 0x12d   :  { %v5540_v19 = vpop.f32.mrf.mxu1 }
 0x12e   :  { %v5542_v20 = vpop.f32.mrf.mxu0 }
 0x12f   :  { %v5544_v23 = vpop.f32.mrf.mxu1 }
 0x130   :  { %v428_v24 = vpop.f32.mrf.mxu0 }
 0x131   :  { %v5546_v26 = vpop.f32.mrf.mxu1 }
 0x132   :  { %v5548_v27 = vpop.f32.mrf.mxu0 }
 0x133   :  { %v5550_v32 = vpop.f32.mrf.mxu1 }
 0x134   :  { %v434_v33 = vpop.f32.mrf.mxu0 }
 0x135   :  { %v5552_v34 = vpop.f32.mrf.mxu1 }
 0x136   :  { %v5554_v13 = vpop.f32.mrf.mxu0 }
 0x137   :  { %v5556_v28 = vpop.f32.mrf.mxu1 }
 0x138   :  { %v438_v35 = vpop.f32.mrf.mxu0 }
 0x139   :  { %v5558_v37 = vpop.f32.mrf.mxu1 }
 0x13a   :  { %v5560_v40 = vpop.f32.mrf.mxu0 }
 0x13b   :  { %v5562_v41 = vpop.f32.mrf.mxu1 }
 0x13c   :  { %v444_v43 = vpop.f32.mrf.mxu0 }
 0x13d   :  { %v5564_v45 = vpop.f32.mrf.mxu1 }
 0x13e   :  { %v5566_v49 = vpop.f32.mrf.mxu0 }
 0x13f   :  { %v5568_v50 = vpop.f32.mrf.mxu1 }
 0x140   :  { %v448_v51 = vpop.f32.mrf.mxu0 }
 0x141   :  { %v5570_v52 = vpop.f32.mrf.mxu1 }
 0x142   :  { %v5572_v53 = vpop.f32.mrf.mxu0 }
 0x143   :  { %v5574_v48 = vpop.f32.mrf.mxu1 }
 0x144   :  { %v454_v54 = vpop.f32.mrf.mxu0 }
 0x145   :  { %v5576_v39 = vpop.f32.mrf.mxu1 }
 0x146   :  { %v5578_v36 = vpop.f32.mrf.mxu0 }
 0x147   :  { %v5580_v55 = vpop.f32.mrf.mxu1 }
 0x148   :  { %v458_v42 = vpop.f32.mrf.mxu0 }
 0x149   :  { %v5582_v46 = vpop.f32.mrf.mxu1 }
 0x14a   :  { %v5584_v56 = vpop.f32.mrf.mxu0 }
 0x14b   :  { %v5586_v61 = vpop.f32.mrf.mxu1 }
 0x14c   :  { %7087 = vst [vmem:[#allocation19_spill] sm:$0xff] %v5586_v61  ;;  %v464_v38 = vpop.f32.mrf.mxu0 }
 0x14d   :  { %v810_v57 = vpop.f32.mrf.mxu1 }
 0x14e   :  { %v5588_v62 = vadd.f32 %v810_v57, %v424_v16  ;;  %v5590_v2 = vpop.f32.mrf.mxu0 }
 0x14f   :  { %v5592_v3 = vpop.f32.mrf.mxu1 }
 0x150   :  { %v468_v21 = vpop.f32.mrf.mxu0 }
 0x151   :  { %v814_v4 = vpop.f32.mrf.mxu1 }
 0x152   :  { %v5596_v22 = vadd.f32 %v814_v4, %v428_v24  ;;  %v5599_v5 = vpop.f32.mrf.mxu0 }
 0x153   :  { %v5601_v25 = vpop.f32.mrf.mxu1 }
 0x154   :  { %v474_v44 = vpop.f32.mrf.mxu0 }
 0x155   :  { %v820_v8 = vpop.f32.mrf.mxu1 }
 0x156   :  { %v5606_v47 = vadd.f32 %v820_v8, %v434_v33  ;;  %v5608_v60 = vpop.f32.mrf.mxu0 }
 0x157   :  { %v5610_v9 = vpop.f32.mrf.mxu1 }
 0x158   :  { %7090 = vst [vmem:[#allocation22_spill] sm:$0xff] %v5606_v47  ;;  %v478_v17 = vpop.f32.mrf.mxu0 }
 0x159   :  { %v824_v29 = vpop.f32.mrf.mxu1 }
 0x15a   :  { %v5612_v30 = vadd.f32 %v824_v29, %v438_v35  ;;  %v5614_v59 = vpop.f32.mrf.mxu0 }
 0x15b   :  { %v5616_v0 = vpop.f32.mrf.mxu1 }
 0x15c   :  { %7091 = vst [vmem:[#allocation23_spill] sm:$0xff] %v5612_v30  ;;  %v484_v7 = vpop.f32.mrf.mxu0 }
 0x15d   :  { %v830_v10 = vpop.f32.mrf.mxu1 }
 0x15e   :  { %v5618_v11 = vadd.f32 %v830_v10, %v444_v43  ;;  %v5620_v12 = vpop.f32.mrf.mxu0 }
 0x15f   :  { %v5622_v14 = vpop.f32.mrf.mxu1 }
 0x160   :  { %7092 = vst [vmem:[#allocation24_spill] sm:$0xff] %v5618_v11  ;;  %v488_v63 = vpop.f32.mrf.mxu0 }
 0x161   :  { %v834_v15 = vpop.f32.mrf.mxu1 }
 0x162   :  { %v5624_v1 = vadd.f32 %v834_v15, %v448_v51  ;;  %v5626_v16 = vpop.f32.mrf.mxu0 }
 0x163   :  { %v5628_v24 = vpop.f32.mrf.mxu1 }
 0x164   :  { %7093 = vst [vmem:[#allocation25_spill] sm:$0xff] %v5624_v1  ;;  %v494_v33 = vpop.f32.mrf.mxu0 }
 0x165   :  { %v840_v35 = vpop.f32.mrf.mxu1 }
 0x166   :  { %v5630_v31 = vadd.f32 %v840_v35, %v454_v54  ;;  %v5632_v57 = vpop.f32.mrf.mxu0 }
 0x167   :  { %v5634_v43 = vpop.f32.mrf.mxu1 }
 0x168   :  { %7094 = vst [vmem:[#allocation26_spill] sm:$0xff] %v5630_v31  ;;  %v498_v4 = vpop.f32.mrf.mxu0 }
 0x169   :  { %v844_v8 = vpop.f32.mrf.mxu1 }
 0x16a   :  { %v5636_v29 = vadd.f32 %v844_v8, %v458_v42  ;;  %v5638_v10 = vpop.f32.mrf.mxu0 }
 0x16b   :  { %v5640_v51 = vpop.f32.mrf.mxu1 }
 0x16c   :  { %7095 = vst [vmem:[#allocation27_spill] sm:$0xff] %v5636_v29  ;;  %v4475_v6 = vpop.f32.mrf.mxu0 }
 0x16d   :  { %v850_v15 = vpop.f32.mrf.mxu1  ;;  %v5645_v1 = vadd.f32 %v4475_v6, %v5540_v19 }
 0x16e   :  { %v5642_v58 = vadd.f32 %v850_v15, %v464_v38  ;;  %v923_v35 = vpop.f32.mrf.mxu0 }
 0x16f   :  { %v5647_v54 = vpop.f32.mrf.mxu1  ;;  %v5650_v31 = vadd.f32 %v923_v35, %v5544_v23 }
 0x170   :  { %7096 = vst [vmem:[#allocation28_spill] sm:$0xff] %v5642_v58  ;;  %v4476_v42 = vpop.f32.mrf.mxu0 }
 0x171   :  { %v854_v11 = vpop.f32.mrf.mxu1  ;;  %v5655_v29 = vadd.f32 %v4476_v42, %v5546_v26 }
 0x172   :  { %v5652_v8 = vadd.f32 %v854_v11, %v468_v21  ;;  %v5659_v38 = vpop.f32.mrf.mxu0 }
 0x173   :  { %v5657_v30 = vpop.f32.mrf.mxu1 }
 0x174   :  { %7097 = vst [vmem:[#allocation29_spill] sm:$0xff] %v5652_v8  ;;  %v4479_v19 = vpop.f32.mrf.mxu0 }
 0x175   :  { %v860_v15 = vpop.f32.mrf.mxu1  ;;  %v5664_v58 = vadd.f32 %v4479_v19, %v5552_v34 }
 0x176   :  { %v5661_v6 = vadd.f32 %v860_v15, %v474_v44  ;;  %v939_v35 = vpop.f32.mrf.mxu0 }
 0x177   :  { %7099 = vst [vmem:[#allocation31_spill] sm:$0xff] %v5664_v58  ;;  %v5666_v23 = vpop.f32.mrf.mxu1  ;;  %v5669_v21 = vadd.f32 %v939_v35, %v5556_v28 }
 0x178   :  { %7098 = vst [vmem:[#allocation30_spill] sm:$0xff] %v5661_v6  ;;  %v4480_v26 = vpop.f32.mrf.mxu0 }
 0x179   :  { %v864_v11 = vpop.f32.mrf.mxu1  ;;  %v5674_v8 = vadd.f32 %v4480_v26, %v5558_v37 }
 0x17a   :  { %v5671_v42 = vadd.f32 %v864_v11, %v478_v17  ;;  %v942_v61 = vpop.f32.mrf.mxu0 }
 0x17b   :  { %7101 = vst [vmem:[#allocation33_spill] sm:$0xff] %v5674_v8  ;;  %v866_v47 = vpop.f32.mrf.mxu1 }
 0x17c   :  { %7100 = vst [vmem:[#allocation32_spill] sm:$0xff] %v5671_v42  ;;  %v4483_v15 = vpop.f32.mrf.mxu0 }
 0x17d   :  { %v870_v44 = vpop.f32.mrf.mxu1  ;;  %v5679_v34 = vadd.f32 %v4483_v15, %v5564_v45 }
 0x17e   :  { %v5676_v6 = vadd.f32 %v870_v44, %v484_v7  ;;  %v955_v58 = vpop.f32.mrf.mxu0 }
 0x17f   :  { %v872_v19 = vpop.f32.mrf.mxu1  ;;  %v5682_v28 = vadd.f32 %v955_v58, %v5568_v50  ;;  %v1450_v58 = vsub.s32 0, %v5309_v18 }
 0x180   :  { %7102 = vst [vmem:[#allocation34_spill] sm:$0xff] %v5676_v6  ;;  %v4484_v17 = vpop.f32.mrf.mxu0 }
 0x181   :  { %v874_v35 = vpop.f32.mrf.mxu1  ;;  %v5687_v37 = vadd.f32 %v4484_v17, %v5570_v52  ;;  %v1454_v52 = vsub.s32 1, %v5309_v18 }
 0x182   :  { %v5684_v11 = vadd.f32 %v874_v35, %v488_v63  ;;  %v958_v42 = vpop.f32.mrf.mxu0  ;;  %v1458_v63 = vsub.s32 2, %v5309_v18 }
 0x183   :  { %v876_v26 = vpop.f32.mrf.mxu1 }
 0x184   :  { %7103 = vst [vmem:[#allocation35_spill] sm:$0xff] %v5684_v11  ;;  %v4487_v7 = vpop.f32.mrf.mxu0 }
 0x185   :  { %v880_v8 = vpop.f32.mrf.mxu1  ;;  %v5692_v45 = vadd.f32 %v4487_v7, %v5576_v39 }
 0x186   :  { %v5689_v44 = vadd.f32 %v880_v8, %v494_v33  ;;  %v971_v6 = vpop.f32.mrf.mxu0  ;;  %v1446_v33 = vld [vmem:[%s7060_s2] sm:$0x7] }
 0x187   :  { %7105 = vst [vmem:[#allocation37_spill] sm:$0xff] %v5692_v45  ;;  %v882_v15 = vpop.f32.mrf.mxu1  ;;  %v5695_v50 = vadd.f32 %v971_v6, %v5580_v55  ;;  %v5709_v55 = vadd.s32 8, %v5309_v18  ;;  %v5713_v11 = vrot.slane %v1446_v33, %v1458_v63  ;;  %v813_v45 = vadd.f32 %v5592_v3, %v5542_v20  ;;  %v5040_v18 = vld [vmem:[#allocation11 + $0x90] sm:$0xff]  }
 0x188   :  { %7104 = vst [vmem:[#allocation36_spill] sm:$0xff] %v5689_v44  ;;  %v4488_v17 = vpop.f32.mrf.mxu0  ;;  %v5711_v44 = vrot.slane %v1446_v33, %v1450_v58  ;;  %v5729_v63 = vadd.f32 %v5622_v14, %v5566_v49  ;;  %v5748_v49 = vadd.f32 %v5647_v54, %v5590_v2  ;;  %v5761_v2 = vadd.f32 %v5666_v23, %v5608_v60 }
 0x189   :  { %7106 = vst [vmem:[#allocation38_spill] sm:$0xff] %v5695_v50  ;;  %v884_v35 = vpop.f32.mrf.mxu1  ;;  %v5706_v39 = vadd.f32 %v4488_v17, %v5582_v46  ;;  %v5715_v50 = vrot.slane %v1446_v33, %v1454_v52  ;;  %v823_v46 = vadd.f32 %v5610_v9, %v5554_v13  ;;  %v5733_v52 = vadd.f32 %v5628_v24, %v5572_v53 }
 0x18a   :  { %v5703_v8 = vadd.f32 %v884_v35, %v498_v4  ;;  %v974_v7 = vpop.f32.mrf.mxu0  ;;  %v817_v4 = vadd.f32 %v5601_v25, %v5548_v27  ;;  %v5725_v35 = vadd.f32 %v5616_v0, %v5560_v40  ;;  %vm1561_vm2 = vcmp.lt.s32.totalorder %v5709_v55, 14 }
 0x18b   :  { %v886_v6 = vpop.f32.mrf.mxu1  ;;  %v5740_v13 = vadd.f32 %v5634_v43, %v5578_v36  ;;  %v5744_v40 = vadd.f32 %v5640_v51, %v5584_v56  ;;  %v5752_v53 = vadd.f32 %v5657_v30, %v5599_v5  ;;  %v927_v56 = vadd.f32 %v5659_v38, %v5550_v32  ;;  %v7107_v38 = vld [vmem:[#allocation19_spill] sm:$0xff] }
 0x18c   :  { %v1222_v17 = vpop.f32.mrf.mxu0  ;;  %v5764_v14 = vadd.f32 %v866_v47, %v5614_v59  ;;  %v5767_v5 = vadd.f32 %v942_v61, %v5562_v41  ;;  %v5770_v24 = vadd.f32 %v872_v19, %v5620_v12  ;;  %v5777_v60 = vadd.f32 %v876_v26, %v5626_v16 }
 0x18d   :  { %v4507_v58 = vpop.f32.mrf.mxu1  ;;  %v1398_v20 = vadd.f32 %v1222_v17, %v5588_v62  ;;  %v5780_v47 = vadd.f32 %v958_v42, %v5574_v48  ;;  %v5785_v12 = vadd.f32 %v882_v15, %v5632_v57  ;;  %v5788_v54 = vadd.f32 %v886_v6, %v5638_v10 }
 0x18e   :  { %v1406_v27 = vadd.f32 %v4507_v58, %v5645_v1  ;;  %v1224_v62 = vpop.f32.mrf.mxu0  ;;  %v5791_v23 = vadd.f32 %v974_v7, %v7107_v38  ;;  %vm2263_vm10 = vcmp.lt.s32.totalorder %v5709_v55, 12  ;;  %vm3593_vm12 = vcmp.lt.s32.totalorder %v5709_v55, 10 }
 0x18f   :  { %v1335_v3 = vpop.f32.mrf.mxu1  ;;  %v1463_v25 = vadd.f32 %v5711_v44, %v1398_v20  ;;  %v1399_v36 = vadd.f32 %v1224_v62, %v813_v45  ;;  %v7109_v20 = vld [vmem:[#allocation22_spill] sm:$0xff]  ;;  %v7110_v62 = vld [vmem:[#allocation31_spill] sm:$0xff] }
 0x190   :  { %v1471_v9 = vadd.f32 %v5713_v11, %v1406_v27  ;;  %v1400_v0 = vadd.f32 %v1335_v3, %v5650_v31  ;;  %v1226_v30 = vpop.f32.mrf.mxu0 }
 0x191   :  { %v4508_v1 = vpop.f32.mrf.mxu1  ;;  %v1464_v31 = vadd.f32 %v5715_v50, %v1399_v36  ;;  %v1401_v41 = vadd.f32 %v1226_v30, %v5596_v22  ;;  %v1511_v16 = vmax.f32 %v1463_v25, 0.0 }
 0x192   :  { %v5772_v43 = vmax.f32 %v1471_v9, 0.0  ;;  %v1465_v32 = vadd.f32 %v5713_v11, %v1400_v0  ;;  %v1409_v61 = vadd.f32 %v4508_v1, %v5655_v29  ;;  %v1228_v59 = vpop.f32.mrf.mxu0 }
 0x193   :  { %v1338_v51 = vpop.f32.mrf.mxu1  ;;  %v1466_v19 = vadd.f32 %v5711_v44, %v1401_v41  ;;  %v1402_v42 = vadd.f32 %v1228_v59, %v817_v4  ;;  %v5797_v15 = vmax.f32 %v1464_v31, 0.0 }
 0x194   :  { %v1474_v48 = vadd.f32 %v5713_v11, %v1409_v61  ;;  %v1403_v22 = vadd.f32 %v1338_v51, %v927_v56  ;;  %v1232_v26 = vpop.f32.mrf.mxu0  ;;  %v7073_v45 = vrot.slane %v5772_v43, 1  ;;  %v7072_v57 = vrot.slane %v5772_v43, 2 }
 0x195   :  { %v4511_v29 = vpop.f32.mrf.mxu1  ;;  %v5799_v10 = vmax.f32 %v1465_v32, 0.0  ;;  %v1514_v33 = vmax.f32 %v1466_v19, 0.0  ;;  %v1467_v7 = vadd.f32 %v5715_v50, %v1402_v42  ;;  %v1404_v27 = vadd.f32 %v1232_v26, %v7109_v20 }
 0x196   :  { %v5801_v6 = vmax.f32 %v1474_v48, 0.0  ;;  %v1468_v17 = vadd.f32 %v5713_v11, %v1403_v22  ;;  %v1234_v58 = vpop.f32.mrf.mxu0  ;;  %v1418_v3 = vadd.f32 %v4511_v29, %v7110_v62  ;;  %v7112_v62 = vld [vmem:[#allocation23_spill] sm:$0xff] }
 0x197   :  { %v1351_v4 = vpop.f32.mrf.mxu1  ;;  %v1405_v25 = vadd.f32 %v1234_v58, %v823_v46  ;;  %v1563_v36 = vsel %vm1561_vm2, %v1514_v33, -inf  ;;  %v5814_v41 = vmax.f32 %v1467_v7, 0.0  ;;  %v1469_v46 = vadd.f32 %v5711_v44, %v1404_v27 }
 0x198   :  { %7108 = vst [vmem:[#allocation19_spill] sm:$0xff] %v5801_v6  ;;  %v1412_v9 = vadd.f32 %v1351_v4, %v5669_v21  ;;  %v2363_v56 = vrot.slane %v5801_v6, 1  ;;  %v2710_v30 = vrot.slane %v5801_v6, 2  ;;  %v1236_v1 = vpop.f32.mrf.mxu0  ;;  %v1578_v32 = vmax.f32 %v1511_v16, %v1563_v36  ;;  %v7119_v6 = vld [vmem:[#allocation20_spill] sm:$0xff] }
 0x199   :  { %v4512_v31 = vpop.f32.mrf.mxu1  ;;  %v5816_v61 = vmax.f32 %v1468_v17, 0.0  ;;  %v1483_v51 = vadd.f32 %v5713_v11, %v1418_v3  ;;  %v1470_v38 = vadd.f32 %v5715_v50, %v1405_v25  ;;  %v1407_v3 = vadd.f32 %v1236_v1, %v7112_v62  ;;  %v7113_v25 = vld [vmem:[#allocation33_spill] sm:$0xff] }
 0x19a   :  { %v5823_v21 = vsel %vm204_vm0, %v7073_v45, %v2363_v56  ;;  %v5829_v59 = vsel %vm1002_vm1, %v7072_v57, %v2710_v30  ;;  %v1238_v16 = vpop.f32.mrf.mxu0  ;;  %v1579_v26 = vrot.slane %v1578_v32, 4  ;;  %v1477_v27 = vadd.f32 %v5713_v11, %v1412_v9 }
 0x19b   :  { %7111 = vst [vmem:[#allocation22_spill] sm:$0xff] %v5829_v59  ;;  %v1354_v19 = vpop.f32.mrf.mxu1  ;;  %v1421_v36 = vadd.f32 %v4512_v31, %v7113_v25  ;;  %v1517_v57 = vmax.f32 %v1469_v46, 0.0  ;;  %v5844_v42 = vmax.f32 %v1483_v51, 0.0  ;;  %v5846_v29 = vmax.f32 %v1470_v38, 0.0  ;;  %v7114_v51 = vld [vmem:[#allocation24_spill] sm:$0xff] }
 0x19c   :  { %v1242_v58 = vpop.f32.mrf.mxu0  ;;  %v1580_v20 = vmax.f32 %v1578_v32, %v1579_v26  ;;  %v5848_v17 = vmax.f32 %v1477_v27, 0.0  ;;  %v1472_v32 = vadd.f32 %v5711_v44, %v1407_v3  ;;  %v1408_v1 = vadd.f32 %v1238_v16, %v5725_v35 }
 0x19d   :  { %v4515_v4 = vpop.f32.mrf.mxu1  ;;  %v1486_v9 = vadd.f32 %v5713_v11, %v1421_v36  ;;  %v1415_v31 = vadd.f32 %v1354_v19, %v5767_v5  ;;  %v1634_v46 = vpack.c.bf16 %v5814_v41, %v5797_v15  ;;  %v1410_v26 = vadd.f32 %v1242_v58, %v7114_v51 }
 0x19e   :  { %v1244_v22 = vpop.f32.mrf.mxu0  ;;  %v1581_v45 = vrot.slane %v1580_v20, 2  ;;  %v7075_v25 = vrot.slane %v5848_v17, 1  ;;  %v7074_v27 = vrot.slane %v5848_v17, 2  ;;  %v1520_v0 = vmax.f32 %v1472_v32, 0.0 }
 0x19f   :  { %v1367_v7 = vpop.f32.mrf.mxu1  ;;  %v5859_v48 = vmax.f32 %v1486_v9, 0.0  ;;  %v1473_v3 = vadd.f32 %v5715_v50, %v1408_v1  ;;  %v1480_v35 = vadd.f32 %v5713_v11, %v1415_v31  ;;  %4569 = vmatprep.mubr.bf16.mxu0 %v1634_v46  ;;  %v5864_v5 = vadd.f32 %v5711_v44, %v1410_v26 }
 0x1a0   :  { %v1246_v38 = vpop.f32.mrf.mxu0  ;;  %v1582_v62 = vmax.f32 %v1580_v20, %v1581_v45  ;;  %v5870_v45 = vsel %vm204_vm0, %v2363_v56, %v7075_v25  ;;  %v5876_v20 = vsel %vm1002_vm1, %v2710_v30, %v7074_v27  ;;  %v1565_v36 = vsel %vm1561_vm2, %v1520_v0, -inf }
 0x1a1   :  { %7115 = vst [vmem:[#allocation31_spill] sm:$0xff] %v5859_v48  ;;  %v4516_v16 = vpop.f32.mrf.mxu1  ;;  %7116 = vst [vmem:[#allocation23_spill] sm:$0xff] %v5876_v20  ;;  %v1585_v31 = vmax.f32 %v1517_v57, %v1565_v36  ;;  %v5889_v26 = vmax.f32 %v1473_v3, 0.0  ;;  %v1430_v0 = vadd.f32 %v4515_v4, %v5679_v34  ;;  %v1411_v25 = vadd.f32 %v1244_v22, %v5729_v63  ;;  %v4965_v3 = vld [vmem:[#allocation8 + $0x70] sm:$0xff]  }
 0x1a2   :  { %v1248_v19 = vpop.f32.mrf.mxu0  ;;  %v1583_v58 = vrot.slane %v1582_v62, 1  ;;  %v1424_v9 = vadd.f32 %v1367_v7, %v5682_v28  ;;  %v5899_v30 = vmax.f32 %v1480_v35, 0.0  ;;  %v1523_v4 = vmax.f32 %v5864_v5, 0.0 }
 0x1a3   :  { %v1586_v27 = vrot.slane %v1585_v31, 4  ;;  %v1370_v32 = vpop.f32.mrf.mxu1  ;;  %v1635_v33 = vpack.c.bf16 %v5889_v26, %v5846_v29  ;;  %v1661_v34 = vrot.slane %v5889_v26, 1  ;;  %v1495_v63 = vadd.f32 %v5713_v11, %v1430_v0 }
 0x1a4   :  { %v5884_v46 = vpop.f32.mrf.mxu0  ;;  %v1584_v57 = vmax.f32 %v1582_v62, %v1583_v58  ;;  %v1476_v28 = vadd.f32 %v5715_v50, %v1411_v25  ;;  %v2008_v7 = vrot.slane %v5889_v26, 2  ;;  %v1489_v62 = vadd.f32 %v5713_v11, %v1424_v9  ;;  %v7117_v58 = vld [vmem:[#allocation25_spill] sm:$0xff] }
 0x1a5   :  { %v1587_v51 = vmax.f32 %v1585_v31, %v1586_v27  ;;  %v1413_v36 = vadd.f32 %v1246_v38, %v7117_v58  ;;  %4570 = vmatmul.mubr.bf16.vlgmr.msra.gmra.mxu0 %v1635_v33  ;;  %v5910_v56 = vmax.f32 %v1495_v63, 0.0  ;;  %v1433_v31 = vadd.f32 %v4516_v16, %v5687_v37  ;;  %v4519_v0 = vpop.f32.mrf.mxu1  ;;  %v4967_v38 = vld [vmem:[#allocation8 + $0x68] sm:$0xff]  }
 0x1a6   :  { %v5894_v1 = vpop.f32.mrf.mxu0  ;;  %v5912_v27 = vmax.f32 %v1476_v28, 0.0  ;;  %4618 = vmatpush3.bf16.msra.mxu0 %v7119_v6  ;;  %v5918_v26 = vmax.f32 %v1489_v62, 0.0  ;;  %v1414_v9 = vadd.f32 %v1248_v19, %v5733_v52  ;;  %v1427_v33 = vadd.f32 %v1370_v32, %v5780_v47  ;;  %v4969_v19 = vld [vmem:[#allocation8 + $0x60] sm:$0xff]  }
 0x1a7   :  { %v1588_v35 = vrot.slane %v1587_v51, 2  ;;  %7118 = vst [vmem:[#allocation33_spill] sm:$0xff] %v5910_v56  ;;  %v1478_v5 = vadd.f32 %v5711_v44, %v1413_v36  ;;  %4619 = vmatprep.subr.bf16.mxu0 %v4965_v3  ;;  %v7121_v28 = vrot.slane %v5846_v29, 1  ;;  %v7122_v36 = vrot.slane %v5846_v29, 2  ;;  %v1383_v6 = vpop.f32.mrf.mxu1 }
 0x1a8   :  { %v5904_v22 = vpop.f32.mrf.mxu0  ;;  %7120 = vst [vmem:[#allocation24_spill] sm:$0xff] %v5918_v26 }
 0x1a9   :  { %v1589_v63 = vmax.f32 %v1587_v51, %v1588_v35  ;;  %v5927_v37 = vsel %vm204_vm0, %v7121_v28, %v1661_v34  ;;  %v5937_v52 = vsel %vm1002_vm1, %v7122_v36, %v2008_v7  ;;  %v1526_v32 = vmax.f32 %v1478_v5, 0.0  ;;  %v4520_v26 = vpop.f32.mrf.mxu1 }
 0x1aa   :  { %v5915_v25 = vpop.f32.mrf.mxu0  ;;  %7123 = vst [vmem:[#allocation25_spill] sm:$0xff] %v5937_v52  ;;  %v1498_v35 = vadd.f32 %v5713_v11, %v1433_v31  ;;  %v1479_v28 = vadd.f32 %v5715_v50, %v1414_v9  ;;  %4620 = vmatpush3.bf16.msra.mxu0 %v4965_v3  ;;  %v1492_v5 = vadd.f32 %v5713_v11, %v1427_v33  ;;  %v7125_v3 = vrot.slane %v5912_v27, 1 }
 0x1ab   :  { %v1590_v51 = vrot.slane %v1589_v63, 1  ;;  %v1567_v47 = vsel %vm1561_vm2, %v1526_v32, -inf  ;;  %4621 = vmatprep.subr.bf16.mxu0 %v4967_v38  ;;  %v7126_v32 = vrot.slane %v5846_v29, 1  ;;  %v7127_v33 = vrot.slane %v5814_v41, 1 }
 0x1ac   :  { %v5931_v62 = vpop.f32.mrf.mxu0  ;;  %v1592_v20 = vmax.f32 %v1523_v4, %v1567_v47  ;;  %v5952_v9 = vmax.f32 %v1498_v35, 0.0  ;;  %v5960_v59 = vsel %vm204_vm0, %v1661_v34, %v7125_v3  ;;  %v7129_v47 = vld [vmem:[#allocation37_spill] sm:$0xff]  ;;  %v7130_v36 = vrot.slane %v5912_v27, 2 }
 0x1ad   :  { %v1591_v58 = vmax.f32 %v1589_v63, %v1590_v51  ;;  %v1687_v63 = vsel %vm204_vm0, %v7127_v33, %v7126_v32  ;;  %v7128_v51 = vld [vmem:[#allocation26_spill] sm:$0xff]  ;;  %v1442_v35 = vadd.f32 %v4519_v0, %v7129_v47  ;;  %v5980_v56 = vmax.f32 %v1479_v28, 0.0  ;;  %v4971_v28 = vld [vmem:[#allocation8 + $0x58] sm:$0xff]  }
 0x1ae   :  { %v5944_v16 = vpop.f32.mrf.mxu0  ;;  %7124 = vst [vmem:[#allocation20_spill] sm:$0xff] %v5952_v9  ;;  %v1416_v4 = vadd.f32 %v5884_v46, %v7128_v51  ;;  %v5978_v34 = vsel %vm1002_vm1, %v2008_v7, %v7130_v36  ;;  %v1593_v3 = vrot.slane %v1592_v20, 4  ;;  %4622 = vmatpush3.bf16.msra.mxu0 %v4967_v38  ;;  %v7133_v32 = vrot.slane %v5797_v15, 1  ;;  %v7134_v0 = vld [vmem:[#allocation38_spill] sm:$0xff]  ;;  %v7135_v9 = vld [vmem:[#allocation27_spill] sm:$0xff] }
 0x1af   :  { %v5972_v31 = vsel %vm3674_vm3, %v1591_v58, %v1584_v57  ;;  %7131 = vst [vmem:[#allocation26_spill] sm:$0xff] %v5978_v34  ;;  %v5986_v57 = vmax.f32 %v1492_v5, 0.0  ;;  %v7132_v58 = vmov %v7127_v33  ;;  %4623 = vmatprep.subr.bf16.mxu0 %v4969_v19  ;;  %v1507_v51 = vadd.f32 %v5713_v11, %v1442_v35 }
 0x1b0   :  { %v5954_v48 = vpop.f32.mrf.mxu0  ;;  %v1688_v7 = vsel %vm204_vm0, %v7133_v32, %v7132_v58  ;;  %v1594_v36 = vmax.f32 %v1592_v20, %v1593_v3  ;;  %v1481_v38 = vadd.f32 %v5711_v44, %v1416_v4  ;;  %v1417_v5 = vadd.f32 %v5894_v1, %v5740_v13 }
 0x1b1   :  { %v1690_v33 = vpack.c.bf16 %v1687_v63, %v1688_v7  ;;  %v1436_v46 = vadd.f32 %v1383_v6, %v7134_v0  ;;  %v1419_v34 = vadd.f32 %v5904_v22, %v7135_v9  ;;  %v1445_v58 = vadd.f32 %v4520_v26, %v5706_v39  ;;  %v1386_v26 = vpop.f32.mrf.mxu1  ;;  %v4973_v6 = vld [vmem:[#allocation8 + $0x50] sm:$0xff]  }
 0x1b2   :  { %v5982_v52 = vpop.f32.mrf.mxu0  ;;  %v1595_v32 = vrot.slane %v1594_v36, 2  ;;  %v1663_v20 = vrot.slane %v5980_v56, 1  ;;  %v6005_v63 = vmax.f32 %v1507_v51, 0.0  ;;  %v1420_v4 = vadd.f32 %v5915_v25, %v5744_v40  ;;  %4624 = vmatpush3.bf16.msra.mxu0 %v4969_v19  ;;  %v7136_v19 = vld [vmem:[#allocation21_spill] sm:$0xff] }
 0x1b3   :  { %4537 = vmatprep.mubr.bf16.mxu1 %v1690_v33  ;;  %v1482_v13 = vadd.f32 %v5715_v50, %v1417_v5  ;;  %v1501_v1 = vadd.f32 %v5713_v11, %v1436_v46  ;;  %v1484_v22 = vadd.f32 %v5711_v44, %v1419_v34  ;;  %v1510_v39 = vadd.f32 %v5713_v11, %v1445_v58 }
 0x1b4   :  { %v5996_v47 = vpop.f32.mrf.mxu0  ;;  %4625 = vmatprep.subr.bf16.mxu0 %v4971_v28  ;;  %v1596_v9 = vmax.f32 %v1594_v36, %v1595_v32  ;;  %v1485_v40 = vadd.f32 %v5715_v50, %v1420_v4  ;;  %v1529_v51 = vmax.f32 %v1481_v38, 0.0  ;;  %v1439_v5 = vadd.f32 %v1386_v26, %v5791_v23  ;;  %v4966_v32 = vld [vmem:[#allocation7 + $0xb0] sm:$0xff]   ;;  %v7140_v23 = vld [vmem:[#allocation30_spill] sm:$0xff] }
 0x1b5   :  { %v6021_v7 = vmax.f32 %v1482_v13, 0.0  ;;  %v6023_v46 = vmax.f32 %v1501_v1, 0.0  ;;  %v1532_v34 = vmax.f32 %v1484_v22, 0.0  ;;  %v1691_v36 = vpack.c.bf16 %v5960_v59, %v5927_v37 }
 0x1b6   :  { %v6009_v35 = vpop.f32.mrf.mxu0  ;;  %v1597_v33 = vrot.slane %v1596_v9, 1  ;;  %4626 = vmatpush3.bf16.msra.mxu0 %v4971_v28  ;;  %v6032_v13 = vmax.f32 %v1510_v39, 0.0  ;;  %v6034_v1 = vmax.f32 %v1485_v40, 0.0  ;;  %v1504_v40 = vadd.f32 %v5713_v11, %v1439_v5  ;;  %v4968_v11 = vld [vmem:[#allocation7 + $0xa8] sm:$0xff]   ;;  %v7138_v5 = vld [vmem:[#allocation29_spill] sm:$0xff] }
 0x1b7   :  { %4627 = vmatprep.subr.bf16.mxu0 %v4973_v6  ;;  %v1664_v38 = vrot.slane %v6021_v7, 1  ;;  %v1569_v59 = vsel %vm1561_vm2, %v1532_v34, -inf  ;;  %4538 = vmatmul.mubr.bf16.vlgmr.msra.gmra.mxu1 %v1691_v36  ;;  %v1636_v34 = vpack.c.bf16 %v5980_v56, %v5912_v27  ;;  %v7137_v36 = vld [vmem:[#allocation28_spill] sm:$0xff]  ;;  %v1423_v28 = vadd.f32 %v5944_v16, %v5748_v49 }
 0x1b8   :  { %v6018_v25 = vpop.f32.mrf.mxu0  ;;  %v1598_v22 = vmax.f32 %v1596_v9, %v1597_v33  ;;  %v1599_v39 = vmax.f32 %v1529_v51, %v1569_v59  ;;  %4586 = vmatpush3.bf16.msra.mxu1 %v7136_v19  ;;  %v4975_v9 = vld [vmem:[#allocation8 + $0x48] sm:$0xff]   ;;  %v1422_v4 = vadd.f32 %v5931_v62, %v7137_v36  ;;  %v1665_v59 = vrot.slane %v6034_v1, 1 }
 0x1b9   :  { %4587 = vmatprep.subr.bf16.mxu1 %v4966_v32  ;;  %4573 = vmatprep.mubr.bf16.mxu0 %v1636_v34  ;;  %v1488_v49 = vadd.f32 %v5715_v50, %v1423_v28  ;;  %v1683_v16 = vsel %vm204_vm0, %v1663_v20, %v1664_v38  ;;  %v6082_v28 = vmax.f32 %v1504_v40, 0.0  ;;  %v1637_v3 = vpack.c.bf16 %v6034_v1, %v6021_v7 }
 0x1ba   :  { %v6028_v58 = vpop.f32.mrf.mxu0  ;;  %v6048_v33 = vsel %vm3676_vm4, %v1598_v22, %v5972_v31  ;;  %v1600_v51 = vrot.slane %v1599_v39, 4  ;;  %v1425_v31 = vadd.f32 %v5954_v48, %v7138_v5  ;;  %v1426_v22 = vadd.f32 %v5982_v52, %v5752_v53  ;;  %4628 = vmatpush3.bf16.msra.mxu0 %v4973_v6  ;;  %v4977_v48 = vld [vmem:[#allocation8 + $0x40] sm:$0xff]  }
 0x1bb   :  { %v1487_v62 = vadd.f32 %v5711_v44, %v1422_v4  ;;  %v7139_v6 = vrot.slane %v5912_v27, 1  ;;  %4629 = vmatprep.subr.bf16.mxu0 %v4975_v9  ;;  %v6084_v34 = vmax.f32 %v1488_v49, 0.0  ;;  %v4970_v53 = vld [vmem:[#allocation7 + $0xa0] sm:$0xff]   ;;  %4574 = vmatmul.mubr.bf16.gmra.mxu0 %v1637_v3  ;;  %v4974_v3 = vld [vmem:[#allocation7 + $0x90] sm:$0xff]  }
 0x1bc   :  { %v6040_v37 = vpop.f32.mrf.mxu0  ;;  %v1601_v5 = vmax.f32 %v1599_v39, %v1600_v51  ;;  %v1490_v52 = vadd.f32 %v5711_v44, %v1425_v31  ;;  %4588 = vmatpush3.bf16.msra.mxu1 %v4966_v32  ;;  %v1491_v19 = vadd.f32 %v5715_v50, %v1426_v22  ;;  %v1429_v22 = vadd.f32 %v6009_v35, %v5761_v2 }
 0x1bd   :  { %v1684_v4 = vsel %vm204_vm0, %v7139_v6, %v1663_v20  ;;  %4589 = vmatprep.subr.bf16.mxu1 %v4968_v11  ;;  %v1428_v20 = vadd.f32 %v5996_v47, %v7140_v23  ;;  %v1535_v32 = vmax.f32 %v1487_v62, 0.0  ;;  %v1666_v40 = vrot.slane %v6084_v34, 1  ;;  %v7141_v23 = vld [vmem:[#allocation32_spill] sm:$0xff] }
 0x1be   :  { %v6056_v26 = vpop.f32.mrf.mxu0  ;;  %v1692_v39 = vpack.c.bf16 %v1683_v16, %v1684_v4  ;;  %v1602_v31 = vrot.slane %v1601_v5, 2  ;;  %v1538_v0 = vmax.f32 %v1490_v52, 0.0  ;;  %4630 = vmatpush3.bf16.msra.mxu0 %v4975_v9  ;;  %v6092_v49 = vmax.f32 %v1491_v19, 0.0  ;;  %v6096_v16 = vld [vmem:[#allocation8 + $0xb8] sm:$0xff]  }
 0x1bf   :  { %4631 = vmatprep.subr.bf16.mxu0 %v4977_v48  ;;  %v1493_v47 = vadd.f32 %v5711_v44, %v1428_v20  ;;  %v1431_v9 = vadd.f32 %v6018_v25, %v7141_v23  ;;  %v1494_v4 = vadd.f32 %v5715_v50, %v1429_v22  ;;  %v1432_v25 = vadd.f32 %v6028_v58, %v5764_v14 }
 0x1c0   :  { %v6072_v36 = vpop.f32.mrf.mxu0  ;;  %4541 = vmatprep.mubr.bf16.mxu1 %v1692_v39  ;;  %v1603_v52 = vmax.f32 %v1601_v5, %v1602_v31  ;;  %v1571_v6 = vsel %vm1561_vm2, %v1538_v0, -inf  ;;  %4590 = vmatpush3.bf16.msra.mxu1 %v4968_v11  ;;  %v4972_v5 = vld [vmem:[#allocation7 + $0x98] sm:$0xff]   ;;  %v1667_v0 = vrot.slane %v6092_v49, 1  ;;  %v1681_v20 = vsel %vm204_vm0, %v1665_v59, %v1666_v40 }
 0x1c1   :  { %v1606_v35 = vmax.f32 %v1535_v32, %v1571_v6  ;;  %4591 = vmatprep.subr.bf16.mxu1 %v4970_v53  ;;  %v1496_v39 = vadd.f32 %v5711_v44, %v1431_v9  ;;  %v6113_v31 = vmax.f32 %v1494_v4, 0.0  ;;  %v1682_v32 = vsel %vm204_vm0, %v1664_v38, %v1665_v59 }
 0x1c2   :  { %v1288_v51 = vpop.f32.mrf.mxu0  ;;  %4632 = vmatpush3.bf16.msra.mxu0 %v4977_v48  ;;  %v1604_v22 = vrot.slane %v1603_v52, 1  ;;  %v1497_v14 = vadd.f32 %v5715_v50, %v1432_v25  ;;  %v1693_v58 = vpack.c.bf16 %v1681_v20, %v1682_v32  ;;  %v1541_v9 = vmax.f32 %v1493_v47, 0.0 }
 0x1c3   :  { %v1607_v11 = vrot.slane %v1606_v35, 4  ;;  %4681 = vmatprep.subr.bf16.mxu0 %v6096_v16  ;;  %v1544_v6 = vmax.f32 %v1496_v39, 0.0  ;;  %v1668_v4 = vrot.slane %v6113_v31, 1  ;;  %v1638_v19 = vpack.c.bf16 %v6092_v49, %v6084_v34  ;;  %v7142_v39 = vld [vmem:[#allocation34_spill] sm:$0xff] }
 0x1c4   :  { %v6103_v62 = vpop.f32.mrf.mxu0  ;;  %4592 = vmatpush3.bf16.msra.mxu1 %v4970_v53  ;;  %v6130_v59 = vmax.f32 %v1497_v14, 0.0  ;;  %v1434_v25 = vadd.f32 %v6040_v37, %v7142_v39  ;;  %v1435_v53 = vadd.f32 %v6056_v26, %v5770_v24  ;;  %v1438_v32 = vadd.f32 %v1288_v51, %v5777_v60 }
 0x1c5   :  { %v1608_v23 = vmax.f32 %v1606_v35, %v1607_v11  ;;  %4593 = vmatprep.subr.bf16.mxu1 %v4972_v5  ;;  %v1573_v38 = vsel %vm1561_vm2, %v1544_v6, -inf  ;;  %4542 = vmatmul.mubr.bf16.gmra.mxu1 %v1693_v58  ;;  %v7143_v11 = vld [vmem:[#allocation35_spill] sm:$0xff]  ;;  %v6139_v2 = vmax.f32 %v1603_v52, %v1604_v22  ;;  %v2015_v6 = vrot.slane %v6113_v31, 2 }
 0x1c6   :  { %v1294_v48 = vpop.f32.mrf.mxu0  ;;  %v1613_v35 = vmax.f32 %v1541_v9, %v1573_v38  ;;  %4577 = vmatprep.mubr.bf16.mxu0 %v1638_v19  ;;  %v1437_v20 = vadd.f32 %v6072_v36, %v7143_v11  ;;  %v1499_v14 = vadd.f32 %v5711_v44, %v1434_v25  ;;  %v1500_v58 = vadd.f32 %v5715_v50, %v1435_v53  ;;  %v4976_v36 = vld [vmem:[#allocation7 + $0x88] sm:$0xff]  }
 0x1c7   :  { %v1609_v47 = vrot.slane %v1608_v23, 2  ;;  %v1503_v19 = vadd.f32 %v5715_v50, %v1438_v32  ;;  %v1669_v60 = vrot.slane %v6130_v59, 1  ;;  %v1679_v22 = vsel %vm204_vm0, %v1667_v0, %v1668_v4 }
 0x1c8   :  { %v1296_v37 = vpop.f32.mrf.mxu0  ;;  %4594 = vmatpush3.bf16.msra.mxu1 %v4972_v5  ;;  %v1614_v24 = vrot.slane %v1613_v35, 4  ;;  %v1502_v26 = vadd.f32 %v5711_v44, %v1437_v20  ;;  %v6148_v52 = vmax.f32 %v1500_v58, 0.0  ;;  %v1547_v25 = vmax.f32 %v1499_v14, 0.0 }
 0x1c9   :  { %v1610_v39 = vmax.f32 %v1608_v23, %v1609_v47  ;;  %4595 = vmatprep.subr.bf16.mxu1 %v4974_v3  ;;  %v6152_v5 = vmax.f32 %v1503_v19, 0.0  ;;  %v1680_v23 = vsel %vm204_vm0, %v1666_v40, %v1667_v0  ;;  %v1639_v11 = vpack.c.bf16 %v6130_v59, %v6113_v31  ;;  %v7144_v0 = vld [vmem:[#allocation36_spill] sm:$0xff] }
 0x1ca   :  { %v1615_v9 = vmax.f32 %v1613_v35, %v1614_v24  ;;  %v1550_v38 = vmax.f32 %v1502_v26, 0.0  ;;  %v1670_v53 = vrot.slane %v6148_v52, 1  ;;  %v1694_v47 = vpack.c.bf16 %v1679_v22, %v1680_v23  ;;  %v1298_v20 = vpop.f32.mrf.mxu0  ;;  %v4978_v26 = vld [vmem:[#allocation7 + $0x80] sm:$0xff]  }
 0x1cb   :  { %v1611_v32 = vrot.slane %v1610_v39, 1  ;;  %v1671_v40 = vrot.slane %v6152_v5, 1  ;;  %4578 = vmatmul.mubr.bf16.gmra.mxu0 %v1639_v11  ;;  %v1440_v14 = vadd.f32 %v6103_v62, %v7144_v0  ;;  %v1441_v22 = vadd.f32 %v1294_v48, %v5785_v12 }
 0x1cc   :  { %4596 = vmatpush3.bf16.msra.mxu1 %v4974_v3  ;;  %v1616_v58 = vrot.slane %v1615_v9, 2  ;;  %v1575_v24 = vsel %vm1561_vm2, %v1550_v38, -inf  ;;  %4545 = vmatprep.mubr.bf16.mxu1 %v1694_v47  ;;  %v1443_v23 = vadd.f32 %v1296_v37, %v5703_v8  ;;  %v1444_v51 = vadd.f32 %v1298_v20, %v5788_v54  ;;  %v6178_v54 = vld [vmem:[#allocation8 + $0x38] sm:$0xff]  }
 0x1cd   :  { %4597 = vmatprep.subr.bf16.mxu1 %v4976_v36  ;;  %v1620_v19 = vmax.f32 %v1547_v25, %v1575_v24  ;;  %v1677_v38 = vsel %vm204_vm0, %v1669_v60, %v1670_v53  ;;  %v1505_v25 = vadd.f32 %v5711_v44, %v1440_v14  ;;  %v1506_v24 = vadd.f32 %v5715_v50, %v1441_v22 }
 0x1ce   :  { %v1617_v3 = vmax.f32 %v1615_v9, %v1616_v58  ;;  %v1678_v47 = vsel %vm204_vm0, %v1668_v4, %v1669_v60  ;;  %v1508_v12 = vadd.f32 %v5711_v44, %v1443_v23  ;;  %v1509_v48 = vadd.f32 %v5715_v50, %v1444_v51 }
 0x1cf   :  { %v1621_v35 = vrot.slane %v1620_v19, 4  ;;  %v1695_v8 = vpack.c.bf16 %v1677_v38, %v1678_v47  ;;  %v6180_v37 = vmax.f32 %v1610_v39, %v1611_v32  ;;  %v6182_v11 = vmax.f32 %v1506_v24, 0.0 }
 0x1d0   :  { %4598 = vmatpush3.bf16.msra.mxu1 %v4976_v36  ;;  %v1618_v62 = vrot.slane %v1617_v3, 1  ;;  %v1640_v20 = vpack.c.bf16 %v6152_v5, %v6148_v52  ;;  %v2018_v4 = vrot.slane %v6152_v5, 2  ;;  %v1553_v36 = vmax.f32 %v1505_v25, 0.0 }
 0x1d1   :  { %4599 = vmatprep.subr.bf16.mxu1 %v4978_v26  ;;  %v1622_v9 = vmax.f32 %v1620_v19, %v1621_v35  ;;  %v1556_v60 = vmax.f32 %v1508_v12, 0.0  ;;  %v6187_v58 = vmax.f32 %v1509_v48, 0.0  ;;  %4546 = vmatmul.mubr.bf16.gmra.mxu1 %v1695_v8  ;;  %v1672_v51 = vrot.slane %v6182_v11, 1 }
 0x1d2   :  { %v6189_v44 = vmax.f32 %v1617_v3, %v1618_v62  ;;  %4581 = vmatprep.mubr.bf16.mxu0 %v1640_v20  ;;  %v7145_v39 = vrot.slane %v5772_v43, 1  ;;  %v7146_v32 = vrot.slane %v5816_v61, 1  ;;  %v1676_v14 = vsel %vm204_vm0, %v1670_v53, %v1671_v40 }
 0x1d3   :  { %v1623_v50 = vrot.slane %v1622_v9, 2  ;;  %v1577_v19 = vsel %vm1561_vm2, %v1556_v60, -inf  ;;  %v1673_v0 = vrot.slane %v6187_v58, 1  ;;  %v1641_v22 = vpack.c.bf16 %v6187_v58, %v6182_v11 }
 0x1d4   :  { %v2389_v35 = vsel %vm204_vm0, %v7146_v32, %v7145_v39  ;;  %4600 = vmatpush3.bf16.msra.mxu1 %v4978_v26  ;;  %v1627_v23 = vmax.f32 %v1553_v36, %v1577_v19  ;;  %v1675_v38 = vsel %vm204_vm0, %v1671_v40, %v1672_v51  ;;  %v7147_v26 = vmov %v7146_v32 }
 0x1d5   :  { %4649 = vmatprep.subr.bf16.mxu1 %v6178_v54  ;;  %v1624_v3 = vmax.f32 %v1622_v9, %v1623_v50  ;;  %v7148_v25 = vrot.slane %v5799_v10, 1  ;;  %v1696_v47 = vpack.c.bf16 %v1675_v38, %v1676_v14  ;;  %4582 = vmatmul.mubr.bf16.gmra.mxu0 %v1641_v22  ;;  %v1674_v62 = vsel %vm204_vm0, %v1672_v51, %v1673_v0 }
 0x1d6   :  { %v7149_v12 = vrot.slane %v5797_v15, 1  ;;  %v2019_v40 = vrot.slane %v6182_v11, 2  ;;  %v1628_v8 = vrot.slane %v1627_v23, 4  ;;  %v7150_v20 = vrot.slane %v5846_v29, 2 }
 0x1d7   :  { %v2390_v24 = vsel %vm204_vm0, %v7148_v25, %v7147_v26  ;;  %v7151_v36 = vrot.slane %v5814_v41, 2  ;;  %v2020_v50 = vrot.slane %v6187_v58, 2  ;;  %4549 = vmatprep.mubr.bf16.mxu1 %v1696_v47  ;;  %v7153_v39 = vrot.slane %v5797_v15, 2 }
 0x1d8   :  { %v2392_v53 = vpack.c.bf16 %v2389_v35, %v2390_v24  ;;  %v1689_v48 = vsel %vm204_vm0, %v1673_v0, %v7149_v12  ;;  %v2393_v35 = vpack.c.bf16 %v5870_v45, %v5823_v21  ;;  %v7154_v29 = vrot.slane %v5844_v42, 1  ;;  %v7158_v21 = vld [vmem:[#allocation25_spill] sm:$0xff]  ;;  %v7159_v45 = vld [vmem:[#allocation26_spill] sm:$0xff] }
 0x1d9   :  { %v1697_v9 = vpack.c.bf16 %v1689_v48, %v1674_v62  ;;  %v2034_v60 = vsel %vm1002_vm1, %v7151_v36, %v7150_v20  ;;  %v7152_v51 = vmov %v7151_v36  ;;  %v7155_v19 = vrot.slane %v5899_v30, 1  ;;  %v7164_v36 = vld [vmem:[#allocation24_spill] sm:$0xff] }
 0x1da   :  { %4633 = vmatprep.mubr.bf16.mxu0 %v2392_v53  ;;  %v2035_v32 = vsel %vm1002_vm1, %v7153_v39, %v7152_v51  ;;  %v1625_v14 = vrot.slane %v1624_v3, 1  ;;  %v1629_v22 = vmax.f32 %v1627_v23, %v1628_v8  ;;  %v7157_v26 = vrot.slane %v5848_v17, 1  ;;  %v7166_v51 = vld [vmem:[#allocation31_spill] sm:$0xff] }
 0x1db   :  { %v2385_v0 = vsel %vm204_vm0, %v7155_v19, %v7154_v29  ;;  %v2037_v38 = vpack.c.bf16 %v2034_v60, %v2035_v32  ;;  %v7156_v41 = vmov %v7155_v19  ;;  %4550 = vmatmul.mubr.bf16.gmra.mxu1 %v1697_v9  ;;  %v2038_v47 = vpack.c.bf16 %v7159_v45, %v7158_v21 }
 0x1dc   :  { %v2386_v25 = vsel %vm204_vm0, %v7157_v26, %v7156_v41  ;;  %v7160_v53 = vrot.slane %v6021_v7, 2  ;;  %v7161_v62 = vrot.slane %v5980_v56, 2  ;;  %v7163_v48 = vrot.slane %v5912_v27, 2  ;;  %v4981_v27 = vld [vmem:[#allocation8 + $0xb0] sm:$0xff]   ;;  %v7170_v41 = vld [vmem:[#allocation33_spill] sm:$0xff] }
 0x1dd   :  { %v2394_v24 = vpack.c.bf16 %v2385_v0, %v2386_v25  ;;  %v1630_v20 = vrot.slane %v1629_v22, 2  ;;  %4601 = vmatprep.mubr.bf16.mxu1 %v2037_v38  ;;  %v7165_v60 = vrot.slane %v7164_v36, 1  ;;  %v7167_v39 = vrot.slane %v7166_v51, 1  ;;  %4634 = vmatmul.mubr.bf16.vlgmr.msra.gmra.mxu0 %v2393_v35 }
 0x1de   :  { %v2030_v23 = vsel %vm1002_vm1, %v7161_v62, %v7160_v53  ;;  %v7162_v12 = vmov %v7161_v62  ;;  %v7169_v19 = vrot.slane %v5844_v42, 1  ;;  %v7171_v26 = vrot.slane %v7170_v41, 1  ;;  %4682 = vmatpush3.bf16.msra.mxu0 %v6096_v16 }
 0x1df   :  { %v2031_v8 = vsel %vm1002_vm1, %v7163_v48, %v7162_v12  ;;  %v2383_v32 = vsel %vm204_vm0, %v7167_v39, %v7165_v60  ;;  %v7168_v29 = vmov %v7167_v39  ;;  %v7172_v38 = vrot.slane %v5986_v57, 1  ;;  %4637 = vmatprep.mubr.bf16.mxu0 %v2394_v24  ;;  %4683 = vmatprep.subr.bf16.mxu0 %v4981_v27 }
 0x1e0   :  { %v2039_v9 = vpack.c.bf16 %v2030_v23, %v2031_v8  ;;  %v2384_v56 = vsel %vm204_vm0, %v7169_v19, %v7168_v29  ;;  %v7174_v45 = vmov %v7165_v60  ;;  %v7175_v62 = vrot.slane %v6084_v34, 2 }
 0x1e1   :  { %v2395_v0 = vpack.c.bf16 %v2383_v32, %v2384_v56  ;;  %v2381_v25 = vsel %vm204_vm0, %v7172_v38, %v7171_v26  ;;  %v7173_v21 = vmov %v7172_v38  ;;  %v7176_v23 = vrot.slane %v6034_v1, 2  ;;  %v7183_v26 = vld [vmem:[#allocation20_spill] sm:$0xff] }
 0x1e2   :  { %v2382_v53 = vsel %vm204_vm0, %v7174_v45, %v7173_v21  ;;  %v1631_v48 = vmax.f32 %v1629_v22, %v1630_v20  ;;  %v7178_v39 = vrot.slane %v6021_v7, 2  ;;  %v7179_v29 = vrot.slane %v6092_v49, 2  ;;  %4684 = vmatpush3.bf16.msra.mxu0 %v4981_v27 }
 0x1e3   :  { %v6292_v12 = vsel %vm1002_vm1, %v7176_v23, %v7175_v62  ;;  %v2396_v8 = vpack.c.bf16 %v2381_v25, %v2382_v53  ;;  %v7177_v60 = vmov %v7176_v23  ;;  %v7181_v7 = vmov %v7175_v62  ;;  %4602 = vmatmul.mubr.bf16.vlgmr.msra.gmra.mxu1 %v2038_v47 }
 0x1e4   :  { %v6300_v32 = vsel %vm1002_vm1, %v7178_v39, %v7177_v60  ;;  %v6308_v19 = vsel %vm1002_vm1, %v7179_v29, %v2015_v6  ;;  %v7180_v1 = vmov %v7179_v29  ;;  %v7182_v56 = vrot.slane %v6023_v46, 1  ;;  %v4982_v39 = vld [vmem:[#allocation8 + $0x30] sm:$0xff]   ;;  %4605 = vmatprep.mubr.bf16.mxu1 %v2039_v9  ;;  %4650 = vmatpush3.bf16.msra.mxu1 %v6178_v54 }
 0x1e5   :  { %v2040_v22 = vpack.c.bf16 %v6292_v12, %v6300_v32  ;;  %v6318_v20 = vsel %vm1002_vm1, %v7181_v7, %v7180_v1  ;;  %v7184_v38 = vrot.slane %v7183_v26, 1  ;;  %v7186_v21 = vrot.slane %v7170_v41, 1  ;;  %4651 = vmatprep.subr.bf16.mxu1 %v4982_v39  ;;  %4638 = vmatmul.mubr.bf16.gmra.mxu0 %v2395_v0 }
 0x1e6   :  { %v1632_v34 = vrot.slane %v1631_v48, 1  ;;  %v7187_v62 = vrot.slane %v6005_v63, 1  ;;  %v7188_v23 = vrot.slane %v6082_v28, 1  ;;  %v7190_v16 = vmov %v7182_v56  ;;  %4641 = vmatprep.mubr.bf16.mxu0 %v2396_v8 }
 0x1e7   :  { %v6326_v25 = vsel %vm204_vm0, %v7184_v38, %v7182_v56  ;;  %v7185_v35 = vmov %v7184_v38  ;;  %v7191_v1 = vrot.slane %v6148_v52, 2  ;;  %v7192_v7 = vrot.slane %v6130_v59, 2 }
 0x1e8   :  { %v6334_v49 = vsel %vm204_vm0, %v7186_v21, %v7185_v35  ;;  %v6347_v60 = vsel %vm204_vm0, %v7188_v23, %v7187_v62  ;;  %v7189_v24 = vmov %v7188_v23  ;;  %v6379_v21 = vsel %vm1002_vm1, %v2018_v4, %v2019_v40  ;;  %v4983_v23 = vld [vmem:[#allocation8 + $0xa8] sm:$0xff]   ;;  %4652 = vmatpush3.bf16.msra.mxu1 %v4982_v39 }
 0x1e9   :  { %v6355_v29 = vsel %vm204_vm0, %v7190_v16, %v7189_v24  ;;  %v6363_v56 = vsel %vm1002_vm1, %v7192_v7, %v7191_v1  ;;  %v7193_v38 = vmov %v7192_v7  ;;  %v6381_v62 = vmax.f32 %v1624_v3, %v1625_v14  ;;  %4685 = vmatprep.subr.bf16.mxu0 %v4983_v23 }
 0x1ea   :  { %v6371_v35 = vsel %vm1002_vm1, %v2015_v6, %v7193_v38  ;;  %v7194_v6 = vmov %v7191_v1  ;;  %v7195_v14 = vrot.slane %v6032_v13, 1  ;;  %v7196_v16 = vrot.slane %v6005_v63, 1  ;;  %4686 = vmatpush3.bf16.msra.mxu0 %v4983_v23 }
 0x1eb   :  { %v6393_v24 = vsel %vm1002_vm1, %v7194_v6, %v2018_v4  ;;  %v7197_v5 = vrot.slane %v5799_v10, 1  ;;  %v7199_v47 = vrot.slane %v5772_v43, 2  ;;  %v7200_v7 = vrot.slane %v5816_v61, 2  ;;  %4606 = vmatmul.mubr.bf16.gmra.mxu1 %v2040_v22 }
 0x1ec   :  { %v6403_v1 = vsel %vm204_vm0, %v7196_v16, %v7195_v14  ;;  %v7198_v52 = vmov %v7195_v14  ;;  %v2722_v6 = vrot.slane %v6032_v13, 2  ;;  %v6439_v9 = vsel %vm1002_vm1, %v2019_v40, %v2020_v50  ;;  %v4985_v40 = vld [vmem:[#allocation8 + $0xa0] sm:$0xff]  }
 0x1ed   :  { %v6411_v4 = vsel %vm204_vm0, %v7198_v52, %v7197_v5  ;;  %v6419_v38 = vsel %vm1002_vm1, %v7200_v7, %v7199_v47  ;;  %v7201_v16 = vmov %v7200_v7  ;;  %v7202_v5 = vrot.slane %v5799_v10, 2  ;;  %v4984_v7 = vld [vmem:[#allocation8 + $0x28] sm:$0xff]   ;;  %4687 = vmatprep.subr.bf16.mxu0 %v4985_v40 }
 0x1ee   :  { %v2720_v54 = vrot.slane %v6082_v28, 2  ;;  %v1633_v47 = vmax.f32 %v1631_v48, %v1632_v34  ;;  %v7204_v27 = vrot.slane %v5844_v42, 2  ;;  %v7205_v48 = vrot.slane %v5899_v30, 2  ;;  %4653 = vmatprep.subr.bf16.mxu1 %v4984_v7  ;;  %4688 = vmatpush3.bf16.msra.mxu0 %v4985_v40  ;;  %v5004_v40 = vld [vmem:[#allocation10 + $0x10] sm:$0xff]  }
 0x1ef   :  { %v6431_v52 = vsel %vm1002_vm1, %v7202_v5, %v7201_v16  ;;  %v7203_v16 = vrot.slane %v5797_v15, 2  ;;  %v7207_v58 = vrot.slane %v5848_v17, 2  ;;  %v7208_v14 = vrot.slane %v7164_v36, 2  ;;  %4654 = vmatpush3.bf16.msra.mxu1 %v4984_v7  ;;  %v4997_v7 = vld [vmem:[#allocation10 + $0x78] sm:$0xff]  }
 0x1f0   :  { %v6460_v34 = vsel %vm1002_vm1, %v7205_v48, %v7204_v27  ;;  %v7206_v15 = vmov %v7205_v48  ;;  %v7209_v27 = vrot.slane %v7166_v51, 2  ;;  %v7212_v0 = vrot.slane %v7170_v41, 2 }
 0x1f1   :  { %v6450_v11 = vsel %vm1002_vm1, %v2020_v50, %v7203_v16  ;;  %v6468_v50 = vsel %vm1002_vm1, %v7207_v58, %v7206_v15  ;;  %v7211_v15 = vrot.slane %v5844_v42, 2  ;;  %v7213_v16 = vrot.slane %v5986_v57, 2 }
 0x1f2   :  { %v6480_v48 = vsel %vm1002_vm1, %v7209_v27, %v7208_v14  ;;  %v7210_v3 = vmov %v7209_v27  ;;  %v7215_v31 = vmov %v7208_v14  ;;  %v7217_v14 = vrot.slane %v7183_v26, 2 }
 0x1f3   :  { %v6488_v58 = vsel %vm1002_vm1, %v7211_v15, %v7210_v3  ;;  %v6496_v5 = vsel %vm1002_vm1, %v7213_v16, %v7212_v0  ;;  %v7214_v27 = vmov %v7213_v16  ;;  %v4986_v16 = vld [vmem:[#allocation8 + $0x20] sm:$0xff]   ;;  %v7216_v0 = vrot.slane %v6023_v46, 2 }
 0x1f4   :  { %v6506_v3 = vsel %vm1002_vm1, %v7215_v31, %v7214_v27  ;;  %v4987_v27 = vld [vmem:[#allocation8 + $0x98] sm:$0xff]   ;;  %v7218_v23 = vmov %v7217_v14  ;;  %v7219_v15 = vrot.slane %v7170_v41, 2  ;;  %v7220_v39 = vrot.slane %v6005_v63, 2  ;;  %4655 = vmatprep.subr.bf16.mxu1 %v4986_v16 }
 0x1f5   :  { %v6520_v31 = vsel %vm1002_vm1, %v7217_v14, %v7216_v0  ;;  %v7221_v14 = vmov %v7216_v0  ;;  %v2341_v53 = vpack.c.bf16 %v7183_v26, %v7170_v41  ;;  %v7222_v45 = vrot.slane %v6005_v63, 2  ;;  %4689 = vmatprep.subr.bf16.mxu0 %v4987_v27  ;;  %4656 = vmatpush3.bf16.msra.mxu1 %v4986_v16  ;;  %v5012_v16 = vld [vmem:[#allocation10 + $0x40] sm:$0xff]  }
 0x1f6   :  { %v6528_v8 = vsel %vm1002_vm1, %v7219_v15, %v7218_v23  ;;  %v6534_v59 = vsel %vm1002_vm1, %v2720_v54, %v7220_v39  ;;  %v6540_v0 = vsel %vm1002_vm1, %v7221_v14, %v2720_v54  ;;  %v2342_v23 = vpack.c.bf16 %v6082_v28, %v6023_v46  ;;  %v4988_v28 = vld [vmem:[#allocation8 + $0x18] sm:$0xff]   ;;  %4690 = vmatpush3.bf16.msra.mxu0 %v4987_v27 }
 0x1f7   :  { %v2744_v15 = vpack.c.bf16 %v6520_v31, %v6528_v8  ;;  %v2745_v39 = vpack.c.bf16 %v6534_v59, %v6540_v0  ;;  %v2723_v54 = vsel %vm1002_vm1, %v7222_v45, %v2722_v6  ;;  %v7223_v41 = vpack.c.bf16 %v6308_v19, %v6318_v20  ;;  %v4989_v20 = vld [vmem:[#allocation8 + $0x90] sm:$0xff]   ;;  %4657 = vmatprep.subr.bf16.mxu1 %v4988_v28  ;;  %v6625_v8 = vld [vmem:[#allocation10 + $0xb8] sm:$0xff]  }
 0x1f8   :  { %v7224_v12 = vrot.slane %v5799_v10, 2  ;;  %v2343_v22 = vpack.c.bf16 %v6032_v13, %v6005_v63  ;;  %v3679_v46 = vsel %vm3678_vm5, %v6139_v2, %v6048_v33  ;;  %v7225_v63 = vpack.c.bf16 %v6326_v25, %v6334_v49  ;;  %4691 = vmatprep.subr.bf16.mxu0 %v4989_v20 }
 0x1f9   :  { %4609 = vmatprep.mubr.bf16.mxu1 %v7223_v41  ;;  %v3681_v19 = vsel %vm3680_vm6, %v6180_v37, %v3679_v46  ;;  %v7226_v33 = vpack.c.bf16 %v6347_v60, %v6355_v29  ;;  %v4990_v37 = vld [vmem:[#allocation8 + $0x10] sm:$0xff]   ;;  %v7227_v25 = vpack.c.bf16 %v6363_v56, %v6371_v35  ;;  %v7228_v49 = vpack.c.bf16 %v6379_v21, %v6393_v24  ;;  %v4992_v60 = vld [vmem:[#allocation8 + $0x8] sm:$0xff]   ;;  %v4993_v29 = vld [vmem:[#allocation8 + $0x80] sm:$0xff]  }
 0x1fa   :  { %v2738_v32 = vsel %vm1002_vm1, %v2722_v6, %v7224_v12  ;;  %v3683_v45 = vsel %vm3682_vm7, %v6189_v44, %v3681_v19  ;;  %4642 = vmatmul.mubr.bf16.gmra.mxu0 %v7225_v63  ;;  %v4991_v44 = vld [vmem:[#allocation8 + $0x88] sm:$0xff]   ;;  %4658 = vmatpush3.bf16.msra.mxu1 %v4988_v28  ;;  %v7230_v59 = vpack.c.bf16 %v6419_v38, %v6431_v52  ;;  %v4994_v56 = vld [vmem:[#allocation8] sm:$0xff]  }
 0x1fb   :  { %v2746_v26 = vpack.c.bf16 %v2738_v32, %v2723_v54  ;;  %v3685_v13 = vsel %vm3684_vm8, %v6381_v62, %v3683_v45  ;;  %4645 = vmatprep.mubr.bf16.mxu0 %v7226_v33  ;;  %4610 = vmatmul.mubr.bf16.gmra.mxu1 %v7227_v25  ;;  %v7229_v62 = vpack.c.bf16 %v6411_v4, %v6403_v1  ;;  %v7232_v24 = vld [vmem:[#allocation23_spill] sm:$0xff]  ;;  %v7233_v1 = vld [vmem:[#allocation22_spill] sm:$0xff] }
 0x1fc   :  { %v6582_v2 = vsel %vm3686_vm9, %v1633_v47, %v3685_v13  ;;  %4613 = vmatprep.mubr.bf16.mxu1 %v7228_v49  ;;  %4692 = vmatpush3.bf16.msra.mxu0 %v4989_v20  ;;  %v2336_v35 = vpack.c.bf16 %v5816_v61, %v5799_v10  ;;  %v7231_v21 = vpack.c.bf16 %v6450_v11, %v6439_v9  ;;  %v7236_v6 = vld [vmem:[#allocation19_spill] sm:$0xff] }
 0x1fd   :  { %4659 = vmatprep.subr.bf16.mxu1 %v4990_v37  ;;  %4693 = vmatprep.subr.bf16.mxu0 %v4991_v44  ;;  %v7234_v4 = vpack.c.bf16 %v7232_v24, %v7233_v1  ;;  %v7235_v38 = vpack.c.bf16 %v6460_v34, %v6468_v50  ;;  %v7237_v10 = vpack.c.bf16 %v7236_v6, %v5772_v43  ;;  %v4998_v11 = vld [vmem:[#allocation10 + $0x28] sm:$0xff]   ;;  %v5007_v50 = vld [vmem:[#allocation10 + $0x50] sm:$0xff]  }
 0x1fe   :  { %4660 = vmatpush3.bf16.msra.mxu1 %v4990_v37  ;;  %v7238_v61 = vpack.c.bf16 %v5899_v30, %v5848_v17  ;;  %v7239_v52 = vpack.c.bf16 %v6480_v48, %v6488_v58  ;;  %v7240_v9 = vpack.c.bf16 %v6496_v5, %v6506_v3  ;;  %v7241_v47 = vpack.c.bf16 %v7166_v51, %v5844_v42  ;;  %v4995_v17 = vld [vmem:[#allocation10 + $0x38] sm:$0xff]   ;;  %v4996_v30 = vld [vmem:[#allocation10 + $0x30] sm:$0xff]   ;;  %v5006_v34 = vld [vmem:[#allocation10 + $0x8] sm:$0xff]  }
 0x1ff   :  { %4661 = vmatprep.subr.bf16.mxu1 %v4992_v60  ;;  %v7242_v43 = vpack.c.bf16 %v5986_v57, %v7164_v36  ;;  %v4999_v42 = vld [vmem:[#allocation10 + $0x70] sm:$0xff]   ;;  %v5000_v57 = vld [vmem:[#allocation10 + $0x20] sm:$0xff]   ;;  %v5001_v36 = vld [vmem:[#allocation10 + $0x68] sm:$0xff]  }
 0x200   :  { %4694 = vmatpush3.bf16.msra.mxu0 %v4991_v44  ;;  %v5002_v51 = vld [vmem:[#allocation10 + $0x18] sm:$0xff]   ;;  %v5008_v48 = vld [vmem:[#allocation10] sm:$0xff]   ;;  %v5009_v58 = vld [vmem:[#allocation10 + $0x48] sm:$0xff]  }
 0x201   :  { %4695 = vmatprep.subr.bf16.mxu0 %v4993_v29  ;;  %v5005_v5 = vld [vmem:[#allocation10 + $0x58] sm:$0xff]  }
 0x202   :  { %4646 = vmatmul.mubr.bf16.gmra.mxu0 %v7229_v62  ;;  %4662 = vmatpush3.bf16.msra.mxu1 %v4992_v60  ;;  %v5010_v3 = vld [vmem:[#allocation11 + $0x78] sm:$0xff]  }
 0x203   :  { %4697 = vmatprep.mubr.bf16.mxu0 %v7230_v59  ;;  %4614 = vmatmul.mubr.bf16.gmra.mxu1 %v7231_v21 }
 0x204   :  { %4665 = vmatprep.mubr.bf16.mxu1 %v2336_v35  ;;  %4696 = vmatpush3.bf16.msra.mxu0 %v4993_v29 }
 0x205   :  { %4663 = vmatprep.subr.bf16.mxu1 %v4994_v56  ;;  %4745 = vmatprep.subr.bf16.mxu0 %v4995_v17 }
 0x206   :  { %4664 = vmatpush3.bf16.msra.mxu1 %v4994_v56 }
 0x207   :  { %4713 = vmatprep.subr.bf16.mxu1 %v4997_v7 }
 0x20a   :  { %4698 = vmatmul.mubr.bf16.vlgmr.msra.gmra.mxu0 %v7234_v4 }
 0x20b   :  { %4701 = vmatprep.mubr.bf16.mxu0 %v7235_v38  ;;  %4666 = vmatmul.mubr.bf16.vlgmr.msra.gmra.mxu1 %v7237_v10 }
 0x20c   :  { %4669 = vmatprep.mubr.bf16.mxu1 %v7238_v61  ;;  %4746 = vmatpush3.bf16.msra.mxu0 %v4995_v17 }
 0x20d   :  { %4747 = vmatprep.subr.bf16.mxu0 %v4996_v30  ;;  %4714 = vmatpush3.bf16.msra.mxu1 %v4997_v7  ;;  %v6667_v7 = vld [vmem:[%s7062_s4] ss:$0 sm:$0xff] }
 0x20e   :  { %4715 = vmatprep.subr.bf16.mxu1 %v4999_v42 }
 0x210   :  { %4748 = vmatpush3.bf16.msra.mxu0 %v4996_v30 }
 0x211   :  { %4749 = vmatprep.subr.bf16.mxu0 %v4998_v11  ;;  %4716 = vmatpush3.bf16.msra.mxu1 %v4999_v42 }
 0x212   :  { %4702 = vmatmul.mubr.bf16.gmra.mxu0 %v7239_v52  ;;  %4717 = vmatprep.subr.bf16.mxu1 %v5001_v36 }
 0x213   :  { %4705 = vmatprep.mubr.bf16.mxu0 %v7240_v9  ;;  %4670 = vmatmul.mubr.bf16.gmra.mxu1 %v7241_v47 }
 0x214   :  { %4673 = vmatprep.mubr.bf16.mxu1 %v7242_v43  ;;  %4750 = vmatpush3.bf16.msra.mxu0 %v4998_v11 }
 0x215   :  { %4751 = vmatprep.subr.bf16.mxu0 %v5000_v57  ;;  %4718 = vmatpush3.bf16.msra.mxu1 %v5001_v36 }
 0x218   :  { %4752 = vmatpush3.bf16.msra.mxu0 %v5000_v57 }
 0x219   :  { %4753 = vmatprep.subr.bf16.mxu0 %v5002_v51 }
 0x21a   :  { %4706 = vmatmul.mubr.bf16.gmra.mxu0 %v2744_v15 }
 0x21b   :  { %4709 = vmatprep.mubr.bf16.mxu0 %v2745_v39  ;;  %4674 = vmatmul.mubr.bf16.gmra.mxu1 %v2341_v53  ;;  %v5003_v53 = vld [vmem:[#allocation10 + $0x60] sm:$0xff]  }
 0x21c   :  { %4677 = vmatprep.mubr.bf16.mxu1 %v2342_v23  ;;  %4719 = vmatprep.subr.bf16.mxu1 %v5003_v53 }
 0x21d   :  { %4754 = vmatpush3.bf16.msra.mxu0 %v5002_v51  ;;  %4720 = vmatpush3.bf16.msra.mxu1 %v5003_v53 }
 0x21e   :  { %4755 = vmatprep.subr.bf16.mxu0 %v5004_v40  ;;  %4721 = vmatprep.subr.bf16.mxu1 %v5005_v5 }
 0x221   :  { %4756 = vmatpush3.bf16.msra.mxu0 %v5004_v40  ;;  %4722 = vmatpush3.bf16.msra.mxu1 %v5005_v5 }
 0x222   :  { %4710 = vmatmul.mubr.bf16.gmra.mxu0 %v2746_v26  ;;  %4757 = vmatprep.subr.bf16.mxu0 %v5006_v34 }
 0x223   :  { %4678 = vmatmul.mubr.bf16.gmra.mxu1 %v2343_v22  ;;  %4723 = vmatprep.subr.bf16.mxu1 %v5007_v50 }
 0x225   :  { %4758 = vmatpush3.bf16.msra.mxu0 %v5006_v34  ;;  %4724 = vmatpush3.bf16.msra.mxu1 %v5007_v50 }
 0x226   :  { %4759 = vmatprep.subr.bf16.mxu0 %v5008_v48  ;;  %4725 = vmatprep.subr.bf16.mxu1 %v5009_v58 }
 0x229   :  { %4760 = vmatpush3.bf16.msra.mxu0 %v5008_v48  ;;  %4726 = vmatpush3.bf16.msra.mxu1 %v5009_v58 }
 0x22a   :  { %4394 = vmatprep.subr.bf16.mxu0 %v5010_v3  ;;  %4727 = vmatprep.subr.bf16.mxu1 %v5012_v16 }
 0x22d   :  { %4728 = vmatpush3.bf16.msra.mxu1 %v5012_v16 }
 0x22e   :  { %4777 = vmatprep.subr.bf16.mxu1 %v6625_v8 }
 0x265   :  { %v4571_v31 = vpop.f32.mrf.mxu0 }
 0x267   :  { %v1942_v27 = vpop.f32.mrf.mxu0 }
 0x269   :  { %v4572_v15 = vpop.f32.mrf.mxu0 }
 0x26b   :  { %v1945_v12 = vpop.f32.mrf.mxu0 }
 0x277   :  { %v4539_v14 = vpop.f32.mrf.mxu1 }
 0x278   :  { %v1951_v0 = vadd.f32 %v4571_v31, %v4539_v14 }
 0x279   :  { %v1797_v39 = vpop.f32.mrf.mxu1 }
 0x27a   :  { %v1943_v23 = vadd.f32 %v1942_v27, %v1797_v39 }
 0x27b   :  { %v4540_v54 = vpop.f32.mrf.mxu1  ;;  %v4575_v46 = vpop.f32.mrf.mxu0 }
 0x27c   :  { %v1954_v41 = vadd.f32 %v4572_v15, %v4540_v54 }
 0x27d   :  { %v1800_v32 = vpop.f32.mrf.mxu1  ;;  %v1958_v28 = vpop.f32.mrf.mxu0 }
 0x27e   :  { %v1946_v22 = vadd.f32 %v1945_v12, %v1800_v32 }
 0x27f   :  { %v4576_v20 = vpop.f32.mrf.mxu0 }
 0x281   :  { %v1961_v13 = vpop.f32.mrf.mxu0 }
 0x285   :  { %v4543_v26 = vpop.f32.mrf.mxu1 }
 0x286   :  { %v1967_v19 = vadd.f32 %v4575_v46, %v4543_v26 }
 0x287   :  { %v1813_v45 = vpop.f32.mrf.mxu1 }
 0x288   :  { %v1959_v63 = vadd.f32 %v1958_v28, %v1813_v45 }
 0x289   :  { %v4544_v33 = vpop.f32.mrf.mxu1 }
 0x28a   :  { %v1970_v15 = vadd.f32 %v4576_v20, %v4544_v33 }
 0x28b   :  { %v4579_v37 = vpop.f32.mrf.mxu0  ;;  %v1816_v25 = vpop.f32.mrf.mxu1 }
 0x28c   :  { %v1962_v46 = vadd.f32 %v1961_v13, %v1816_v25 }
 0x28d   :  { %v6628_v44 = vpop.f32.mrf.mxu0 }
 0x28f   :  { %v6630_v49 = vpop.f32.mrf.mxu0 }
 0x291   :  { %v4547_v60 = vpop.f32.mrf.mxu1  ;;  %v6632_v29 = vpop.f32.mrf.mxu0 }
 0x293   :  { %v6634_v62 = vpop.f32.mrf.mxu1 }
 0x295   :  { %v6636_v59 = vpop.f32.mrf.mxu1  ;;  %v6638_v56 = vpop.f32.mrf.mxu0 }
 0x297   :  { %v6640_v35 = vpop.f32.mrf.mxu1  ;;  %v6642_v21 = vpop.f32.mrf.mxu0 }
 0x299   :  { %v6646_v1 = vpop.f32.mrf.mxu0 }
 0x29b   :  { %v6644_v24 = vpop.f32.mrf.mxu1  ;;  %v6650_v38 = vpop.f32.mrf.mxu0 }
 0x29d   :  { %v6648_v4 = vpop.f32.mrf.mxu1  ;;  %v6654_v10 = vpop.f32.mrf.mxu0 }
 0x29f   :  { %v6652_v6 = vpop.f32.mrf.mxu1  ;;  %v6658_v52 = vpop.f32.mrf.mxu0 }
 0x2a1   :  { %v6656_v61 = vpop.f32.mrf.mxu1  ;;  %v6660_v47 = vpop.f32.mrf.mxu0 }
 0x2a3   :  { %v4603_v9 = vpop.f32.mrf.mxu1  ;;  %v6662_v30 = vpop.f32.mrf.mxu0 }
 0x2a4   :  { %v2209_v43 = vadd.f32 %v4603_v9, %v1951_v0 }
 0x2a5   :  { %v2144_v17 = vpop.f32.mrf.mxu1  ;;  %v6669_v57 = vpop.f32.mrf.mxu0 }
 0x2a6   :  { %v2207_v11 = vadd.f32 %v2144_v17, %v1943_v23  ;;  %v2232_v51 = vadd.f32 %v6667_v7, %v2209_v43  ;;  %v1983_v43 = vadd.f32 %v4579_v37, %v4547_v60 }
 0x2a7   :  { %v4604_v42 = vpop.f32.mrf.mxu1  ;;  %v6672_v40 = vpop.f32.mrf.mxu0 }
 0x2a8   :  { %v2210_v36 = vadd.f32 %v4604_v42, %v1954_v41  ;;  %v2230_v50 = vadd.f32 %v6667_v7, %v2207_v11  ;;  %v2248_v31 = vmax.f32 %v2232_v51, 0.0 }
 0x2a9   :  { %v2147_v53 = vpop.f32.mrf.mxu1  ;;  %v6677_v58 = vpop.f32.mrf.mxu0 }
 0x2aa   :  { %v2233_v5 = vadd.f32 %v6667_v7, %v2210_v36  ;;  %v2208_v34 = vadd.f32 %v2147_v53, %v1946_v22  ;;  %v2246_v41 = vmax.f32 %v2230_v50, 0.0 }
 0x2ab   :  { %v4607_v48 = vpop.f32.mrf.mxu1  ;;  %v6680_v0 = vpop.f32.mrf.mxu0 }
 0x2ac   :  { %v2249_v3 = vmax.f32 %v2233_v5, 0.0  ;;  %v2231_v16 = vadd.f32 %v6667_v7, %v2208_v34  ;;  %v2213_v27 = vadd.f32 %v4607_v48, %v1967_v19  ;;  %v1975_v34 = vadd.f32 %v6628_v44, %v6634_v62 }
 0x2ad   :  { %v2160_v14 = vpop.f32.mrf.mxu1  ;;  %v1978_v62 = vadd.f32 %v6632_v29, %v6640_v35 }
 0x2ae   :  { %v2267_v39 = vsel %vm2263_vm10, %v2249_v3, -inf  ;;  %v2247_v23 = vmax.f32 %v2231_v16, 0.0  ;;  %v2211_v54 = vadd.f32 %v2160_v14, %v1959_v63  ;;  %v2236_v9 = vadd.f32 %v6667_v7, %v2213_v27 }
 0x2af   :  { %v2287_v12 = vmax.f32 %v2248_v31, %v2267_v39  ;;  %v4608_v32 = vpop.f32.mrf.mxu1  ;;  %v1986_v16 = vadd.f32 %v6630_v49, %v6636_v59 }
 0x2b0   :  { %v2265_v28 = vsel %vm2263_vm10, %v2247_v23, -inf  ;;  %v2214_v26 = vadd.f32 %v4608_v32, %v1970_v15  ;;  %v2234_v63 = vadd.f32 %v6667_v7, %v2211_v54  ;;  %v2252_v37 = vmax.f32 %v2236_v9, 0.0 }
 0x2b1   :  { %v2288_v19 = vrot.slane %v2287_v12, 4  ;;  %v2280_v45 = vmax.f32 %v2246_v41, %v2265_v28  ;;  %v2163_v20 = vpop.f32.mrf.mxu1  ;;  %v1999_v9 = vadd.f32 %v6638_v56, %v6644_v24 }
 0x2b2   :  { %v2237_v17 = vadd.f32 %v6667_v7, %v2214_v26  ;;  %v2212_v11 = vadd.f32 %v2163_v20, %v1962_v46  ;;  %v2250_v31 = vmax.f32 %v2234_v63, 0.0  ;;  %v1991_v20 = vadd.f32 %v6642_v21, %v6648_v4 }
 0x2b3   :  { %v2289_v42 = vmax.f32 %v2287_v12, %v2288_v19  ;;  %v2281_v36 = vrot.slane %v2280_v45, 4 }
 0x2b4   :  { %v2253_v51 = vmax.f32 %v2237_v17, 0.0  ;;  %v2235_v53 = vadd.f32 %v6667_v7, %v2212_v11 }
 0x2b5   :  { %v2290_v50 = vrot.slane %v2289_v42, 2  ;;  %v2282_v48 = vmax.f32 %v2280_v45, %v2281_v36 }
 0x2b6   :  { %v2271_v27 = vsel %vm2263_vm10, %v2253_v51, -inf  ;;  %v2251_v14 = vmax.f32 %v2235_v53, 0.0 }
 0x2b7   :  { %v2291_v15 = vmax.f32 %v2289_v42, %v2290_v50  ;;  %v2283_v39 = vrot.slane %v2282_v48, 2  ;;  %v2301_v23 = vmax.f32 %v2252_v37, %v2271_v27 }
 0x2b8   :  { %v2269_v12 = vsel %vm2263_vm10, %v2251_v14, -inf }
 0x2b9   :  { %v2292_v32 = vrot.slane %v2291_v15, 1  ;;  %v2284_v46 = vmax.f32 %v2282_v48, %v2283_v39  ;;  %v2302_v28 = vrot.slane %v2301_v23, 4  ;;  %v2294_v26 = vmax.f32 %v2250_v31, %v2269_v12 }
 0x2ba   :  { %v6684_v22 = vpop.f32.mrf.mxu0 }
 0x2bb   :  { %v4611_v13 = vpop.f32.mrf.mxu1  ;;  %v2285_v63 = vrot.slane %v2284_v46, 1  ;;  %v2295_v17 = vrot.slane %v2294_v26, 4  ;;  %v2293_v53 = vmax.f32 %v2291_v15, %v2292_v32 }
 0x2bc   :  { %v6689_v33 = vpop.f32.mrf.mxu0  ;;  %v2217_v5 = vadd.f32 %v4611_v13, %v1983_v43  ;;  %v2002_v43 = vadd.f32 %v6646_v1, %v6652_v6  ;;  %v2303_v13 = vmax.f32 %v2301_v23, %v2302_v28  ;;  %v1994_v1 = vadd.f32 %v6650_v38, %v6656_v61 }
 0x2bd   :  { %v2176_v60 = vpop.f32.mrf.mxu1  ;;  %v2286_v21 = vmax.f32 %v2284_v46, %v2285_v63  ;;  %v2296_v4 = vmax.f32 %v2294_v26, %v2295_v17 }
 0x2be   :  { %v6693_v25 = vpop.f32.mrf.mxu0  ;;  %v2215_v54 = vadd.f32 %v2176_v60, %v1975_v34  ;;  %v2240_v49 = vadd.f32 %v6667_v7, %v2217_v5  ;;  %v2304_v15 = vrot.slane %v2303_v13, 2 }
 0x2bf   :  { %v4612_v41 = vpop.f32.mrf.mxu1  ;;  %v3697_v60 = vsel %vm3674_vm3, %v2293_v53, %v2286_v21 }
 0x2c0   :  { %v6698_v3 = vpop.f32.mrf.mxu0  ;;  %v2218_v59 = vadd.f32 %v4612_v41, %v1986_v16  ;;  %v2238_v11 = vadd.f32 %v6667_v7, %v2215_v54  ;;  %v2256_v5 = vmax.f32 %v2240_v49, 0.0  ;;  %v2297_v16 = vrot.slane %v2296_v4, 2 }
 0x2c1   :  { %v2179_v19 = vpop.f32.mrf.mxu1  ;;  %v2305_v63 = vmax.f32 %v2303_v13, %v2304_v15 }
 0x2c2   :  { %v6704_v44 = vpop.f32.mrf.mxu0  ;;  %v2241_v29 = vadd.f32 %v6667_v7, %v2218_v59  ;;  %v2216_v35 = vadd.f32 %v2179_v19, %v1978_v62  ;;  %v2254_v31 = vmax.f32 %v2238_v11, 0.0  ;;  %v2298_v38 = vmax.f32 %v2296_v4, %v2297_v16 }
 0x2c3   :  { %v4615_v42 = vpop.f32.mrf.mxu1 }
 0x2c4   :  { %v6711_v45 = vpop.f32.mrf.mxu0  ;;  %v2257_v51 = vmax.f32 %v2241_v29, 0.0  ;;  %v2239_v56 = vadd.f32 %v6667_v7, %v2216_v35  ;;  %v2221_v24 = vadd.f32 %v4615_v42, %v1999_v9  ;;  %v2299_v28 = vrot.slane %v2298_v38, 1 }
 0x2c5   :  { %v2192_v34 = vpop.f32.mrf.mxu1 }
 0x2c6   :  { %v6721_v36 = vpop.f32.mrf.mxu0  ;;  %v2275_v6 = vsel %vm2263_vm10, %v2257_v51, -inf  ;;  %v2255_v48 = vmax.f32 %v2239_v56, 0.0  ;;  %v2219_v37 = vadd.f32 %v2192_v34, %v1991_v20  ;;  %v2244_v23 = vadd.f32 %v6667_v7, %v2221_v24  ;;  %v6741_v51 = vld [vmem:[%s7064_s6] ss:$0 sm:$0xff] }
 0x2c7   :  { %v2315_v27 = vmax.f32 %v2256_v5, %v2275_v6  ;;  %v4616_v14 = vpop.f32.mrf.mxu1  ;;  %v2300_v17 = vmax.f32 %v2298_v38, %v2299_v28 }
 0x2c8   :  { %v6724_v50 = vpop.f32.mrf.mxu0  ;;  %v2273_v39 = vsel %vm2263_vm10, %v2255_v48, -inf  ;;  %v2222_v54 = vadd.f32 %v4616_v14, %v2002_v43  ;;  %v2242_v12 = vadd.f32 %v6667_v7, %v2219_v37  ;;  %v2260_v11 = vmax.f32 %v2244_v23, 0.0 }
 0x2c9   :  { %v2316_v61 = vrot.slane %v2315_v27, 4  ;;  %v2308_v62 = vmax.f32 %v2254_v31, %v2273_v39  ;;  %v2195_v49 = vpop.f32.mrf.mxu1 }
 0x2ca   :  { %v4699_v41 = vpop.f32.mrf.mxu0  ;;  %v2245_v59 = vadd.f32 %v6667_v7, %v2222_v54  ;;  %v2220_v32 = vadd.f32 %v2195_v49, %v1994_v1  ;;  %v2258_v42 = vmax.f32 %v2242_v12, 0.0  ;;  %v3698_v1 = vsel %vm3676_vm4, %v2300_v17, %v3697_v60 }
 0x2cb   :  { %v2317_v26 = vmax.f32 %v2315_v27, %v2316_v61  ;;  %v2309_v19 = vrot.slane %v2308_v62, 4  ;;  %v4667_v9 = vpop.f32.mrf.mxu1  ;;  %v2306_v27 = vrot.slane %v2305_v63, 1 }
 0x2cc   :  { %v2846_v46 = vpop.f32.mrf.mxu0  ;;  %v2261_v20 = vmax.f32 %v2245_v59, 0.0  ;;  %v2243_v29 = vadd.f32 %v6667_v7, %v2220_v32  ;;  %v2653_v35 = vadd.f32 %v4667_v9, %v6654_v10 }
 0x2cd   :  { %v2644_v56 = vpop.f32.mrf.mxu1  ;;  %v2318_v10 = vrot.slane %v2317_v26, 2  ;;  %v2310_v5 = vmax.f32 %v2308_v62, %v2309_v19  ;;  %v2307_v28 = vmax.f32 %v2305_v63, %v2306_v27 }
 0x2ce   :  { %v4700_v43 = vpop.f32.mrf.mxu0  ;;  %v2279_v24 = vsel %vm2263_vm10, %v2261_v20, -inf  ;;  %v2259_v53 = vmax.f32 %v2243_v29, 0.0  ;;  %v2911_v21 = vadd.f32 %v4699_v41, %v2653_v35  ;;  %v2645_v7 = vadd.f32 %v2644_v56, %v6658_v52 }
 0x2cf   :  { %v2329_v13 = vmax.f32 %v2260_v11, %v2279_v24  ;;  %v4668_v34 = vpop.f32.mrf.mxu1  ;;  %v6753_v60 = vmax.f32 %v2317_v26, %v2318_v10  ;;  %v2311_v38 = vrot.slane %v2310_v5, 2 }
 0x2d0   :  { %v2849_v4 = vpop.f32.mrf.mxu0  ;;  %v2277_v6 = vsel %vm2263_vm10, %v2259_v53, -inf  ;;  %v2934_v48 = vadd.f32 %v6741_v51, %v2911_v21  ;;  %v2909_v37 = vadd.f32 %v2846_v46, %v2645_v7  ;;  %v2656_v16 = vadd.f32 %v4668_v34, %v6660_v47 }
 0x2d1   :  { %v2330_v14 = vrot.slane %v2329_v13, 4  ;;  %v2322_v15 = vmax.f32 %v2258_v42, %v2277_v6  ;;  %v2647_v52 = vpop.f32.mrf.mxu1  ;;  %v6769_v42 = vsel %vm3678_vm5, %v2307_v28, %v3698_v1  ;;  %v5011_v6 = vld [vmem:[#allocation11 + $0x38] sm:$0xff]   ;;  %v5014_v28 = vld [vmem:[#allocation11 + $0x30] sm:$0xff]  }
 0x2d2   :  { %v4703_v31 = vpop.f32.mrf.mxu0  ;;  %v2932_v39 = vadd.f32 %v6741_v51, %v2909_v37  ;;  %v2912_v23 = vadd.f32 %v4700_v43, %v2656_v16  ;;  %v2648_v54 = vadd.f32 %v2647_v52, %v6662_v30  ;;  %v6755_v62 = vmax.f32 %v2934_v48, 0.0 }
 0x2d3   :  { %v2323_v61 = vrot.slane %v2322_v15, 4  ;;  %v4671_v12 = vpop.f32.mrf.mxu1  ;;  %v6757_v49 = vmax.f32 %v2329_v13, %v2330_v14  ;;  %v2320_v43 = vrot.slane %v6753_v60, 1  ;;  %v5013_v14 = vld [vmem:[#allocation11 + $0x70] sm:$0xff]  }
 0x2d4   :  { %v2862_v41 = vpop.f32.mrf.mxu0  ;;  %v2935_v47 = vadd.f32 %v6741_v51, %v2912_v23  ;;  %v2910_v59 = vadd.f32 %v2849_v4, %v2648_v54  ;;  %v2669_v32 = vadd.f32 %v4671_v12, %v6669_v57  ;;  %v6761_v9 = vmax.f32 %v2932_v39, 0.0 }
 0x2d5   :  { %v2324_v19 = vmax.f32 %v2322_v15, %v2323_v61  ;;  %v2660_v30 = vpop.f32.mrf.mxu1  ;;  %v6771_v57 = vmax.f32 %v2310_v5, %v2311_v38  ;;  %v2332_v63 = vrot.slane %v6757_v49, 2  ;;  %v2990_v53 = vrot.slane %v6755_v62, 1 }
 0x2d6   :  { %v4704_v46 = vpop.f32.mrf.mxu0  ;;  %v2933_v26 = vadd.f32 %v6741_v51, %v2910_v59  ;;  %v2915_v20 = vadd.f32 %v4703_v31, %v2669_v32  ;;  %v2661_v29 = vadd.f32 %v2660_v30, %v6672_v40  ;;  %v6766_v17 = vmax.f32 %v2935_v47, 0.0 }
 0x2d7   :  { %v4672_v11 = vpop.f32.mrf.mxu1  ;;  %v2325_v21 = vrot.slane %v2324_v19, 2  ;;  %v2988_v10 = vrot.slane %v6761_v9, 1  ;;  %v2313_v30 = vrot.slane %v6771_v57, 1 }
 0x2d8   :  { %v2865_v35 = vpop.f32.mrf.mxu0  ;;  %v6774_v56 = vmax.f32 %v2933_v26, 0.0  ;;  %v2913_v40 = vadd.f32 %v2862_v41, %v2661_v29  ;;  %v2672_v7 = vadd.f32 %v4672_v11, %v6677_v58  ;;  %v2938_v13 = vadd.f32 %v6741_v51, %v2915_v20 }
 0x2d9   :  { %v2663_v4 = vpop.f32.mrf.mxu1  ;;  %v2965_v37 = vpack.c.bf16 %v6766_v17, %v6755_v62  ;;  %v2991_v16 = vrot.slane %v6766_v17, 1  ;;  %v6795_v54 = vmax.f32 %v2324_v19, %v2325_v21  ;;  %v6805_v19 = vmax.f32 %v6753_v60, %v2320_v43 }
 0x2da   :  { %v4707_v24 = vpop.f32.mrf.mxu0  ;;  %v2664_v34 = vadd.f32 %v2663_v4, %v6680_v0  ;;  %v2964_v1 = vpack.c.bf16 %v6774_v56, %v6761_v9  ;;  %v2989_v48 = vrot.slane %v6774_v56, 1  ;;  %v2936_v58 = vadd.f32 %v6741_v51, %v2913_v40 }
 0x2db   :  { %v2916_v31 = vadd.f32 %v4704_v46, %v2672_v7  ;;  %v4675_v27 = vpop.f32.mrf.mxu1  ;;  %v6812_v11 = vmax.f32 %v6757_v49, %v2332_v63  ;;  %v2327_v43 = vrot.slane %v6795_v54, 1  ;;  %v3016_v4 = vsel %vm204_vm0, %v2990_v53, %v2991_v16 }
 0x2dc   :  { %v2878_v5 = vpop.f32.mrf.mxu0  ;;  %v2914_v15 = vadd.f32 %v2865_v35, %v2664_v34  ;;  %v2685_v0 = vadd.f32 %v4675_v27, %v6684_v22  ;;  %4761 = vmatprep.mubr.bf16.mxu0 %v2964_v1  ;;  %v3017_v39 = vsel %vm204_vm0, %v2989_v48, %v2990_v53  ;;  %v3018_v23 = vsel %vm204_vm0, %v2988_v10, %v2989_v48  ;;  %v5016_v35 = vld [vmem:[#allocation11 + $0x68] sm:$0xff]  }
 0x2dd   :  { %v6797_v41 = vmax.f32 %v2936_v58, 0.0  ;;  %v2939_v38 = vadd.f32 %v6741_v51, %v2916_v31  ;;  %v2676_v61 = vpop.f32.mrf.mxu1  ;;  %4762 = vmatmul.mubr.bf16.vlgmr.msra.gmra.mxu0 %v2965_v37  ;;  %v3020_v12 = vpack.c.bf16 %v3017_v39, %v3018_v23  ;;  %v6800_v22 = vmax.f32 %v2938_v13, 0.0  ;;  %v5017_v53 = vld [vmem:[#allocation11 + $0x28] sm:$0xff]  }
 0x2de   :  { %v4708_v52 = vpop.f32.mrf.mxu0  ;;  %v2937_v47 = vadd.f32 %v6741_v51, %v2914_v15  ;;  %v2919_v59 = vadd.f32 %v4707_v24, %v2685_v0  ;;  %v2677_v32 = vadd.f32 %v2676_v61, %v6689_v33  ;;  %4395 = vmatpush3.bf16.msra.mxu0 %v5011_v6 }
 0x2df   :  { %v2992_v26 = vrot.slane %v6797_v41, 1  ;;  %v6809_v20 = vmax.f32 %v2939_v38, 0.0  ;;  %v4676_v29 = vpop.f32.mrf.mxu1  ;;  %4729 = vmatprep.mubr.bf16.mxu1 %v3020_v12  ;;  %4396 = vmatprep.subr.bf16.mxu0 %v5013_v14 }
 0x2e0   :  { %v2881_v46 = vpop.f32.mrf.mxu0  ;;  %v6814_v33 = vmax.f32 %v2937_v47, 0.0  ;;  %v2917_v24 = vadd.f32 %v2878_v5, %v2677_v32  ;;  %v2688_v21 = vadd.f32 %v4676_v29, %v6693_v25  ;;  %v2942_v7 = vadd.f32 %v6741_v51, %v2919_v59  ;;  %v5018_v25 = vld [vmem:[#allocation10 + $0xb0] sm:$0xff]   ;;  %v5021_v59 = vld [vmem:[#allocation10 + $0xa8] sm:$0xff]  }
 0x2e1   :  { %v3015_v40 = vsel %vm204_vm0, %v2991_v16, %v2992_v26  ;;  %v2679_v13 = vpop.f32.mrf.mxu1  ;;  %v2994_v5 = vrot.slane %v6800_v22, 1  ;;  %v2995_v1 = vrot.slane %v6809_v20, 1  ;;  %v2967_v15 = vpack.c.bf16 %v6809_v20, %v6800_v22 }
 0x2e2   :  { %v4711_v60 = vpop.f32.mrf.mxu0  ;;  %v2940_v49 = vadd.f32 %v6741_v51, %v2917_v24  ;;  %v2920_v63 = vadd.f32 %v4708_v52, %v2688_v21  ;;  %v3021_v34 = vpack.c.bf16 %v3015_v40, %v3016_v4  ;;  %4397 = vmatpush3.bf16.msra.mxu0 %v5014_v28  ;;  %v2680_v6 = vadd.f32 %v2679_v13, %v6698_v3  ;;  %v5019_v3 = vld [vmem:[#allocation11 + $0x60] sm:$0xff]   ;;  %v5022_v21 = vld [vmem:[#allocation11 + $0x58] sm:$0xff]  }
 0x2e3   :  { %v4679_v37 = vpop.f32.mrf.mxu1  ;;  %v2966_v58 = vpack.c.bf16 %v6814_v33, %v6797_v41  ;;  %4398 = vmatprep.subr.bf16.mxu0 %v5016_v35  ;;  %v2993_v16 = vrot.slane %v6814_v33, 1  ;;  %v6836_v0 = vmax.f32 %v2942_v7, 0.0  ;;  %v5020_v35 = vld [vmem:[#allocation11 + $0x20] sm:$0xff]   ;;  %v3012_v24 = vsel %vm204_vm0, %v2994_v5, %v2995_v1 }
 0x2e4   :  { %v2894_v48 = vpop.f32.mrf.mxu0  ;;  %v6830_v31 = vmax.f32 %v2940_v49, 0.0  ;;  %v2943_v27 = vadd.f32 %v6741_v51, %v2920_v63  ;;  %v2701_v14 = vadd.f32 %v4679_v37, %v6704_v44  ;;  %4730 = vmatmul.mubr.bf16.vlgmr.msra.gmra.mxu1 %v3021_v34  ;;  %v2918_v52 = vadd.f32 %v2881_v46, %v2680_v6  ;;  %v5024_v63 = vld [vmem:[#allocation10 + $0xa0] sm:$0xff]   ;;  %v5023_v6 = vld [vmem:[#allocation11 + $0x18] sm:$0xff]  }
 0x2e5   :  { %4765 = vmatprep.mubr.bf16.mxu0 %v2966_v58  ;;  %4778 = vmatpush3.bf16.msra.mxu1 %v6625_v8  ;;  %v2692_v39 = vpop.f32.mrf.mxu1  ;;  %v3013_v23 = vsel %vm204_vm0, %v2993_v16, %v2994_v5  ;;  %v3014_v38 = vsel %vm204_vm0, %v2992_v26, %v2993_v16  ;;  %v2314_v44 = vmax.f32 %v6771_v57, %v2313_v30 }
 0x2e6   :  { %v2996_v61 = vrot.slane %v6830_v31, 1  ;;  %v6845_v12 = vmax.f32 %v2943_v27, 0.0  ;;  %v2923_v47 = vadd.f32 %v4711_v60, %v2701_v14  ;;  %4766 = vmatmul.mubr.bf16.gmra.mxu0 %v2967_v15  ;;  %4779 = vmatprep.subr.bf16.mxu1 %v5018_v25  ;;  %v2941_v32 = vadd.f32 %v6741_v51, %v2918_v52  ;;  %v4712_v8 = vpop.f32.mrf.mxu0 }
 0x2e7   :  { %v2693_v46 = vadd.f32 %v2692_v39, %v6711_v45  ;;  %4399 = vmatpush3.bf16.msra.mxu0 %v5017_v53  ;;  %v4680_v28 = vpop.f32.mrf.mxu1  ;;  %v3022_v29 = vpack.c.bf16 %v3013_v23, %v3014_v38  ;;  %v2328_v26 = vmax.f32 %v6795_v54, %v2327_v43  ;;  %v2334_v60 = vrot.slane %v6812_v11, 1  ;;  %v5025_v53 = vld [vmem:[#allocation11 + $0x50] sm:$0xff]   ;;  %v5027_v23 = vld [vmem:[#allocation10 + $0x98] sm:$0xff]  }
 0x2e8   :  { %v2946_v57 = vadd.f32 %v6741_v51, %v2923_v47  ;;  %v2704_v30 = vadd.f32 %v4680_v28, %v6721_v36  ;;  %4400 = vmatprep.subr.bf16.mxu0 %v5019_v3  ;;  %v6855_v40 = vmax.f32 %v2941_v32, 0.0  ;;  %v3011_v54 = vsel %vm204_vm0, %v2995_v1, %v2996_v61  ;;  %v2897_v5 = vpop.f32.mrf.mxu0  ;;  %v5028_v32 = vld [vmem:[#allocation11 + $0x48] sm:$0xff]  }
 0x2e9   :  { %v2921_v45 = vadd.f32 %v2894_v48, %v2693_v46  ;;  %4733 = vmatprep.mubr.bf16.mxu1 %v3022_v29  ;;  %4780 = vmatpush3.bf16.msra.mxu1 %v5018_v25  ;;  %v2695_v7 = vpop.f32.mrf.mxu1  ;;  %v2998_v43 = vrot.slane %v6836_v0, 1  ;;  %v2999_v36 = vrot.slane %v6845_v12, 1  ;;  %v3023_v49 = vpack.c.bf16 %v3011_v54, %v3012_v24 }
 0x2ea   :  { %v2924_v4 = vadd.f32 %v4712_v8, %v2704_v30  ;;  %v2696_v13 = vadd.f32 %v2695_v7, %v6724_v50  ;;  %4781 = vmatprep.subr.bf16.mxu1 %v5021_v59  ;;  %v2968_v25 = vpack.c.bf16 %v6855_v40, %v6830_v31  ;;  %v2969_v1 = vpack.c.bf16 %v6845_v12, %v6836_v0 }
 0x2eb   :  { %v2944_v34 = vadd.f32 %v6741_v51, %v2921_v45  ;;  %4401 = vmatpush3.bf16.msra.mxu0 %v5020_v35  ;;  %v2997_v48 = vrot.slane %v6855_v40, 1  ;;  %v6868_v37 = vmax.f32 %v2946_v57, 0.0  ;;  %v3700_v16 = vsel %vm3680_vm6, %v2314_v44, %v6769_v42  ;;  %v5026_v44 = vld [vmem:[#allocation11 + $0x10] sm:$0xff]   ;;  %v5029_v57 = vld [vmem:[#allocation11 + $0x8] sm:$0xff]  }
 0x2ec   :  { %v2947_v50 = vadd.f32 %v6741_v51, %v2924_v4  ;;  %v2922_v58 = vadd.f32 %v2897_v5, %v2696_v13  ;;  %4734 = vmatmul.mubr.bf16.gmra.mxu1 %v3023_v49  ;;  %4402 = vmatprep.subr.bf16.mxu0 %v5022_v21  ;;  %v3701_v3 = vsel %vm3682_vm7, %v6805_v19, %v3700_v16  ;;  %v3336_v45 = vrot.slane %v6774_v56, 2  ;;  %v5032_v13 = vld [vmem:[#allocation11] sm:$0xff]  }
 0x2ed   :  { %v6873_v27 = vmax.f32 %v2944_v34, 0.0  ;;  %4769 = vmatprep.mubr.bf16.mxu0 %v2968_v25  ;;  %4782 = vmatpush3.bf16.msra.mxu1 %v5021_v59  ;;  %v3009_v14 = vsel %vm204_vm0, %v2997_v48, %v2998_v43  ;;  %v3010_v15 = vsel %vm204_vm0, %v2996_v61, %v2997_v48  ;;  %v3702_v47 = vsel %vm3684_vm8, %v2328_v26, %v3701_v3  ;;  %v5034_v5 = vld [vmem:[#allocation10 + $0x80] sm:$0xff]  }
 0x2ee   :  { %v2945_v52 = vadd.f32 %v6741_v51, %v2922_v58  ;;  %4770 = vmatmul.mubr.bf16.gmra.mxu0 %v2969_v1  ;;  %v3024_v39 = vpack.c.bf16 %v3009_v14, %v3010_v15  ;;  %4783 = vmatprep.subr.bf16.mxu1 %v5024_v63  ;;  %v6883_v38 = vmax.f32 %v2947_v50, 0.0  ;;  %v2335_v19 = vmax.f32 %v6812_v11, %v2334_v60  ;;  %v5030_v11 = vld [vmem:[#allocation10 + $0x90] sm:$0xff]   ;;  %v5031_v60 = vld [vmem:[#allocation11 + $0x40] sm:$0xff]  }
 0x2ef   :  { %v3000_v42 = vrot.slane %v6873_v27, 1  ;;  %4403 = vmatpush3.bf16.msra.mxu0 %v5023_v6  ;;  %v3008_v61 = vsel %vm204_vm0, %v2998_v43, %v2999_v36  ;;  %v3002_v8 = vrot.slane %v6868_v37, 1  ;;  %v5033_v43 = vld [vmem:[#allocation10 + $0x88] sm:$0xff]   ;;  %v3337_v4 = vrot.slane %v6755_v62, 2 }
 0x2f0   :  { %v6886_v59 = vmax.f32 %v2945_v52, 0.0  ;;  %4737 = vmatprep.mubr.bf16.mxu1 %v3024_v39  ;;  %4404 = vmatprep.subr.bf16.mxu0 %v5025_v53  ;;  %v3703_v29 = vsel %vm3686_vm9, %v2335_v19, %v3702_v47  ;;  %v3003_v26 = vrot.slane %v6883_v38, 1  ;;  %v2971_v30 = vpack.c.bf16 %v6883_v38, %v6868_v37 }
 0x2f1   :  { %4784 = vmatpush3.bf16.msra.mxu1 %v5024_v63  ;;  %v3007_v51 = vsel %vm204_vm0, %v2999_v36, %v3000_v42  ;;  %v3722_v7 = vpack.c.bf16 %v3703_v29, %v3703_v29  ;;  %v3335_v36 = vrot.slane %v6761_v9, 2  ;;  %v3364_v63 = vsel %vm1002_vm1, %v3336_v45, %v3337_v4  ;;  %v5036_v29 = vld [vmem:[#allocation11 + $0xb0] sm:$0xff]   ;;  %v5039_v9 = vld [vmem:[#allocation11 + $0x98] sm:$0xff]  }
 0x2f2   :  { %v3025_v46 = vpack.c.bf16 %v3007_v51, %v3008_v61  ;;  %4785 = vmatprep.subr.bf16.mxu1 %v5027_v23  ;;  %v2970_v28 = vpack.c.bf16 %v6886_v59, %v6873_v27  ;;  %v3001_v35 = vrot.slane %v6886_v59, 1  ;;  %v3004_v49 = vsel %vm204_vm0, %v3002_v8, %v3003_v26 }
 0x2f3   :  { %4405 = vmatpush3.bf16.msra.mxu0 %v5026_v44  ;;  %v3019_v56 = vsel %vm204_vm0, %v3003_v26, %v2988_v10  ;;  %v3365_v62 = vsel %vm1002_vm1, %v3335_v36, %v3336_v45  ;;  %v3339_v25 = vrot.slane %v6797_v41, 2  ;;  %v3721_v10 = vpack.c.bf16 %v6582_v2, %v6582_v2  ;;  %v5042_v26 = vld [vmem:[#allocation11 + $0x80] sm:$0xff]  }
 0x2f4   :  { %4738 = vmatmul.mubr.bf16.gmra.mxu1 %v3025_v46  ;;  %4773 = vmatprep.mubr.bf16.mxu0 %v2970_v28  ;;  %v3005_v24 = vsel %vm204_vm0, %v3001_v35, %v3002_v8  ;;  %v3006_v21 = vsel %vm204_vm0, %v3000_v42, %v3001_v35  ;;  %v3027_v34 = vpack.c.bf16 %v3019_v56, %v3004_v49  ;;  %v3340_v6 = vrot.slane %v6814_v33, 2  ;;  %v5035_v46 = vld [vmem:[#allocation11 + $0xb8] sm:$0xff]   ;;  %v5038_v35 = vld [vmem:[#allocation11 + $0xa0] sm:$0xff]  }
 0x2f5   :  { %4786 = vmatpush3.bf16.msra.mxu1 %v5027_v23  ;;  %4406 = vmatprep.subr.bf16.mxu0 %v5028_v32  ;;  %v3026_v54 = vpack.c.bf16 %v3005_v24, %v3006_v21  ;;  %v3367_v1 = vpack.c.bf16 %v3364_v63, %v3365_v62  ;;  %v3338_v48 = vrot.slane %v6766_v17, 2  ;;  %v3341_v50 = vrot.slane %v6800_v22, 2 }
 0x2f6   :  { %4774 = vmatmul.mubr.bf16.gmra.mxu0 %v2971_v30  ;;  %4787 = vmatprep.subr.bf16.mxu1 %v5030_v11  ;;  %v3361_v2 = vsel %vm1002_vm1, %v3339_v25, %v3340_v6  ;;  %v3343_v53 = vrot.slane %v6830_v31, 2  ;;  %v3344_v22 = vrot.slane %v6855_v40, 2  ;;  %v3342_v14 = vrot.slane %v6809_v20, 2 }
 0x2f7   :  { %4407 = vmatpush3.bf16.msra.mxu0 %v5029_v57  ;;  %3955 = vmatprep.mubr.bf16.mxu0 %v3722_v7  ;;  %v3362_v58 = vsel %vm1002_vm1, %v3338_v48, %v3339_v25  ;;  %v3360_v41 = vsel %vm1002_vm1, %v3340_v6, %v3341_v50  ;;  %v3363_v33 = vsel %vm1002_vm1, %v3337_v4, %v3338_v48  ;;  %v3345_v15 = vrot.slane %v6836_v0, 2 }
 0x2f8   :  { %4741 = vmatprep.mubr.bf16.mxu1 %v3026_v54  ;;  %4408 = vmatprep.subr.bf16.mxu0 %v5031_v60  ;;  %v3368_v17 = vpack.c.bf16 %v3362_v58, %v3363_v33  ;;  %v3369_v16 = vpack.c.bf16 %v3360_v41, %v3361_v2  ;;  %v3358_v3 = vsel %vm1002_vm1, %v3342_v14, %v3343_v53  ;;  %v3347_v40 = vrot.slane %v6873_v27, 2 }
 0x2f9   :  { %4788 = vmatpush3.bf16.msra.mxu1 %v5030_v11  ;;  %v3356_v52 = vsel %vm1002_vm1, %v3344_v22, %v3345_v15  ;;  %v3357_v39 = vsel %vm1002_vm1, %v3343_v53, %v3344_v22  ;;  %v3359_v31 = vsel %vm1002_vm1, %v3341_v50, %v3342_v14  ;;  %v3348_v20 = vrot.slane %v6886_v59, 2  ;;  %v5041_v11 = vld [vmem:[#allocation11 + $0x88] sm:$0xff]  }
 0x2fa   :  { %4789 = vmatprep.subr.bf16.mxu1 %v5033_v43  ;;  %v3370_v23 = vpack.c.bf16 %v3358_v3, %v3359_v31  ;;  %v3371_v42 = vpack.c.bf16 %v3356_v52, %v3357_v39  ;;  %v3346_v0 = vrot.slane %v6845_v12, 2  ;;  %v3349_v44 = vrot.slane %v6868_v37, 2 }
 0x2fb   :  { %4409 = vmatpush3.bf16.msra.mxu0 %v5032_v13  ;;  %v3353_v51 = vsel %vm1002_vm1, %v3347_v40, %v3348_v20  ;;  %v3350_v59 = vrot.slane %v6883_v38, 2  ;;  %v5212_v28 = vmov 0.0   ;;  %v5037_v38 = vld [vmem:[#allocation11 + $0xa8] sm:$0xff]  }
 0x2fc   :  { %4742 = vmatmul.mubr.bf16.gmra.mxu1 %v3027_v34  ;;  %v3354_v47 = vsel %vm1002_vm1, %v3346_v0, %v3347_v40  ;;  %v3352_v19 = vsel %vm1002_vm1, %v3348_v20, %v3349_v44  ;;  %v3355_v27 = vsel %vm1002_vm1, %v3345_v15, %v3346_v0 }
 0x2fd   :  { %4790 = vmatpush3.bf16.msra.mxu1 %v5033_v43  ;;  %4793 = vmatprep.mubr.bf16.mxu1 %v3367_v1  ;;  %v3372_v61 = vpack.c.bf16 %v3354_v47, %v3355_v27  ;;  %v3373_v32 = vpack.c.bf16 %v3352_v19, %v3353_v51  ;;  %v3351_v12 = vsel %vm1002_vm1, %v3349_v44, %v3350_v59  ;;  %v6996_v27 = vld [vmem:[%s7066_s8] ss:$0 sm:$0xff] }
 0x2fe   :  { %3956 = vmatmul.mubr.bf16.vlgmr.msra.gmra.mxu0 %v3721_v10  ;;  %4791 = vmatprep.subr.bf16.mxu1 %v5034_v5  ;;  %v3366_v37 = vsel %vm1002_vm1, %v3350_v59, %v3335_v36 }
 0x2ff   :  { %v3374_v8 = vpack.c.bf16 %v3366_v37, %v3351_v12 }
 0x301   :  { %4792 = vmatpush3.bf16.msra.mxu1 %v5034_v5 }
 0x302   :  { %4809 = vmatprep.subr.bf16.mxu1 %v5212_v28 }
 0x304   :  { %4794 = vmatmul.mubr.bf16.vlgmr.msra.gmra.mxu1 %v3368_v17 }
 0x305   :  { %4797 = vmatprep.mubr.bf16.mxu1 %v3369_v16  ;;  %4810 = vmatpush3.bf16.msra.mxu1 %v5035_v46 }
 0x306   :  { %4811 = vmatprep.subr.bf16.mxu1 %v5212_v28 }
 0x309   :  { %4812 = vmatpush3.bf16.msra.mxu1 %v5036_v29 }
 0x30a   :  { %4813 = vmatprep.subr.bf16.mxu1 %v5212_v28 }
 0x30c   :  { %4798 = vmatmul.mubr.bf16.gmra.mxu1 %v3370_v23 }
 0x30d   :  { %4801 = vmatprep.mubr.bf16.mxu1 %v3371_v42  ;;  %4814 = vmatpush3.bf16.msra.mxu1 %v5037_v38 }
 0x30e   :  { %4815 = vmatprep.subr.bf16.mxu1 %v5212_v28 }
 0x311   :  { %4816 = vmatpush3.bf16.msra.mxu1 %v5038_v35 }
 0x312   :  { %4817 = vmatprep.subr.bf16.mxu1 %v5212_v28 }
 0x314   :  { %4802 = vmatmul.mubr.bf16.gmra.mxu1 %v3372_v61 }
 0x315   :  { %4805 = vmatprep.mubr.bf16.mxu1 %v3373_v32  ;;  %4818 = vmatpush3.bf16.msra.mxu1 %v5039_v9 }
 0x316   :  { %4819 = vmatprep.subr.bf16.mxu1 %v5212_v28 }
 0x319   :  { %4820 = vmatpush3.bf16.msra.mxu1 %v5040_v18 }
 0x31a   :  { %4821 = vmatprep.subr.bf16.mxu1 %v5212_v28 }
 0x31c   :  { %4806 = vmatmul.mubr.bf16.gmra.mxu1 %v3374_v8 }
 0x31d   :  { %4825 = vmatprep.mubr.msk.bf16.mxu1 %vm5213_vm11, %v5212_v28  ;;  %4822 = vmatpush3.bf16.msra.mxu1 %v5041_v11 }
 0x31e   :  { %4823 = vmatprep.subr.bf16.mxu1 %v5212_v28 }
 0x321   :  { %4824 = vmatpush3.bf16.msra.mxu1 %v5042_v26 }
 0x39d   :  { %v4763_v57 = vpop.f32.mrf.mxu0 }
 0x39f   :  { %v3272_v30 = vpop.f32.mrf.mxu0 }
 0x3a1   :  { %v4764_v24 = vpop.f32.mrf.mxu0 }
 0x3a3   :  { %v3275_v21 = vpop.f32.mrf.mxu0 }
 0x3a4   :  { %v4731_v60 = vpop.f32.mrf.mxu1 }
 0x3a5   :  { %v3281_v40 = vadd.f32 %v4763_v57, %v4731_v60 }
 0x3a6   :  { %v3127_v45 = vpop.f32.mrf.mxu1  ;;  %v4767_v7 = vpop.f32.mrf.mxu0 }
 0x3a7   :  { %v3273_v42 = vadd.f32 %v3272_v30, %v3127_v45 }
 0x3a8   :  { %v4732_v54 = vpop.f32.mrf.mxu1  ;;  %v3288_v43 = vpop.f32.mrf.mxu0 }
 0x3a9   :  { %v3284_v20 = vadd.f32 %v4764_v24, %v4732_v54 }
 0x3aa   :  { %v3130_v36 = vpop.f32.mrf.mxu1  ;;  %v4768_v4 = vpop.f32.mrf.mxu0 }
 0x3ab   :  { %v3276_v44 = vadd.f32 %v3275_v21, %v3130_v36 }
 0x3ac   :  { %v4735_v13 = vpop.f32.mrf.mxu1  ;;  %v3291_v49 = vpop.f32.mrf.mxu0 }
 0x3ad   :  { %v3297_v12 = vadd.f32 %v4767_v7, %v4735_v13 }
 0x3ae   :  { %v3143_v56 = vpop.f32.mrf.mxu1  ;;  %v6965_v63 = vpop.f32.mrf.mxu0 }
 0x3af   :  { %v3289_v38 = vadd.f32 %v3288_v43, %v3143_v56 }
 0x3b0   :  { %v4736_v62 = vpop.f32.mrf.mxu1  ;;  %v6967_v34 = vpop.f32.mrf.mxu0 }
 0x3b1   :  { %v3300_v18 = vadd.f32 %v4768_v4, %v4736_v62 }
 0x3b2   :  { %v3146_v5 = vpop.f32.mrf.mxu1  ;;  %v6969_v25 = vpop.f32.mrf.mxu0 }
 0x3b3   :  { %v3292_v26 = vadd.f32 %v3291_v49, %v3146_v5 }
 0x3b4   :  { %v4739_v1 = vpop.f32.mrf.mxu1  ;;  %v6971_v10 = vpop.f32.mrf.mxu0 }
 0x3b5   :  { %v3313_v49 = vadd.f32 %v6965_v63, %v4739_v1 }
 0x3b6   :  { %v3159_v6 = vpop.f32.mrf.mxu1  ;;  %v6973_v48 = vpop.f32.mrf.mxu0 }
 0x3b8   :  { %v4740_v50 = vpop.f32.mrf.mxu1  ;;  %v6975_v58 = vpop.f32.mrf.mxu0 }
 0x3ba   :  { %v6977_v41 = vpop.f32.mrf.mxu1  ;;  %v6979_v2 = vpop.f32.mrf.mxu0 }
 0x3bc   :  { %v6981_v33 = vpop.f32.mrf.mxu1  ;;  %v6983_v17 = vpop.f32.mrf.mxu0 }
 0x3be   :  { %v6985_v53 = vpop.f32.mrf.mxu1  ;;  %v4410_v16 = vpop.f32.mrf.mxu0 }
 0x3c0   :  { %v6987_v22 = vpop.f32.mrf.mxu1  ;;  %v4411_v14 = vpop.f32.mrf.mxu0 }
 0x3c1   :  { %v6989_v15 = vadd.f32 %v4411_v14, %v4410_v16 }
 0x3c2   :  { %v6991_v3 = vpop.f32.mrf.mxu1  ;;  %v4413_v52 = vpop.f32.mrf.mxu0 }
 0x3c3   :  { %v3305_v52 = vadd.f32 %v6967_v34, %v3159_v6 }
 0x3c4   :  { %v4795_v39 = vpop.f32.mrf.mxu1  ;;  %v4414_v31 = vpop.f32.mrf.mxu0 }
 0x3c5   :  { %v3539_v47 = vadd.f32 %v4795_v39, %v3281_v40  ;;  %v3316_v39 = vadd.f32 %v6969_v25, %v4740_v50 }
 0x3c6   :  { %v3474_v23 = vpop.f32.mrf.mxu1 }
 0x3c7   :  { %v3537_v19 = vadd.f32 %v3474_v23, %v3273_v42  ;;  %v3562_v8 = vadd.f32 %v6996_v27, %v3539_v47 }
 0x3c8   :  { %v4796_v0 = vpop.f32.mrf.mxu1 }
 0x3c9   :  { %v3540_v51 = vadd.f32 %v4796_v0, %v3284_v20  ;;  %v3560_v46 = vadd.f32 %v6996_v27, %v3537_v19  ;;  %v3578_v21 = vmax.f32 %v3562_v8, 0.0  ;;  %v3308_v19 = vadd.f32 %v6971_v10, %v6977_v41 }
 0x3ca   :  { %v3477_v61 = vpop.f32.mrf.mxu1  ;;  %v3329_v8 = vadd.f32 %v6973_v48, %v6981_v33 }
 0x3cb   :  { %v3563_v59 = vadd.f32 %v6996_v27, %v3540_v51  ;;  %v3538_v32 = vadd.f32 %v3477_v61, %v3276_v44  ;;  %v3576_v60 = vmax.f32 %v3560_v46, 0.0 }
 0x3cc   :  { %v4799_v37 = vpop.f32.mrf.mxu1 }
 0x3cd   :  { %v3579_v28 = vmax.f32 %v3563_v59, 0.0  ;;  %v3561_v29 = vadd.f32 %v6996_v27, %v3538_v32  ;;  %v3543_v35 = vadd.f32 %v4799_v37, %v3297_v12 }
 0x3ce   :  { %v3490_v9 = vpop.f32.mrf.mxu1 }
 0x3cf   :  { %v3577_v11 = vmax.f32 %v3561_v29, 0.0  ;;  %v3597_v57 = vsel %vm3593_vm12, %v3579_v28, -inf  ;;  %v3541_v30 = vadd.f32 %v3490_v9, %v3289_v38  ;;  %v3566_v54 = vadd.f32 %v6996_v27, %v3543_v35 }
 0x3d0   :  { %v4800_v24 = vpop.f32.mrf.mxu1  ;;  %v3617_v43 = vmax.f32 %v3578_v21, %v3597_v57  ;;  %v3321_v28 = vadd.f32 %v6975_v58, %v6985_v53  ;;  %v3332_v9 = vadd.f32 %v6979_v2, %v6987_v22 }
 0x3d1   :  { %v3595_v45 = vsel %vm3593_vm12, %v3577_v11, -inf  ;;  %v3544_v7 = vadd.f32 %v4800_v24, %v3300_v18  ;;  %v3564_v62 = vadd.f32 %v6996_v27, %v3541_v30  ;;  %v3582_v31 = vmax.f32 %v3566_v54, 0.0 }
 0x3d2   :  { %v3493_v36 = vpop.f32.mrf.mxu1  ;;  %v3610_v13 = vmax.f32 %v3576_v60, %v3595_v45  ;;  %v3618_v42 = vrot.slane %v3617_v43, 4 }
 0x3d3   :  { %v3567_v4 = vadd.f32 %v6996_v27, %v3544_v7  ;;  %v3542_v56 = vadd.f32 %v3493_v36, %v3292_v26  ;;  %v3580_v63 = vmax.f32 %v3564_v62, 0.0  ;;  %v3324_v7 = vadd.f32 %v6983_v17, %v6991_v3 }
 0x3d4   :  { %v4803_v5 = vpop.f32.mrf.mxu1  ;;  %v3611_v20 = vrot.slane %v3610_v13, 4  ;;  %v3619_v59 = vmax.f32 %v3617_v43, %v3618_v42 }
 0x3d5   :  { %v3583_v16 = vmax.f32 %v3567_v4, 0.0  ;;  %v3565_v14 = vadd.f32 %v6996_v27, %v3542_v56  ;;  %v3547_v23 = vadd.f32 %v4803_v5, %v3313_v49 }
 0x3d6   :  { %v3506_v40 = vpop.f32.mrf.mxu1  ;;  %v3612_v32 = vmax.f32 %v3610_v13, %v3611_v20  ;;  %v3620_v30 = vrot.slane %v3619_v59, 2 }
 0x3d7   :  { %v3601_v0 = vsel %vm3593_vm12, %v3583_v16, -inf  ;;  %v3581_v44 = vmax.f32 %v3565_v14, 0.0  ;;  %v3545_v1 = vadd.f32 %v3506_v40, %v3305_v52  ;;  %v3570_v50 = vadd.f32 %v6996_v27, %v3547_v23 }
 0x3d8   :  { %v4804_v47 = vpop.f32.mrf.mxu1  ;;  %v3631_v51 = vmax.f32 %v3582_v31, %v3601_v0  ;;  %v3613_v48 = vrot.slane %v3612_v32, 2  ;;  %v3621_v5 = vmax.f32 %v3619_v59, %v3620_v30 }
 0x3d9   :  { %v3599_v34 = vsel %vm3593_vm12, %v3581_v44, -inf  ;;  %v3548_v25 = vadd.f32 %v4804_v47, %v3316_v39  ;;  %v3568_v10 = vadd.f32 %v6996_v27, %v3545_v1  ;;  %v3586_v11 = vmax.f32 %v3570_v50, 0.0 }
 0x3da   :  { %v3624_v6 = vmax.f32 %v3580_v63, %v3599_v34  ;;  %v3509_v61 = vpop.f32.mrf.mxu1  ;;  %v3632_v29 = vrot.slane %v3631_v51, 4  ;;  %v3614_v56 = vmax.f32 %v3612_v32, %v3613_v48 }
 0x3db   :  { %v3571_v12 = vadd.f32 %v6996_v27, %v3548_v25  ;;  %v3546_v37 = vadd.f32 %v3509_v61, %v3308_v19  ;;  %v3584_v60 = vmax.f32 %v3568_v10, 0.0  ;;  %v3622_v19 = vrot.slane %v3621_v5, 1 }
 0x3dc   :  { %v3625_v46 = vrot.slane %v3624_v6, 4  ;;  %v4807_v41 = vpop.f32.mrf.mxu1  ;;  %v3633_v54 = vmax.f32 %v3631_v51, %v3632_v29  ;;  %v3615_v42 = vrot.slane %v3614_v56, 1 }
 0x3dd   :  { %v3587_v38 = vmax.f32 %v3571_v12, 0.0  ;;  %v3569_v35 = vadd.f32 %v6996_v27, %v3546_v37  ;;  %v3551_v26 = vadd.f32 %v4807_v41, %v3329_v8  ;;  %v3623_v8 = vmax.f32 %v3621_v5, %v3622_v19 }
 0x3de   :  { %v3626_v18 = vmax.f32 %v3624_v6, %v3625_v46  ;;  %v3522_v57 = vpop.f32.mrf.mxu1  ;;  %v3634_v17 = vrot.slane %v3633_v54, 2  ;;  %v3616_v61 = vmax.f32 %v3614_v56, %v3615_v42 }
 0x3df   :  { %v3605_v33 = vsel %vm3593_vm12, %v3587_v38, -inf  ;;  %v3585_v24 = vmax.f32 %v3569_v35, 0.0  ;;  %v3549_v53 = vadd.f32 %v3522_v57, %v3321_v28  ;;  %v3574_v13 = vadd.f32 %v6996_v27, %v3551_v26 }
 0x3e0   :  { %v3627_v21 = vrot.slane %v3626_v18, 2  ;;  %v3645_v58 = vmax.f32 %v3586_v11, %v3605_v33  ;;  %v4808_v45 = vpop.f32.mrf.mxu1  ;;  %v3635_v51 = vmax.f32 %v3633_v54, %v3634_v17  ;;  %v3713_v29 = vsel %vm3674_vm3, %v3623_v8, %v3616_v61  ;;  %v4177_v54 = vld [vmem:[%s7068_s10] ss:$0 sm:$0xff] }
 0x3e1   :  { %v3603_v2 = vsel %vm3593_vm12, %v3585_v24, -inf  ;;  %v3552_v22 = vadd.f32 %v4808_v45, %v3332_v9  ;;  %v3572_v52 = vadd.f32 %v6996_v27, %v3549_v53  ;;  %v3590_v40 = vmax.f32 %v3574_v13, 0.0 }
 0x3e2   :  { %v3646_v36 = vrot.slane %v3645_v58, 4  ;;  %v3638_v43 = vmax.f32 %v3584_v60, %v3603_v2  ;;  %v3525_v4 = vpop.f32.mrf.mxu1  ;;  %v3628_v16 = vmax.f32 %v3626_v18, %v3627_v21  ;;  %v3636_v46 = vrot.slane %v3635_v51, 1 }
 0x3e3   :  { %v3575_v49 = vadd.f32 %v6996_v27, %v3552_v22  ;;  %v3550_v62 = vadd.f32 %v3525_v4, %v3324_v7  ;;  %v3588_v1 = vmax.f32 %v3572_v52, 0.0  ;;  %v3958_v2 = vadd.f32 %v6989_v15, %v4177_v54 }
 0x3e4   :  { %v3639_v14 = vrot.slane %v3638_v43, 4  ;;  %v3647_v3 = vmax.f32 %v3645_v58, %v3646_v36  ;;  %v3629_v44 = vrot.slane %v3628_v16, 1  ;;  %v3637_v18 = vmax.f32 %v3635_v51, %v3636_v46 }
 0x3e5   :  { %v3591_v39 = vmax.f32 %v3575_v49, 0.0  ;;  %v3573_v31 = vadd.f32 %v6996_v27, %v3550_v62 }
 0x3e6   :  { %v3640_v23 = vmax.f32 %v3638_v43, %v3639_v14  ;;  %v3648_v34 = vrot.slane %v3647_v3, 2  ;;  %v3630_v59 = vmax.f32 %v3628_v16, %v3629_v44 }
 0x3e7   :  { %v3609_v20 = vsel %vm3593_vm12, %v3591_v39, -inf  ;;  %v3589_v0 = vmax.f32 %v3573_v31, 0.0 }
 0x3e8   :  { %v3641_v63 = vrot.slane %v3640_v23, 2  ;;  %v3659_v47 = vmax.f32 %v3590_v40, %v3609_v20  ;;  %v3649_v10 = vmax.f32 %v3647_v3, %v3648_v34  ;;  %v3714_v38 = vsel %vm3676_vm4, %v3630_v59, %v3713_v29 }
 0x3e9   :  { %v3607_v25 = vsel %vm3593_vm12, %v3589_v0, -inf  ;;  %v3715_v57 = vsel %vm3678_vm5, %v3637_v18, %v3714_v38 }
 0x3ea   :  { %v3642_v6 = vmax.f32 %v3640_v23, %v3641_v63  ;;  %v3660_v50 = vrot.slane %v3659_v47, 4  ;;  %v3652_v27 = vmax.f32 %v3588_v1, %v3607_v25  ;;  %v3650_v11 = vrot.slane %v3649_v10, 1 }
 0x3ec   :  { %v3643_v32 = vrot.slane %v3642_v6, 1  ;;  %v3661_v12 = vmax.f32 %v3659_v47, %v3660_v50  ;;  %v3653_v37 = vrot.slane %v3652_v27, 4  ;;  %v3651_v24 = vmax.f32 %v3649_v10, %v3650_v11 }
 0x3ee   :  { %v3662_v41 = vrot.slane %v3661_v12, 2  ;;  %v3654_v28 = vmax.f32 %v3652_v27, %v3653_v37  ;;  %v3644_v35 = vmax.f32 %v3642_v6, %v3643_v32 }
 0x3f0   :  { %v3663_v55 = vmax.f32 %v3661_v12, %v3662_v41  ;;  %v3655_v9 = vrot.slane %v3654_v28, 2  ;;  %v3716_v48 = vsel %vm3680_vm6, %v3644_v35, %v3715_v57 }
 0x3f1   :  { %v3717_v58 = vsel %vm3682_vm7, %v3651_v24, %v3716_v48 }
 0x3f2   :  { %v3656_v26 = vmax.f32 %v3654_v28, %v3655_v9  ;;  %v3664_v30 = vrot.slane %v3663_v55, 1 }
 0x3f4   :  { %v3657_v33 = vrot.slane %v3656_v26, 1  ;;  %v3665_v60 = vmax.f32 %v3663_v55, %v3664_v30 }
 0x3f6   :  { %v3658_v21 = vmax.f32 %v3656_v26, %v3657_v33 }
 0x3f8   :  { %v3718_v53 = vsel %vm3684_vm8, %v3658_v21, %v3717_v58 }
 0x3f9   :  { %v3719_v45 = vsel %vm3686_vm9, %v3665_v60, %v3718_v53 }
 0x3fa   :  { %v3723_v7 = vpack.c.bf16 %v3719_v45, %v3719_v45 }
 0x3fc   :  { %4826 = vmatmul.mubr.bf16.vlgmr.msra.gmra.mxu1 %v3723_v7 }
 0x4bc   :  { %v3997_v22 = vpop.f32.mrf.mxu1 }
 0x4bd   :  { %v3998_v36 = vadd.f32 %v3997_v22, %v3958_v2 }
 0x4be   :  { %v4827_v43 = vpop.f32.mrf.mxu1 }
 0x4bf   :  { %4003 = vst [vmem:[#allocation13] sm:$0xff] %v3998_v36 }
 0x4c0   :  { %v4000_v13 = vpop.f32.mrf.mxu1 }
 0x4c1   :  { %5182 = shalt.err (!%p5179_p6)
}
 0x4c2   :  { %4013 = dma.vmem_to_hbm [thread:$0]  %s4011_s1, 128, %s7069_s11, [#allocation4]   ;;  %v4828_v4 = vpop.f32.mrf.mxu1 }
 0x4c3   :  { %5199 = dma.done.wait [#allocation4], 128  }
 0x4c4   :  { %5200 = vsyncadd [#allocation4], 4294967168 }
 0x4c5   :  { %4017 = vsyncpa [#allocation3], 1 }
 0x4c6   :  { %4018 = vsyncpa [#allocation6], 1 }
 0x4c7   :  { %4019 = vsyncpa [#allocation9], 1 }
 0x4c8   :  { %4020 = vsyncpa [#allocation12], 1 }
 0x4c9   :  { %4021 = vsyncpa [#allocation4], 1 }

</bundles_post_ra>
